<compile_context>
chip_gen: v7x
topology: tpu7x:2x2x1
jax: 0.10.0
libtpu: 0.0.40
codegen_flags: <defaults>
</compile_context>

<pallas_src>
import functools

import numpy as np
import jax
import jax.numpy as jnp
from jax import lax
from jax.experimental import pallas as pl
from jax.experimental.pallas import tpu as pltpu


# ----------------------------------------------------------------------------
# Small host-side helpers
# ----------------------------------------------------------------------------
def _round_up(x, m):
    return ((x + m - 1) // m) * m


def _device_kind():
    try:
        return jax.devices()[0].device_kind.lower()
    except Exception:
        return ""


def _default_tanh_dtype():
    kind = _device_kind()
    # v5e / v4 and older have no bf16 EUP -> keep tanh in f32 there.
    if any(tag in kind for tag in ("v2", "v3", "v4", "v5")):
        return jnp.float32
    return jnp.bfloat16


def _num_tensorcores():
    kind = _device_kind()
    # Dual-TensorCore chips (megacore v4/v5p, v7x): ensure >=2 batch tiles.
    if any(tag in kind for tag in ("v4", "v5p", "v7", "tpu7", "7x")):
        return 2
    return 1


# ----------------------------------------------------------------------------
# Pallas kernel: chunked Euler–Maruyama walk with inline frame interpolation
# ----------------------------------------------------------------------------
def _sde_euler_kernel(x0_ref, w_ref, dw_ref, out_ref, x_ref, frames_ref, *,
                      chunk_schedules, dim_pad, matmul_dtype, tanh_dtype):
    # x0_ref    : (bt, dim_pad)                 f32  initial state tile (+ constant-1 lane)
    # w_ref     : (dim_pad, 2*dim_pad)          bf16 fused [Wd^T | Wg^T] with bias row
    # dw_ref    : (1, chunk, bt, dim_pad)       bf16 Brownian increments (sqrt(dt)-scaled)
    # out_ref   : (num_frames, bt, dim_pad)          interpolated frames (written at last chunk)
    # x_ref     : (bt, dim_pad)                 f32  VMEM scratch: Euler state (carried over chunks)
    # frames_ref: (num_frames, bt, dim_pad)     f32  VMEM scratch: frame accumulator
    s = pl.program_id(1)

    @pl.when(s == 0)
    def _init():
        x0 = x0_ref[...]
        x_ref[...] = x0
        frames_ref[0] = x0                      # ys[0] = y0 exactly

    w = w_ref[...]
    for c, steps in enumerate(chunk_schedules):
        @pl.when(s == c)
        def _chunk(steps=steps):
            x = x_ref[...]
            # Fully unrolled chunk: dt_k, interpolation weights and frame indices are
            # compile-time constants, so the scheduler sees the whole dependency chain.
            for k_local, dt_k, frames in steps:
                pre = jnp.dot(x.astype(matmul_dtype), w,
                              preferred_element_type=jnp.float32)     # (bt, 2*dim_pad)
                act = jnp.tanh(pre.astype(tanh_dtype)).astype(jnp.float32)
                drift = act[:, :dim_pad]        # f(t, x) = tanh(x @ Wd^T + bd)
                diffusion = act[:, dim_pad:]    # g(t, x) = tanh(x @ Wg^T + bg)  (diagonal)
                x_new = (x + drift * dt_k
                         + diffusion * dw_ref[0, k_local].astype(jnp.float32))
                # Frames bracketed by [t_k, t_{k+1}]: linear interpolation.
                for fi, wgt in frames:
                    frames_ref[fi] = x + (x_new - x) * wgt
                x = x_new
            x_ref[...] = x

    @pl.when(s == pl.num_programs(1) - 1)
    def _finalize():
        out_ref[...] = frames_ref[...].astype(out_ref.dtype)


# ----------------------------------------------------------------------------
# Host-side schedule (mirrors torchsde fixed-step Euler walk + linear interp)
# ----------------------------------------------------------------------------
def _build_schedule(num_frames, dt):
    ts = np.linspace(0.0, 1.0, num_frames).astype(np.float64)
    t0, t_end = float(ts[0]), float(ts[-1])
    n_steps = int(np.ceil((t_end - t0) / dt - 1e-12))
    grid = t0 + dt * np.arange(n_steps + 1, dtype=np.float64)
    grid[-1] = t_end                                     # clip final step to ts[-1]
    # Merge a degenerate near-zero final interval into the previous step.
    if len(grid) > 2 and (grid[-1] - grid[-2]) < 1e-3 * dt:
        grid = np.delete(grid, -2)
    n_steps = len(grid) - 1
    dts = grid[1:] - grid[:-1]

    prev_idx = np.zeros((num_frames,), dtype=np.int32)
    weights = np.zeros((num_frames,), dtype=np.float64)
    for i, out_t in enumerate(ts):
        if i == 0:
            continue                                     # ys[0] = y0 exactly
        k = min(int(np.searchsorted(grid, out_t, side="left")), n_steps)
        p = k - 1
        prev_idx[i] = p
        weights[i] = (out_t - grid[p]) / (grid[k] - grid[p])
    return dts, prev_idx, weights


def _chunk_schedules(dts, prev_idx, weights, num_frames, step_chunk):
    n_steps = len(dts)
    n_chunks = -(-n_steps // step_chunk)
    sched = []
    for c in range(n_chunks):
        steps = []
        for k in range(c * step_chunk, min((c + 1) * step_chunk, n_steps)):
            frames = tuple((int(i), float(weights[i]))
                           for i in range(1, num_frames) if int(prev_idx[i]) == k)
            steps.append((k - c * step_chunk, float(dts[k]), frames))
        sched.append(tuple(steps))
    return tuple(sched), n_chunks


# ----------------------------------------------------------------------------
# Parameters (SDEFunc: two Linear(100, dim) + Tanh, xavier_uniform gain sqrt(2))
# ----------------------------------------------------------------------------
def init_params(key, dim=100, in_dim=100):
    kd, kdb, kg, kgb = jax.random.split(key, 4)
    gain = 2.0 ** 0.5
    bound_w = gain * (6.0 / (in_dim + dim)) ** 0.5
    bound_b = 1.0 / (in_dim ** 0.5)
    wd = jax.random.uniform(kd, (dim, in_dim), jnp.float32, -bound_w, bound_w)
    bd = jax.random.uniform(kdb, (dim,), jnp.float32, -bound_b, bound_b)
    wg = jax.random.uniform(kg, (dim, in_dim), jnp.float32, -bound_w, bound_w)
    bg = jax.random.uniform(kgb, (dim,), jnp.float32, -bound_b, bound_b)
    return dict(wd=wd, bd=bd, wg=wg, bg=bg)     # torch layout: W is (out, in)


def _prep_fused_weights(params, dim_pad, matmul_dtype):
    # torch Linear: y = x @ W.T + b.  Store W.T zero-padded to (dim_pad, dim_pad), put
    # the bias into row dim_pad-1 (driven by the constant-1 input lane), and fuse
    # drift|diffusion along the output dim -> single MXU pass, no separate bias add.
    wd, bd, wg, bg = params["wd"], params["bd"], params["wg"], params["bg"]
    out_dim, in_dim = wd.shape
    assert in_dim < dim_pad, "need one spare input lane for the folded bias"

    def block(w, b):
        blk = jnp.zeros((dim_pad, dim_pad), jnp.float32)
        blk = blk.at[:in_dim, :out_dim].set(jnp.transpose(w))
        blk = blk.at[dim_pad - 1, :out_dim].set(b)          # bias row
        return blk

    w_fused = jnp.concatenate([block(wd, bd), block(wg, bg)], axis=1)
    return w_fused.astype(matmul_dtype)


# ----------------------------------------------------------------------------
# Wrapper (= TemporalGeneratorSDE.forward with linear=False)
# ----------------------------------------------------------------------------
def temporal_generator_sde(x0, params, noise_key, *, num_frames=16, dt=0.025,
                           matmul_dtype=jnp.bfloat16, dw_dtype=jnp.bfloat16,
                           tanh_dtype=None, out_dtype=jnp.float32,
                           batch_tile=128, step_chunk=8):
    batch, in_dim = x0.shape
    out_dim, w_in = params["wd"].shape
    assert w_in == in_dim and out_dim == in_dim, "SDE state dim must equal Linear in/out dim"
    dim = out_dim
    if tanh_dtype is None:
        tanh_dtype = _default_tanh_dtype()

    dts_np, prev_idx, weights = _build_schedule(num_frames, dt)
    n_steps = len(dts_np)

    dim_pad = _round_up(max(dim, in_dim + 1), 128)          # +1 spare lane carries the bias
    batch_pad = _round_up(batch, 8)
    bt = min(batch_tile, batch_pad)
    if _num_tensorcores() > 1 and batch_pad > 8:
        bt = min(bt, _round_up(-(-batch_pad // 2), 8))      # >=2 tiles on dual-TC chips
    batch_pad = _round_up(batch_pad, bt)
    n_btiles = batch_pad // bt

    chunk_sched, n_chunks = _chunk_schedules(dts_np, prev_idx, weights,
                                             num_frames, step_chunk)
    n_steps_pad = n_chunks * step_chunk

    # Brownian increments at the TRUE shape, pre-scaled by sqrt(dt_k), streamed in bf16.
    noise = jax.random.normal(noise_key, (n_steps, batch, dim), dtype=jnp.float32)
    dw = noise * jnp.sqrt(jnp.asarray(dts_np, dtype=jnp.float32))[:, None, None]
    dw_q = dw.astype(dw_dtype)

    # Pre-tiled layout (n_btiles, n_steps_pad, bt, dim_pad): each (batch tile, step
    # chunk) dW block is one contiguous HBM region.  Padded steps/rows/lanes are zero.
    dw_p = jnp.zeros((n_steps_pad, batch_pad, dim_pad), dw_dtype)
    dw_p = dw_p.at[:n_steps, :batch, :dim].set(dw_q)
    dw_t = dw_p.reshape(n_steps_pad, n_btiles, bt, dim_pad).transpose(1, 0, 2, 3)

    # Padded x0 with a constant-1 lane (dim_pad-1) driving the folded bias row.
    # Padded batch rows keep lane dim_pad-1 = 0 -> they stay exactly zero.
    x0_p = jnp.zeros((batch_pad, dim_pad), jnp.float32)
    x0_p = x0_p.at[:batch, :in_dim].set(x0.astype(jnp.float32))
    x0_p = x0_p.at[:batch, dim_pad - 1].set(1.0)

    w_fused = _prep_fused_weights(params, dim_pad, matmul_dtype)

    kernel = functools.partial(_sde_euler_kernel,
                               chunk_schedules=chunk_sched, dim_pad=dim_pad,
                               matmul_dtype=matmul_dtype, tanh_dtype=tanh_dtype)

    out = pl.pallas_call(
        kernel,
        out_shape=jax.ShapeDtypeStruct((num_frames, batch_pad, dim_pad), out_dtype),
        grid=(n_btiles, n_chunks),
        in_specs=[
            pl.BlockSpec((bt, dim_pad), lambda b, s: (b, 0)),              # x0 tile (resident)
            pl.BlockSpec((dim_pad, 2 * dim_pad), lambda b, s: (0, 0)),     # fused W^T + bias row
            pl.BlockSpec((1, step_chunk, bt, dim_pad),
                         lambda b, s: (b, s, 0, 0)),                       # streamed dW chunk
        ],
        out_specs=pl.BlockSpec((num_frames, bt, dim_pad), lambda b, s: (0, b, 0)),
        scratch_shapes=[
            pltpu.VMEM((bt, dim_pad), jnp.float32),                # Euler state (carried)
            pltpu.VMEM((num_frames, bt, dim_pad), jnp.float32),    # frame accumulator
        ],
        compiler_params=pltpu.CompilerParams(
            dimension_semantics=("parallel", "arbitrary")),
    )(x0_p, w_fused, dw_t)

    # torch: sdeint -> (num_frames, batch, dim); .transpose(0, 1); drop padding.
    frames = jnp.transpose(out, (1, 0, 2))[:batch, :, :dim]
    aux = dict(dts=dts_np, prev_idx=prev_idx, weights=weights, dw=dw, dw_q=dw_q,
               x0_p=x0_p, w_fused=w_fused, dim_pad=dim_pad, batch_pad=batch_pad,
               matmul_dtype=matmul_dtype, tanh_dtype=tanh_dtype)
    return frames, aux


# ----------------------------------------------------------------------------
# Pure-JAX references (same noise / schedule) for correctness checks
# ----------------------------------------------------------------------------
def _reference_matched(x0_p, w_fused, dts, dw_p, prev_idx, weights, *,
                       dim_pad, matmul_dtype, tanh_dtype):
    """Replicates the kernel's numerics exactly (padded state, folded bias, bf16 dW)."""
    def step(x, inp):
        dt_k, dw_k = inp
        pre = jnp.dot(x.astype(matmul_dtype), w_fused,
                      preferred_element_type=jnp.float32)
        act = jnp.tanh(pre.astype(tanh_dtype)).astype(jnp.float32)
        x_new = x + act[:, :dim_pad] * dt_k + act[:, dim_pad:] * dw_k
        return x_new, x_new

    _, tail = lax.scan(step, x0_p, (jnp.asarray(dts, jnp.float32), dw_p))
    traj = jnp.concatenate([x0_p[None], tail], axis=0)
    y0, y1 = traj[prev_idx], traj[prev_idx + 1]
    frames = y0 + (y1 - y0) * jnp.asarray(weights, jnp.float32)[:, None, None]
    return jnp.transpose(frames, (1, 0, 2))


def _reference_f32(x0, params, dts, dw, prev_idx, weights):
    """Full-f32 torch semantics (exact precision, explicit bias, unquantized dW)."""
    wd_t = jnp.transpose(params["wd"])
    wg_t = jnp.transpose(params["wg"])
    bd = params["bd"][None, :]
    bg = params["bg"][None, :]
    hi = jax.lax.Precision.HIGHEST

    def step(x, inp):
        dt_k, dw_k = inp
        drift = jnp.tanh(jnp.dot(x, wd_t, precision=hi,
                                 preferred_element_type=jnp.float32) + bd)
        diff = jnp.tanh(jnp.dot(x, wg_t, precision=hi,
                                preferred_element_type=jnp.float32) + bg)
        return x + drift * dt_k + diff * dw_k, x + drift * dt_k + diff * dw_k

    _, tail = lax.scan(step, x0.astype(jnp.float32),
                       (jnp.asarray(dts, jnp.float32), dw))
    traj = jnp.concatenate([x0[None].astype(jnp.float32), tail], axis=0)
    y0, y1 = traj[prev_idx], traj[prev_idx + 1]
    frames = y0 + (y1 - y0) * jnp.asarray(weights, jnp.float32)[:, None, None]
    return jnp.transpose(frames, (1, 0, 2))


if __name__ == "__main__":
    key = jax.random.PRNGKey(0)
    k_param, k_x, k_noise = jax.random.split(key, 3)

    batch, dim, num_frames = 2, 100, 16        # Linear(100, dim) => dim = 100
    params = init_params(k_param, dim=dim)
    x0 = jax.random.normal(k_x, (batch, dim), dtype=jnp.float32)

    out, aux = temporal_generator_sde(x0, params, k_noise,
                                      num_frames=num_frames, dt=0.025)
    out = jax.block_until_ready(out)

    assert out.shape == (batch, num_frames, dim)
    assert bool(jnp.all(jnp.isfinite(out)))

    # (1) Strict structural check: pure-JAX walk with EXACTLY the kernel's numerics
    #     (padded state + folded bf16 bias, bf16 matmul inputs, bf16 dW, kernel tanh dtype).
    dw_q_p = jnp.zeros((len(aux["dts"]), aux["batch_pad"], aux["dim_pad"]), jnp.float32)
    dw_q_p = dw_q_p.at[:, :batch, :dim].set(aux["dw_q"].astype(jnp.float32))
    ref_matched = _reference_matched(
        aux["x0_p"], aux["w_fused"], aux["dts"], dw_q_p,
        aux["prev_idx"], aux["weights"],
        dim_pad=aux["dim_pad"], matmul_dtype=aux["matmul_dtype"],
        tanh_dtype=aux["tanh_dtype"])
    ref_matched = jax.block_until_ready(ref_matched)[:batch, :, :dim]
    np.testing.assert_allclose(np.asarray(out), np.asarray(ref_matched),
                               rtol=3e-3, atol=3e-3)

    # (2) Sanity bound vs. exact-f32 torch semantics: the low-precision fast path
    #     (bf16 matmul inputs / bias / dW and, on v6e+/v7x, bf16 tanh) drifts slowly
    #     over the 40-step walk; the strict gate above checks the kernel itself.
    ref_f32 = jax.block_until_ready(
        _reference_f32(x0, params, aux["dts"], aux["dw"],
                       aux["prev_idx"], aux["weights"]))
    np.testing.assert_allclose(np.asarray(out), np.asarray(ref_f32),
                               rtol=8e-2, atol=8e-2)

    print("KERNEL_OK")
</pallas_src>

<mosaic_0001>
module attributes {stable_mosaic.version = 11 : i64} {
  func.func @_sde_euler_kernel(%arg0: i32, %arg1: i32, %arg2: memref<8x128xf32, #tpu.memory_space<vmem>>, %arg3: memref<128x256xbf16, #tpu.memory_space<vmem>>, %arg4: memref<1x8x8x128xbf16, #tpu.memory_space<vmem>>, %arg5: memref<16x8x128xf32, #tpu.memory_space<vmem>>, %arg6: memref<8x128xf32, #tpu.memory_space<vmem>>, %arg7: memref<16x8x128xf32, #tpu.memory_space<vmem>>) attributes {dimension_semantics = [#tpu.dimension_semantics<parallel>, #tpu.dimension_semantics<arbitrary>], iteration_bounds = array<i64: 1, 5>, scalar_prefetch = 0 : i64, scratch_operands = 2 : i64, tpu.core_type = #tpu.core_type<tc>, window_params = [{transform_indices = @transform_0, window_bounds = array<i64: 8, 128>}, {pipeline_mode = #tpu.pipeline_mode<synchronous>, transform_indices = @transform_1, window_bounds = array<i64: 128, 256>}, {transform_indices = @transform_2, window_bounds = array<i64: 1, 8, 8, 128>}, {transform_indices = @transform_3, window_bounds = array<i64: 16, 8, 128>}]} {
    %c0_i32 = arith.constant 0 : i32
    %0 = arith.cmpi eq, %arg1, %c0_i32 : i32
    %1 = arith.extui %0 : i1 to i32
    %c0_i32_0 = arith.constant 0 : i32
    %2 = arith.cmpi ne, %1, %c0_i32_0 : i32
    scf.if %2 {
      %c0_10 = arith.constant 0 : index
      %c0_11 = arith.constant 0 : index
      %22 = vector.load %arg2[%c0_10, %c0_11] : memref<8x128xf32, #tpu.memory_space<vmem>>, vector<8x128xf32>
      %c0_12 = arith.constant 0 : index
      %c0_13 = arith.constant 0 : index
      %23 = vector.load %arg6[%c0_12, %c0_13] : memref<8x128xf32, #tpu.memory_space<vmem>>, vector<8x128xf32>
      tpu.vector_store %arg6[%c0_12, %c0_13], %22 {strides = array<i32>} : memref<8x128xf32, #tpu.memory_space<vmem>>, vector<8x128xf32>,
      %c0_14 = arith.constant 0 : index
      %c0_15 = arith.constant 0 : index
      %c0_16 = arith.constant 0 : index
      %24 = vector.load %arg7[%c0_14, %c0_15, %c0_16] : memref<16x8x128xf32, #tpu.memory_space<vmem>>, vector<1x8x128xf32>
      %25 = vector.shape_cast %24 : vector<1x8x128xf32> to vector<8x128xf32>
      %26 = vector.shape_cast %22 : vector<8x128xf32> to vector<1x8x128xf32>
      tpu.vector_store %arg7[%c0_14, %c0_15, %c0_16], %26 {strides = array<i32>} : memref<16x8x128xf32, #tpu.memory_space<vmem>>, vector<1x8x128xf32>,
    } else {
    }
    %c0 = arith.constant 0 : index
    %c0_1 = arith.constant 0 : index
    %3 = vector.load %arg3[%c0, %c0_1] : memref<128x256xbf16, #tpu.memory_space<vmem>>, vector<128x256xbf16>
    %c0_i32_2 = arith.constant 0 : i32
    %4 = arith.cmpi eq, %arg1, %c0_i32_2 : i32
    %5 = arith.extui %4 : i1 to i32
    %c0_i32_3 = arith.constant 0 : i32
    %6 = arith.cmpi ne, %5, %c0_i32_3 : i32
    scf.if %6 {
      %c0_10 = arith.constant 0 : index
      %c0_11 = arith.constant 0 : index
      %22 = vector.load %arg6[%c0_10, %c0_11] : memref<8x128xf32, #tpu.memory_space<vmem>>, vector<8x128xf32>
      %23 = arith.truncf %22 : vector<8x128xf32> to vector<8x128xbf16>
      %cst = arith.constant dense<0.000000e+00> : vector<8x256xf32>
      %24 = tpu.matmul %23, %3, %cst {dimension_numbers = #tpu.dot_dimension_numbers<[1], [0], [0], [1], [0, 0, 1, 1], [], []>} : vector<8x128xbf16>, vector<128x256xbf16>, vector<8x256xf32> -> vector<8x256xf32>
      %25 = arith.truncf %24 : vector<8x256xf32> to vector<8x256xbf16>
      %26 = math.tanh %25 : vector<8x256xbf16>
      %27 = arith.extf %26 : vector<8x256xbf16> to vector<8x256xf32>
      %28 = vector.extract_strided_slice %27 {offsets = [0, 0], sizes = [8, 128], strides = [1, 1]} : vector<8x256xf32> to vector<8x128xf32>
      %29 = vector.extract_strided_slice %27 {offsets = [0, 128], sizes = [8, 128], strides = [1, 1]} : vector<8x256xf32> to vector<8x128xf32>
      %cst_12 = arith.constant 2.500000e-02 : f32
      %30 = vector.broadcast %cst_12 : f32 to vector<8x128xf32>
      %31 = arith.mulf %28, %30 : vector<8x128xf32>
      %32 = arith.addf %22, %31 : vector<8x128xf32>
      %c0_13 = arith.constant 0 : index
      %c0_14 = arith.constant 0 : index
      %c0_15 = arith.constant 0 : index
      %c0_16 = arith.constant 0 : index
      %33 = vector.load %arg4[%c0_13, %c0_14, %c0_15, %c0_16] : memref<1x8x8x128xbf16, #tpu.memory_space<vmem>>, vector<1x1x8x128xbf16>
      %34 = vector.shape_cast %33 : vector<1x1x8x128xbf16> to vector<8x128xbf16>
      %35 = arith.extf %34 : vector<8x128xbf16> to vector<8x128xf32>
      %36 = arith.mulf %29, %35 : vector<8x128xf32>
      %37 = arith.addf %32, %36 : vector<8x128xf32>
      %38 = arith.truncf %37 : vector<8x128xf32> to vector<8x128xbf16>
      %cst_17 = arith.constant dense<0.000000e+00> : vector<8x256xf32>
      %39 = tpu.matmul %38, %3, %cst_17 {dimension_numbers = #tpu.dot_dimension_numbers<[1], [0], [0], [1], [0, 0, 1, 1], [], []>} : vector<8x128xbf16>, vector<128x256xbf16>, vector<8x256xf32> -> vector<8x256xf32>
      %40 = arith.truncf %39 : vector<8x256xf32> to vector<8x256xbf16>
      %41 = math.tanh %40 : vector<8x256xbf16>
      %42 = arith.extf %41 : vector<8x256xbf16> to vector<8x256xf32>
      %43 = vector.extract_strided_slice %42 {offsets = [0, 0], sizes = [8, 128], strides = [1, 1]} : vector<8x256xf32> to vector<8x128xf32>
      %44 = vector.extract_strided_slice %42 {offsets = [0, 128], sizes = [8, 128], strides = [1, 1]} : vector<8x256xf32> to vector<8x128xf32>
      %cst_18 = arith.constant 2.500000e-02 : f32
      %45 = vector.broadcast %cst_18 : f32 to vector<8x128xf32>
      %46 = arith.mulf %43, %45 : vector<8x128xf32>
      %47 = arith.addf %37, %46 : vector<8x128xf32>
      %c0_19 = arith.constant 0 : index
      %c1 = arith.constant 1 : index
      %c0_20 = arith.constant 0 : index
      %c0_21 = arith.constant 0 : index
      %48 = vector.load %arg4[%c0_19, %c1, %c0_20, %c0_21] : memref<1x8x8x128xbf16, #tpu.memory_space<vmem>>, vector<1x1x8x128xbf16>
      %49 = vector.shape_cast %48 : vector<1x1x8x128xbf16> to vector<8x128xbf16>
      %50 = arith.extf %49 : vector<8x128xbf16> to vector<8x128xf32>
      %51 = arith.mulf %44, %50 : vector<8x128xf32>
      %52 = arith.addf %47, %51 : vector<8x128xf32>
      %53 = arith.truncf %52 : vector<8x128xf32> to vector<8x128xbf16>
      %cst_22 = arith.constant dense<0.000000e+00> : vector<8x256xf32>
      %54 = tpu.matmul %53, %3, %cst_22 {dimension_numbers = #tpu.dot_dimension_numbers<[1], [0], [0], [1], [0, 0, 1, 1], [], []>} : vector<8x128xbf16>, vector<128x256xbf16>, vector<8x256xf32> -> vector<8x256xf32>
      %55 = arith.truncf %54 : vector<8x256xf32> to vector<8x256xbf16>
      %56 = math.tanh %55 : vector<8x256xbf16>
      %57 = arith.extf %56 : vector<8x256xbf16> to vector<8x256xf32>
      %58 = vector.extract_strided_slice %57 {offsets = [0, 0], sizes = [8, 128], strides = [1, 1]} : vector<8x256xf32> to vector<8x128xf32>
      %59 = vector.extract_strided_slice %57 {offsets = [0, 128], sizes = [8, 128], strides = [1, 1]} : vector<8x256xf32> to vector<8x128xf32>
      %cst_23 = arith.constant 2.500000e-02 : f32
      %60 = vector.broadcast %cst_23 : f32 to vector<8x128xf32>
      %61 = arith.mulf %58, %60 : vector<8x128xf32>
      %62 = arith.addf %52, %61 : vector<8x128xf32>
      %c0_24 = arith.constant 0 : index
      %c2 = arith.constant 2 : index
      %c0_25 = arith.constant 0 : index
      %c0_26 = arith.constant 0 : index
      %63 = vector.load %arg4[%c0_24, %c2, %c0_25, %c0_26] : memref<1x8x8x128xbf16, #tpu.memory_space<vmem>>, vector<1x1x8x128xbf16>
      %64 = vector.shape_cast %63 : vector<1x1x8x128xbf16> to vector<8x128xbf16>
      %65 = arith.extf %64 : vector<8x128xbf16> to vector<8x128xf32>
      %66 = arith.mulf %59, %65 : vector<8x128xf32>
      %67 = arith.addf %62, %66 : vector<8x128xf32>
      %68 = arith.subf %67, %52 : vector<8x128xf32>
      %cst_27 = arith.constant 0.666666686 : f32
      %69 = vector.broadcast %cst_27 : f32 to vector<8x128xf32>
      %70 = arith.mulf %68, %69 : vector<8x128xf32>
      %71 = arith.addf %52, %70 : vector<8x128xf32>
      %c1_28 = arith.constant 1 : index
      %c0_29 = arith.constant 0 : index
      %c0_30 = arith.constant 0 : index
      %72 = vector.load %arg7[%c1_28, %c0_29, %c0_30] : memref<16x8x128xf32, #tpu.memory_space<vmem>>, vector<1x8x128xf32>
      %73 = vector.shape_cast %72 : vector<1x8x128xf32> to vector<8x128xf32>
      %74 = vector.shape_cast %71 : vector<8x128xf32> to vector<1x8x128xf32>
      tpu.vector_store %arg7[%c1_28, %c0_29, %c0_30], %74 {strides = array<i32>} : memref<16x8x128xf32, #tpu.memory_space<vmem>>, vector<1x8x128xf32>,
      %75 = arith.truncf %67 : vector<8x128xf32> to vector<8x128xbf16>
      %cst_31 = arith.constant dense<0.000000e+00> : vector<8x256xf32>
      %76 = tpu.matmul %75, %3, %cst_31 {dimension_numbers = #tpu.dot_dimension_numbers<[1], [0], [0], [1], [0, 0, 1, 1], [], []>} : vector<8x128xbf16>, vector<128x256xbf16>, vector<8x256xf32> -> vector<8x256xf32>
      %77 = arith.truncf %76 : vector<8x256xf32> to vector<8x256xbf16>
      %78 = math.tanh %77 : vector<8x256xbf16>
      %79 = arith.extf %78 : vector<8x256xbf16> to vector<8x256xf32>
      %80 = vector.extract_strided_slice %79 {offsets = [0, 0], sizes = [8, 128], strides = [1, 1]} : vector<8x256xf32> to vector<8x128xf32>
      %81 = vector.extract_strided_slice %79 {offsets = [0, 128], sizes = [8, 128], strides = [1, 1]} : vector<8x256xf32> to vector<8x128xf32>
      %cst_32 = arith.constant 2.500000e-02 : f32
      %82 = vector.broadcast %cst_32 : f32 to vector<8x128xf32>
      %83 = arith.mulf %80, %82 : vector<8x128xf32>
      %84 = arith.addf %67, %83 : vector<8x128xf32>
      %c0_33 = arith.constant 0 : index
      %c3 = arith.constant 3 : index
      %c0_34 = arith.constant 0 : index
      %c0_35 = arith.constant 0 : index
      %85 = vector.load %arg4[%c0_33, %c3, %c0_34, %c0_35] : memref<1x8x8x128xbf16, #tpu.memory_space<vmem>>, vector<1x1x8x128xbf16>
      %86 = vector.shape_cast %85 : vector<1x1x8x128xbf16> to vector<8x128xbf16>
      %87 = arith.extf %86 : vector<8x128xbf16> to vector<8x128xf32>
      %88 = arith.mulf %81, %87 : vector<8x128xf32>
      %89 = arith.addf %84, %88 : vector<8x128xf32>
      %90 = arith.truncf %89 : vector<8x128xf32> to vector<8x128xbf16>
      %cst_36 = arith.constant dense<0.000000e+00> : vector<8x256xf32>
      %91 = tpu.matmul %90, %3, %cst_36 {dimension_numbers = #tpu.dot_dimension_numbers<[1], [0], [0], [1], [0, 0, 1, 1], [], []>} : vector<8x128xbf16>, vector<128x256xbf16>, vector<8x256xf32> -> vector<8x256xf32>
      %92 = arith.truncf %91 : vector<8x256xf32> to vector<8x256xbf16>
      %93 = math.tanh %92 : vector<8x256xbf16>
      %94 = arith.extf %93 : vector<8x256xbf16> to vector<8x256xf32>
      %95 = vector.extract_strided_slice %94 {offsets = [0, 0], sizes = [8, 128], strides = [1, 1]} : vector<8x256xf32> to vector<8x128xf32>
      %96 = vector.extract_strided_slice %94 {offsets = [0, 128], sizes = [8, 128], strides = [1, 1]} : vector<8x256xf32> to vector<8x128xf32>
      %cst_37 = arith.constant 2.500000e-02 : f32
      %97 = vector.broadcast %cst_37 : f32 to vector<8x128xf32>
      %98 = arith.mulf %95, %97 : vector<8x128xf32>
      %99 = arith.addf %89, %98 : vector<8x128xf32>
      %c0_38 = arith.constant 0 : index
      %c4 = arith.constant 4 : index
      %c0_39 = arith.constant 0 : index
      %c0_40 = arith.constant 0 : index
      %100 = vector.load %arg4[%c0_38, %c4, %c0_39, %c0_40] : memref<1x8x8x128xbf16, #tpu.memory_space<vmem>>, vector<1x1x8x128xbf16>
      %101 = vector.shape_cast %100 : vector<1x1x8x128xbf16> to vector<8x128xbf16>
      %102 = arith.extf %101 : vector<8x128xbf16> to vector<8x128xf32>
      %103 = arith.mulf %96, %102 : vector<8x128xf32>
      %104 = arith.addf %99, %103 : vector<8x128xf32>
      %105 = arith.truncf %104 : vector<8x128xf32> to vector<8x128xbf16>
      %cst_41 = arith.constant dense<0.000000e+00> : vector<8x256xf32>
      %106 = tpu.matmul %105, %3, %cst_41 {dimension_numbers = #tpu.dot_dimension_numbers<[1], [0], [0], [1], [0, 0, 1, 1], [], []>} : vector<8x128xbf16>, vector<128x256xbf16>, vector<8x256xf32> -> vector<8x256xf32>
      %107 = arith.truncf %106 : vector<8x256xf32> to vector<8x256xbf16>
      %108 = math.tanh %107 : vector<8x256xbf16>
      %109 = arith.extf %108 : vector<8x256xbf16> to vector<8x256xf32>
      %110 = vector.extract_strided_slice %109 {offsets = [0, 0], sizes = [8, 128], strides = [1, 1]} : vector<8x256xf32> to vector<8x128xf32>
      %111 = vector.extract_strided_slice %109 {offsets = [0, 128], sizes = [8, 128], strides = [1, 1]} : vector<8x256xf32> to vector<8x128xf32>
      %cst_42 = arith.constant 2.500000e-02 : f32
      %112 = vector.broadcast %cst_42 : f32 to vector<8x128xf32>
      %113 = arith.mulf %110, %112 : vector<8x128xf32>
      %114 = arith.addf %104, %113 : vector<8x128xf32>
      %c0_43 = arith.constant 0 : index
      %c5 = arith.constant 5 : index
      %c0_44 = arith.constant 0 : index
      %c0_45 = arith.constant 0 : index
      %115 = vector.load %arg4[%c0_43, %c5, %c0_44, %c0_45] : memref<1x8x8x128xbf16, #tpu.memory_space<vmem>>, vector<1x1x8x128xbf16>
      %116 = vector.shape_cast %115 : vector<1x1x8x128xbf16> to vector<8x128xbf16>
      %117 = arith.extf %116 : vector<8x128xbf16> to vector<8x128xf32>
      %118 = arith.mulf %111, %117 : vector<8x128xf32>
      %119 = arith.addf %114, %118 : vector<8x128xf32>
      %120 = arith.subf %119, %104 : vector<8x128xf32>
      %cst_46 = arith.constant 0.333333343 : f32
      %121 = vector.broadcast %cst_46 : f32 to vector<8x128xf32>
      %122 = arith.mulf %120, %121 : vector<8x128xf32>
      %123 = arith.addf %104, %122 : vector<8x128xf32>
      %c2_47 = arith.constant 2 : index
      %c0_48 = arith.constant 0 : index
      %c0_49 = arith.constant 0 : index
      %124 = vector.load %arg7[%c2_47, %c0_48, %c0_49] : memref<16x8x128xf32, #tpu.memory_space<vmem>>, vector<1x8x128xf32>
      %125 = vector.shape_cast %124 : vector<1x8x128xf32> to vector<8x128xf32>
      %126 = vector.shape_cast %123 : vector<8x128xf32> to vector<1x8x128xf32>
      tpu.vector_store %arg7[%c2_47, %c0_48, %c0_49], %126 {strides = array<i32>} : memref<16x8x128xf32, #tpu.memory_space<vmem>>, vector<1x8x128xf32>,
      %127 = arith.truncf %119 : vector<8x128xf32> to vector<8x128xbf16>
      %cst_50 = arith.constant dense<0.000000e+00> : vector<8x256xf32>
      %128 = tpu.matmul %127, %3, %cst_50 {dimension_numbers = #tpu.dot_dimension_numbers<[1], [0], [0], [1], [0, 0, 1, 1], [], []>} : vector<8x128xbf16>, vector<128x256xbf16>, vector<8x256xf32> -> vector<8x256xf32>
      %129 = arith.truncf %128 : vector<8x256xf32> to vector<8x256xbf16>
      %130 = math.tanh %129 : vector<8x256xbf16>
      %131 = arith.extf %130 : vector<8x256xbf16> to vector<8x256xf32>
      %132 = vector.extract_strided_slice %131 {offsets = [0, 0], sizes = [8, 128], strides = [1, 1]} : vector<8x256xf32> to vector<8x128xf32>
      %133 = vector.extract_strided_slice %131 {offsets = [0, 128], sizes = [8, 128], strides = [1, 1]} : vector<8x256xf32> to vector<8x128xf32>
      %cst_51 = arith.constant 2.500000e-02 : f32
      %134 = vector.broadcast %cst_51 : f32 to vector<8x128xf32>
      %135 = arith.mulf %132, %134 : vector<8x128xf32>
      %136 = arith.addf %119, %135 : vector<8x128xf32>
      %c0_52 = arith.constant 0 : index
      %c6 = arith.constant 6 : index
      %c0_53 = arith.constant 0 : index
      %c0_54 = arith.constant 0 : index
      %137 = vector.load %arg4[%c0_52, %c6, %c0_53, %c0_54] : memref<1x8x8x128xbf16, #tpu.memory_space<vmem>>, vector<1x1x8x128xbf16>
      %138 = vector.shape_cast %137 : vector<1x1x8x128xbf16> to vector<8x128xbf16>
      %139 = arith.extf %138 : vector<8x128xbf16> to vector<8x128xf32>
      %140 = arith.mulf %133, %139 : vector<8x128xf32>
      %141 = arith.addf %136, %140 : vector<8x128xf32>
      %142 = arith.truncf %141 : vector<8x128xf32> to vector<8x128xbf16>
      %cst_55 = arith.constant dense<0.000000e+00> : vector<8x256xf32>
      %143 = tpu.matmul %142, %3, %cst_55 {dimension_numbers = #tpu.dot_dimension_numbers<[1], [0], [0], [1], [0, 0, 1, 1], [], []>} : vector<8x128xbf16>, vector<128x256xbf16>, vector<8x256xf32> -> vector<8x256xf32>
      %144 = arith.truncf %143 : vector<8x256xf32> to vector<8x256xbf16>
      %145 = math.tanh %144 : vector<8x256xbf16>
      %146 = arith.extf %145 : vector<8x256xbf16> to vector<8x256xf32>
      %147 = vector.extract_strided_slice %146 {offsets = [0, 0], sizes = [8, 128], strides = [1, 1]} : vector<8x256xf32> to vector<8x128xf32>
      %148 = vector.extract_strided_slice %146 {offsets = [0, 128], sizes = [8, 128], strides = [1, 1]} : vector<8x256xf32> to vector<8x128xf32>
      %cst_56 = arith.constant 2.500000e-02 : f32
      %149 = vector.broadcast %cst_56 : f32 to vector<8x128xf32>
      %150 = arith.mulf %147, %149 : vector<8x128xf32>
      %151 = arith.addf %141, %150 : vector<8x128xf32>
      %c0_57 = arith.constant 0 : index
      %c7 = arith.constant 7 : index
      %c0_58 = arith.constant 0 : index
      %c0_59 = arith.constant 0 : index
      %152 = vector.load %arg4[%c0_57, %c7, %c0_58, %c0_59] : memref<1x8x8x128xbf16, #tpu.memory_space<vmem>>, vector<1x1x8x128xbf16>
      %153 = vector.shape_cast %152 : vector<1x1x8x128xbf16> to vector<8x128xbf16>
      %154 = arith.extf %153 : vector<8x128xbf16> to vector<8x128xf32>
      %155 = arith.mulf %148, %154 : vector<8x128xf32>
      %156 = arith.addf %151, %155 : vector<8x128xf32>
      %157 = arith.subf %156, %141 : vector<8x128xf32>
      %cst_60 = arith.constant 1.000000e+00 : f32
      %158 = vector.broadcast %cst_60 : f32 to vector<8x128xf32>
      %159 = arith.mulf %157, %158 : vector<8x128xf32>
      %160 = arith.addf %141, %159 : vector<8x128xf32>
      %c3_61 = arith.constant 3 : index
      %c0_62 = arith.constant 0 : index
      %c0_63 = arith.constant 0 : index
      %161 = vector.load %arg7[%c3_61, %c0_62, %c0_63] : memref<16x8x128xf32, #tpu.memory_space<vmem>>, vector<1x8x128xf32>
      %162 = vector.shape_cast %161 : vector<1x8x128xf32> to vector<8x128xf32>
      %163 = vector.shape_cast %160 : vector<8x128xf32> to vector<1x8x128xf32>
      tpu.vector_store %arg7[%c3_61, %c0_62, %c0_63], %163 {strides = array<i32>} : memref<16x8x128xf32, #tpu.memory_space<vmem>>, vector<1x8x128xf32>,
      %c0_64 = arith.constant 0 : index
      %c0_65 = arith.constant 0 : index
      %164 = vector.load %arg6[%c0_64, %c0_65] : memref<8x128xf32, #tpu.memory_space<vmem>>, vector<8x128xf32>
      tpu.vector_store %arg6[%c0_64, %c0_65], %156 {strides = array<i32>} : memref<8x128xf32, #tpu.memory_space<vmem>>, vector<8x128xf32>,
    } else {
    }
    %c1_i32 = arith.constant 1 : i32
    %7 = arith.cmpi eq, %arg1, %c1_i32 : i32
    %8 = arith.extui %7 : i1 to i32
    %c0_i32_4 = arith.constant 0 : i32
    %9 = arith.cmpi ne, %8, %c0_i32_4 : i32
    scf.if %9 {
      %c0_10 = arith.constant 0 : index
      %c0_11 = arith.constant 0 : index
      %22 = vector.load %arg6[%c0_10, %c0_11] : memref<8x128xf32, #tpu.memory_space<vmem>>, vector<8x128xf32>
      %23 = arith.truncf %22 : vector<8x128xf32> to vector<8x128xbf16>
      %cst = arith.constant dense<0.000000e+00> : vector<8x256xf32>
      %24 = tpu.matmul %23, %3, %cst {dimension_numbers = #tpu.dot_dimension_numbers<[1], [0], [0], [1], [0, 0, 1, 1], [], []>} : vector<8x128xbf16>, vector<128x256xbf16>, vector<8x256xf32> -> vector<8x256xf32>
      %25 = arith.truncf %24 : vector<8x256xf32> to vector<8x256xbf16>
      %26 = math.tanh %25 : vector<8x256xbf16>
      %27 = arith.extf %26 : vector<8x256xbf16> to vector<8x256xf32>
      %28 = vector.extract_strided_slice %27 {offsets = [0, 0], sizes = [8, 128], strides = [1, 1]} : vector<8x256xf32> to vector<8x128xf32>
      %29 = vector.extract_strided_slice %27 {offsets = [0, 128], sizes = [8, 128], strides = [1, 1]} : vector<8x256xf32> to vector<8x128xf32>
      %cst_12 = arith.constant 2.500000e-02 : f32
      %30 = vector.broadcast %cst_12 : f32 to vector<8x128xf32>
      %31 = arith.mulf %28, %30 : vector<8x128xf32>
      %32 = arith.addf %22, %31 : vector<8x128xf32>
      %c0_13 = arith.constant 0 : index
      %c0_14 = arith.constant 0 : index
      %c0_15 = arith.constant 0 : index
      %c0_16 = arith.constant 0 : index
      %33 = vector.load %arg4[%c0_13, %c0_14, %c0_15, %c0_16] : memref<1x8x8x128xbf16, #tpu.memory_space<vmem>>, vector<1x1x8x128xbf16>
      %34 = vector.shape_cast %33 : vector<1x1x8x128xbf16> to vector<8x128xbf16>
      %35 = arith.extf %34 : vector<8x128xbf16> to vector<8x128xf32>
      %36 = arith.mulf %29, %35 : vector<8x128xf32>
      %37 = arith.addf %32, %36 : vector<8x128xf32>
      %38 = arith.truncf %37 : vector<8x128xf32> to vector<8x128xbf16>
      %cst_17 = arith.constant dense<0.000000e+00> : vector<8x256xf32>
      %39 = tpu.matmul %38, %3, %cst_17 {dimension_numbers = #tpu.dot_dimension_numbers<[1], [0], [0], [1], [0, 0, 1, 1], [], []>} : vector<8x128xbf16>, vector<128x256xbf16>, vector<8x256xf32> -> vector<8x256xf32>
      %40 = arith.truncf %39 : vector<8x256xf32> to vector<8x256xbf16>
      %41 = math.tanh %40 : vector<8x256xbf16>
      %42 = arith.extf %41 : vector<8x256xbf16> to vector<8x256xf32>
      %43 = vector.extract_strided_slice %42 {offsets = [0, 0], sizes = [8, 128], strides = [1, 1]} : vector<8x256xf32> to vector<8x128xf32>
      %44 = vector.extract_strided_slice %42 {offsets = [0, 128], sizes = [8, 128], strides = [1, 1]} : vector<8x256xf32> to vector<8x128xf32>
      %cst_18 = arith.constant 2.500000e-02 : f32
      %45 = vector.broadcast %cst_18 : f32 to vector<8x128xf32>
      %46 = arith.mulf %43, %45 : vector<8x128xf32>
      %47 = arith.addf %37, %46 : vector<8x128xf32>
      %c0_19 = arith.constant 0 : index
      %c1 = arith.constant 1 : index
      %c0_20 = arith.constant 0 : index
      %c0_21 = arith.constant 0 : index
      %48 = vector.load %arg4[%c0_19, %c1, %c0_20, %c0_21] : memref<1x8x8x128xbf16, #tpu.memory_space<vmem>>, vector<1x1x8x128xbf16>
      %49 = vector.shape_cast %48 : vector<1x1x8x128xbf16> to vector<8x128xbf16>
      %50 = arith.extf %49 : vector<8x128xbf16> to vector<8x128xf32>
      %51 = arith.mulf %44, %50 : vector<8x128xf32>
      %52 = arith.addf %47, %51 : vector<8x128xf32>
      %53 = arith.truncf %52 : vector<8x128xf32> to vector<8x128xbf16>
      %cst_22 = arith.constant dense<0.000000e+00> : vector<8x256xf32>
      %54 = tpu.matmul %53, %3, %cst_22 {dimension_numbers = #tpu.dot_dimension_numbers<[1], [0], [0], [1], [0, 0, 1, 1], [], []>} : vector<8x128xbf16>, vector<128x256xbf16>, vector<8x256xf32> -> vector<8x256xf32>
      %55 = arith.truncf %54 : vector<8x256xf32> to vector<8x256xbf16>
      %56 = math.tanh %55 : vector<8x256xbf16>
      %57 = arith.extf %56 : vector<8x256xbf16> to vector<8x256xf32>
      %58 = vector.extract_strided_slice %57 {offsets = [0, 0], sizes = [8, 128], strides = [1, 1]} : vector<8x256xf32> to vector<8x128xf32>
      %59 = vector.extract_strided_slice %57 {offsets = [0, 128], sizes = [8, 128], strides = [1, 1]} : vector<8x256xf32> to vector<8x128xf32>
      %cst_23 = arith.constant 2.500000e-02 : f32
      %60 = vector.broadcast %cst_23 : f32 to vector<8x128xf32>
      %61 = arith.mulf %58, %60 : vector<8x128xf32>
      %62 = arith.addf %52, %61 : vector<8x128xf32>
      %c0_24 = arith.constant 0 : index
      %c2 = arith.constant 2 : index
      %c0_25 = arith.constant 0 : index
      %c0_26 = arith.constant 0 : index
      %63 = vector.load %arg4[%c0_24, %c2, %c0_25, %c0_26] : memref<1x8x8x128xbf16, #tpu.memory_space<vmem>>, vector<1x1x8x128xbf16>
      %64 = vector.shape_cast %63 : vector<1x1x8x128xbf16> to vector<8x128xbf16>
      %65 = arith.extf %64 : vector<8x128xbf16> to vector<8x128xf32>
      %66 = arith.mulf %59, %65 : vector<8x128xf32>
      %67 = arith.addf %62, %66 : vector<8x128xf32>
      %68 = arith.subf %67, %52 : vector<8x128xf32>
      %cst_27 = arith.constant 0.666666686 : f32
      %69 = vector.broadcast %cst_27 : f32 to vector<8x128xf32>
      %70 = arith.mulf %68, %69 : vector<8x128xf32>
      %71 = arith.addf %52, %70 : vector<8x128xf32>
      %c4 = arith.constant 4 : index
      %c0_28 = arith.constant 0 : index
      %c0_29 = arith.constant 0 : index
      %72 = vector.load %arg7[%c4, %c0_28, %c0_29] : memref<16x8x128xf32, #tpu.memory_space<vmem>>, vector<1x8x128xf32>
      %73 = vector.shape_cast %72 : vector<1x8x128xf32> to vector<8x128xf32>
      %74 = vector.shape_cast %71 : vector<8x128xf32> to vector<1x8x128xf32>
      tpu.vector_store %arg7[%c4, %c0_28, %c0_29], %74 {strides = array<i32>} : memref<16x8x128xf32, #tpu.memory_space<vmem>>, vector<1x8x128xf32>,
      %75 = arith.truncf %67 : vector<8x128xf32> to vector<8x128xbf16>
      %cst_30 = arith.constant dense<0.000000e+00> : vector<8x256xf32>
      %76 = tpu.matmul %75, %3, %cst_30 {dimension_numbers = #tpu.dot_dimension_numbers<[1], [0], [0], [1], [0, 0, 1, 1], [], []>} : vector<8x128xbf16>, vector<128x256xbf16>, vector<8x256xf32> -> vector<8x256xf32>
      %77 = arith.truncf %76 : vector<8x256xf32> to vector<8x256xbf16>
      %78 = math.tanh %77 : vector<8x256xbf16>
      %79 = arith.extf %78 : vector<8x256xbf16> to vector<8x256xf32>
      %80 = vector.extract_strided_slice %79 {offsets = [0, 0], sizes = [8, 128], strides = [1, 1]} : vector<8x256xf32> to vector<8x128xf32>
      %81 = vector.extract_strided_slice %79 {offsets = [0, 128], sizes = [8, 128], strides = [1, 1]} : vector<8x256xf32> to vector<8x128xf32>
      %cst_31 = arith.constant 2.500000e-02 : f32
      %82 = vector.broadcast %cst_31 : f32 to vector<8x128xf32>
      %83 = arith.mulf %80, %82 : vector<8x128xf32>
      %84 = arith.addf %67, %83 : vector<8x128xf32>
      %c0_32 = arith.constant 0 : index
      %c3 = arith.constant 3 : index
      %c0_33 = arith.constant 0 : index
      %c0_34 = arith.constant 0 : index
      %85 = vector.load %arg4[%c0_32, %c3, %c0_33, %c0_34] : memref<1x8x8x128xbf16, #tpu.memory_space<vmem>>, vector<1x1x8x128xbf16>
      %86 = vector.shape_cast %85 : vector<1x1x8x128xbf16> to vector<8x128xbf16>
      %87 = arith.extf %86 : vector<8x128xbf16> to vector<8x128xf32>
      %88 = arith.mulf %81, %87 : vector<8x128xf32>
      %89 = arith.addf %84, %88 : vector<8x128xf32>
      %90 = arith.truncf %89 : vector<8x128xf32> to vector<8x128xbf16>
      %cst_35 = arith.constant dense<0.000000e+00> : vector<8x256xf32>
      %91 = tpu.matmul %90, %3, %cst_35 {dimension_numbers = #tpu.dot_dimension_numbers<[1], [0], [0], [1], [0, 0, 1, 1], [], []>} : vector<8x128xbf16>, vector<128x256xbf16>, vector<8x256xf32> -> vector<8x256xf32>
      %92 = arith.truncf %91 : vector<8x256xf32> to vector<8x256xbf16>
      %93 = math.tanh %92 : vector<8x256xbf16>
      %94 = arith.extf %93 : vector<8x256xbf16> to vector<8x256xf32>
      %95 = vector.extract_strided_slice %94 {offsets = [0, 0], sizes = [8, 128], strides = [1, 1]} : vector<8x256xf32> to vector<8x128xf32>
      %96 = vector.extract_strided_slice %94 {offsets = [0, 128], sizes = [8, 128], strides = [1, 1]} : vector<8x256xf32> to vector<8x128xf32>
      %cst_36 = arith.constant 2.500000e-02 : f32
      %97 = vector.broadcast %cst_36 : f32 to vector<8x128xf32>
      %98 = arith.mulf %95, %97 : vector<8x128xf32>
      %99 = arith.addf %89, %98 : vector<8x128xf32>
      %c0_37 = arith.constant 0 : index
      %c4_38 = arith.constant 4 : index
      %c0_39 = arith.constant 0 : index
      %c0_40 = arith.constant 0 : index
      %100 = vector.load %arg4[%c0_37, %c4_38, %c0_39, %c0_40] : memref<1x8x8x128xbf16, #tpu.memory_space<vmem>>, vector<1x1x8x128xbf16>
      %101 = vector.shape_cast %100 : vector<1x1x8x128xbf16> to vector<8x128xbf16>
      %102 = arith.extf %101 : vector<8x128xbf16> to vector<8x128xf32>
      %103 = arith.mulf %96, %102 : vector<8x128xf32>
      %104 = arith.addf %99, %103 : vector<8x128xf32>
      %105 = arith.truncf %104 : vector<8x128xf32> to vector<8x128xbf16>
      %cst_41 = arith.constant dense<0.000000e+00> : vector<8x256xf32>
      %106 = tpu.matmul %105, %3, %cst_41 {dimension_numbers = #tpu.dot_dimension_numbers<[1], [0], [0], [1], [0, 0, 1, 1], [], []>} : vector<8x128xbf16>, vector<128x256xbf16>, vector<8x256xf32> -> vector<8x256xf32>
      %107 = arith.truncf %106 : vector<8x256xf32> to vector<8x256xbf16>
      %108 = math.tanh %107 : vector<8x256xbf16>
      %109 = arith.extf %108 : vector<8x256xbf16> to vector<8x256xf32>
      %110 = vector.extract_strided_slice %109 {offsets = [0, 0], sizes = [8, 128], strides = [1, 1]} : vector<8x256xf32> to vector<8x128xf32>
      %111 = vector.extract_strided_slice %109 {offsets = [0, 128], sizes = [8, 128], strides = [1, 1]} : vector<8x256xf32> to vector<8x128xf32>
      %cst_42 = arith.constant 2.500000e-02 : f32
      %112 = vector.broadcast %cst_42 : f32 to vector<8x128xf32>
      %113 = arith.mulf %110, %112 : vector<8x128xf32>
      %114 = arith.addf %104, %113 : vector<8x128xf32>
      %c0_43 = arith.constant 0 : index
      %c5 = arith.constant 5 : index
      %c0_44 = arith.constant 0 : index
      %c0_45 = arith.constant 0 : index
      %115 = vector.load %arg4[%c0_43, %c5, %c0_44, %c0_45] : memref<1x8x8x128xbf16, #tpu.memory_space<vmem>>, vector<1x1x8x128xbf16>
      %116 = vector.shape_cast %115 : vector<1x1x8x128xbf16> to vector<8x128xbf16>
      %117 = arith.extf %116 : vector<8x128xbf16> to vector<8x128xf32>
      %118 = arith.mulf %111, %117 : vector<8x128xf32>
      %119 = arith.addf %114, %118 : vector<8x128xf32>
      %120 = arith.subf %119, %104 : vector<8x128xf32>
      %cst_46 = arith.constant 0.333333343 : f32
      %121 = vector.broadcast %cst_46 : f32 to vector<8x128xf32>
      %122 = arith.mulf %120, %121 : vector<8x128xf32>
      %123 = arith.addf %104, %122 : vector<8x128xf32>
      %c5_47 = arith.constant 5 : index
      %c0_48 = arith.constant 0 : index
      %c0_49 = arith.constant 0 : index
      %124 = vector.load %arg7[%c5_47, %c0_48, %c0_49] : memref<16x8x128xf32, #tpu.memory_space<vmem>>, vector<1x8x128xf32>
      %125 = vector.shape_cast %124 : vector<1x8x128xf32> to vector<8x128xf32>
      %126 = vector.shape_cast %123 : vector<8x128xf32> to vector<1x8x128xf32>
      tpu.vector_store %arg7[%c5_47, %c0_48, %c0_49], %126 {strides = array<i32>} : memref<16x8x128xf32, #tpu.memory_space<vmem>>, vector<1x8x128xf32>,
      %127 = arith.truncf %119 : vector<8x128xf32> to vector<8x128xbf16>
      %cst_50 = arith.constant dense<0.000000e+00> : vector<8x256xf32>
      %128 = tpu.matmul %127, %3, %cst_50 {dimension_numbers = #tpu.dot_dimension_numbers<[1], [0], [0], [1], [0, 0, 1, 1], [], []>} : vector<8x128xbf16>, vector<128x256xbf16>, vector<8x256xf32> -> vector<8x256xf32>
      %129 = arith.truncf %128 : vector<8x256xf32> to vector<8x256xbf16>
      %130 = math.tanh %129 : vector<8x256xbf16>
      %131 = arith.extf %130 : vector<8x256xbf16> to vector<8x256xf32>
      %132 = vector.extract_strided_slice %131 {offsets = [0, 0], sizes = [8, 128], strides = [1, 1]} : vector<8x256xf32> to vector<8x128xf32>
      %133 = vector.extract_strided_slice %131 {offsets = [0, 128], sizes = [8, 128], strides = [1, 1]} : vector<8x256xf32> to vector<8x128xf32>
      %cst_51 = arith.constant 2.500000e-02 : f32
      %134 = vector.broadcast %cst_51 : f32 to vector<8x128xf32>
      %135 = arith.mulf %132, %134 : vector<8x128xf32>
      %136 = arith.addf %119, %135 : vector<8x128xf32>
      %c0_52 = arith.constant 0 : index
      %c6 = arith.constant 6 : index
      %c0_53 = arith.constant 0 : index
      %c0_54 = arith.constant 0 : index
      %137 = vector.load %arg4[%c0_52, %c6, %c0_53, %c0_54] : memref<1x8x8x128xbf16, #tpu.memory_space<vmem>>, vector<1x1x8x128xbf16>
      %138 = vector.shape_cast %137 : vector<1x1x8x128xbf16> to vector<8x128xbf16>
      %139 = arith.extf %138 : vector<8x128xbf16> to vector<8x128xf32>
      %140 = arith.mulf %133, %139 : vector<8x128xf32>
      %141 = arith.addf %136, %140 : vector<8x128xf32>
      %142 = arith.truncf %141 : vector<8x128xf32> to vector<8x128xbf16>
      %cst_55 = arith.constant dense<0.000000e+00> : vector<8x256xf32>
      %143 = tpu.matmul %142, %3, %cst_55 {dimension_numbers = #tpu.dot_dimension_numbers<[1], [0], [0], [1], [0, 0, 1, 1], [], []>} : vector<8x128xbf16>, vector<128x256xbf16>, vector<8x256xf32> -> vector<8x256xf32>
      %144 = arith.truncf %143 : vector<8x256xf32> to vector<8x256xbf16>
      %145 = math.tanh %144 : vector<8x256xbf16>
      %146 = arith.extf %145 : vector<8x256xbf16> to vector<8x256xf32>
      %147 = vector.extract_strided_slice %146 {offsets = [0, 0], sizes = [8, 128], strides = [1, 1]} : vector<8x256xf32> to vector<8x128xf32>
      %148 = vector.extract_strided_slice %146 {offsets = [0, 128], sizes = [8, 128], strides = [1, 1]} : vector<8x256xf32> to vector<8x128xf32>
      %cst_56 = arith.constant 2.500000e-02 : f32
      %149 = vector.broadcast %cst_56 : f32 to vector<8x128xf32>
      %150 = arith.mulf %147, %149 : vector<8x128xf32>
      %151 = arith.addf %141, %150 : vector<8x128xf32>
      %c0_57 = arith.constant 0 : index
      %c7 = arith.constant 7 : index
      %c0_58 = arith.constant 0 : index
      %c0_59 = arith.constant 0 : index
      %152 = vector.load %arg4[%c0_57, %c7, %c0_58, %c0_59] : memref<1x8x8x128xbf16, #tpu.memory_space<vmem>>, vector<1x1x8x128xbf16>
      %153 = vector.shape_cast %152 : vector<1x1x8x128xbf16> to vector<8x128xbf16>
      %154 = arith.extf %153 : vector<8x128xbf16> to vector<8x128xf32>
      %155 = arith.mulf %148, %154 : vector<8x128xf32>
      %156 = arith.addf %151, %155 : vector<8x128xf32>
      %157 = arith.subf %156, %141 : vector<8x128xf32>
      %cst_60 = arith.constant 1.000000e+00 : f32
      %158 = vector.broadcast %cst_60 : f32 to vector<8x128xf32>
      %159 = arith.mulf %157, %158 : vector<8x128xf32>
      %160 = arith.addf %141, %159 : vector<8x128xf32>
      %c6_61 = arith.constant 6 : index
      %c0_62 = arith.constant 0 : index
      %c0_63 = arith.constant 0 : index
      %161 = vector.load %arg7[%c6_61, %c0_62, %c0_63] : memref<16x8x128xf32, #tpu.memory_space<vmem>>, vector<1x8x128xf32>
      %162 = vector.shape_cast %161 : vector<1x8x128xf32> to vector<8x128xf32>
      %163 = vector.shape_cast %160 : vector<8x128xf32> to vector<1x8x128xf32>
      tpu.vector_store %arg7[%c6_61, %c0_62, %c0_63], %163 {strides = array<i32>} : memref<16x8x128xf32, #tpu.memory_space<vmem>>, vector<1x8x128xf32>,
      %c0_64 = arith.constant 0 : index
      %c0_65 = arith.constant 0 : index
      %164 = vector.load %arg6[%c0_64, %c0_65] : memref<8x128xf32, #tpu.memory_space<vmem>>, vector<8x128xf32>
      tpu.vector_store %arg6[%c0_64, %c0_65], %156 {strides = array<i32>} : memref<8x128xf32, #tpu.memory_space<vmem>>, vector<8x128xf32>,
    } else {
    }
    %c2_i32 = arith.constant 2 : i32
    %10 = arith.cmpi eq, %arg1, %c2_i32 : i32
    %11 = arith.extui %10 : i1 to i32
    %c0_i32_5 = arith.constant 0 : i32
    %12 = arith.cmpi ne, %11, %c0_i32_5 : i32
    scf.if %12 {
      %c0_10 = arith.constant 0 : index
      %c0_11 = arith.constant 0 : index
      %22 = vector.load %arg6[%c0_10, %c0_11] : memref<8x128xf32, #tpu.memory_space<vmem>>, vector<8x128xf32>
      %23 = arith.truncf %22 : vector<8x128xf32> to vector<8x128xbf16>
      %cst = arith.constant dense<0.000000e+00> : vector<8x256xf32>
      %24 = tpu.matmul %23, %3, %cst {dimension_numbers = #tpu.dot_dimension_numbers<[1], [0], [0], [1], [0, 0, 1, 1], [], []>} : vector<8x128xbf16>, vector<128x256xbf16>, vector<8x256xf32> -> vector<8x256xf32>
      %25 = arith.truncf %24 : vector<8x256xf32> to vector<8x256xbf16>
      %26 = math.tanh %25 : vector<8x256xbf16>
      %27 = arith.extf %26 : vector<8x256xbf16> to vector<8x256xf32>
      %28 = vector.extract_strided_slice %27 {offsets = [0, 0], sizes = [8, 128], strides = [1, 1]} : vector<8x256xf32> to vector<8x128xf32>
      %29 = vector.extract_strided_slice %27 {offsets = [0, 128], sizes = [8, 128], strides = [1, 1]} : vector<8x256xf32> to vector<8x128xf32>
      %cst_12 = arith.constant 2.500000e-02 : f32
      %30 = vector.broadcast %cst_12 : f32 to vector<8x128xf32>
      %31 = arith.mulf %28, %30 : vector<8x128xf32>
      %32 = arith.addf %22, %31 : vector<8x128xf32>
      %c0_13 = arith.constant 0 : index
      %c0_14 = arith.constant 0 : index
      %c0_15 = arith.constant 0 : index
      %c0_16 = arith.constant 0 : index
      %33 = vector.load %arg4[%c0_13, %c0_14, %c0_15, %c0_16] : memref<1x8x8x128xbf16, #tpu.memory_space<vmem>>, vector<1x1x8x128xbf16>
      %34 = vector.shape_cast %33 : vector<1x1x8x128xbf16> to vector<8x128xbf16>
      %35 = arith.extf %34 : vector<8x128xbf16> to vector<8x128xf32>
      %36 = arith.mulf %29, %35 : vector<8x128xf32>
      %37 = arith.addf %32, %36 : vector<8x128xf32>
      %38 = arith.truncf %37 : vector<8x128xf32> to vector<8x128xbf16>
      %cst_17 = arith.constant dense<0.000000e+00> : vector<8x256xf32>
      %39 = tpu.matmul %38, %3, %cst_17 {dimension_numbers = #tpu.dot_dimension_numbers<[1], [0], [0], [1], [0, 0, 1, 1], [], []>} : vector<8x128xbf16>, vector<128x256xbf16>, vector<8x256xf32> -> vector<8x256xf32>
      %40 = arith.truncf %39 : vector<8x256xf32> to vector<8x256xbf16>
      %41 = math.tanh %40 : vector<8x256xbf16>
      %42 = arith.extf %41 : vector<8x256xbf16> to vector<8x256xf32>
      %43 = vector.extract_strided_slice %42 {offsets = [0, 0], sizes = [8, 128], strides = [1, 1]} : vector<8x256xf32> to vector<8x128xf32>
      %44 = vector.extract_strided_slice %42 {offsets = [0, 128], sizes = [8, 128], strides = [1, 1]} : vector<8x256xf32> to vector<8x128xf32>
      %cst_18 = arith.constant 2.500000e-02 : f32
      %45 = vector.broadcast %cst_18 : f32 to vector<8x128xf32>
      %46 = arith.mulf %43, %45 : vector<8x128xf32>
      %47 = arith.addf %37, %46 : vector<8x128xf32>
      %c0_19 = arith.constant 0 : index
      %c1 = arith.constant 1 : index
      %c0_20 = arith.constant 0 : index
      %c0_21 = arith.constant 0 : index
      %48 = vector.load %arg4[%c0_19, %c1, %c0_20, %c0_21] : memref<1x8x8x128xbf16, #tpu.memory_space<vmem>>, vector<1x1x8x128xbf16>
      %49 = vector.shape_cast %48 : vector<1x1x8x128xbf16> to vector<8x128xbf16>
      %50 = arith.extf %49 : vector<8x128xbf16> to vector<8x128xf32>
      %51 = arith.mulf %44, %50 : vector<8x128xf32>
      %52 = arith.addf %47, %51 : vector<8x128xf32>
      %53 = arith.truncf %52 : vector<8x128xf32> to vector<8x128xbf16>
      %cst_22 = arith.constant dense<0.000000e+00> : vector<8x256xf32>
      %54 = tpu.matmul %53, %3, %cst_22 {dimension_numbers = #tpu.dot_dimension_numbers<[1], [0], [0], [1], [0, 0, 1, 1], [], []>} : vector<8x128xbf16>, vector<128x256xbf16>, vector<8x256xf32> -> vector<8x256xf32>
      %55 = arith.truncf %54 : vector<8x256xf32> to vector<8x256xbf16>
      %56 = math.tanh %55 : vector<8x256xbf16>
      %57 = arith.extf %56 : vector<8x256xbf16> to vector<8x256xf32>
      %58 = vector.extract_strided_slice %57 {offsets = [0, 0], sizes = [8, 128], strides = [1, 1]} : vector<8x256xf32> to vector<8x128xf32>
      %59 = vector.extract_strided_slice %57 {offsets = [0, 128], sizes = [8, 128], strides = [1, 1]} : vector<8x256xf32> to vector<8x128xf32>
      %cst_23 = arith.constant 2.500000e-02 : f32
      %60 = vector.broadcast %cst_23 : f32 to vector<8x128xf32>
      %61 = arith.mulf %58, %60 : vector<8x128xf32>
      %62 = arith.addf %52, %61 : vector<8x128xf32>
      %c0_24 = arith.constant 0 : index
      %c2 = arith.constant 2 : index
      %c0_25 = arith.constant 0 : index
      %c0_26 = arith.constant 0 : index
      %63 = vector.load %arg4[%c0_24, %c2, %c0_25, %c0_26] : memref<1x8x8x128xbf16, #tpu.memory_space<vmem>>, vector<1x1x8x128xbf16>
      %64 = vector.shape_cast %63 : vector<1x1x8x128xbf16> to vector<8x128xbf16>
      %65 = arith.extf %64 : vector<8x128xbf16> to vector<8x128xf32>
      %66 = arith.mulf %59, %65 : vector<8x128xf32>
      %67 = arith.addf %62, %66 : vector<8x128xf32>
      %68 = arith.subf %67, %52 : vector<8x128xf32>
      %cst_27 = arith.constant 0.666666686 : f32
      %69 = vector.broadcast %cst_27 : f32 to vector<8x128xf32>
      %70 = arith.mulf %68, %69 : vector<8x128xf32>
      %71 = arith.addf %52, %70 : vector<8x128xf32>
      %c7 = arith.constant 7 : index
      %c0_28 = arith.constant 0 : index
      %c0_29 = arith.constant 0 : index
      %72 = vector.load %arg7[%c7, %c0_28, %c0_29] : memref<16x8x128xf32, #tpu.memory_space<vmem>>, vector<1x8x128xf32>
      %73 = vector.shape_cast %72 : vector<1x8x128xf32> to vector<8x128xf32>
      %74 = vector.shape_cast %71 : vector<8x128xf32> to vector<1x8x128xf32>
      tpu.vector_store %arg7[%c7, %c0_28, %c0_29], %74 {strides = array<i32>} : memref<16x8x128xf32, #tpu.memory_space<vmem>>, vector<1x8x128xf32>,
      %75 = arith.truncf %67 : vector<8x128xf32> to vector<8x128xbf16>
      %cst_30 = arith.constant dense<0.000000e+00> : vector<8x256xf32>
      %76 = tpu.matmul %75, %3, %cst_30 {dimension_numbers = #tpu.dot_dimension_numbers<[1], [0], [0], [1], [0, 0, 1, 1], [], []>} : vector<8x128xbf16>, vector<128x256xbf16>, vector<8x256xf32> -> vector<8x256xf32>
      %77 = arith.truncf %76 : vector<8x256xf32> to vector<8x256xbf16>
      %78 = math.tanh %77 : vector<8x256xbf16>
      %79 = arith.extf %78 : vector<8x256xbf16> to vector<8x256xf32>
      %80 = vector.extract_strided_slice %79 {offsets = [0, 0], sizes = [8, 128], strides = [1, 1]} : vector<8x256xf32> to vector<8x128xf32>
      %81 = vector.extract_strided_slice %79 {offsets = [0, 128], sizes = [8, 128], strides = [1, 1]} : vector<8x256xf32> to vector<8x128xf32>
      %cst_31 = arith.constant 2.500000e-02 : f32
      %82 = vector.broadcast %cst_31 : f32 to vector<8x128xf32>
      %83 = arith.mulf %80, %82 : vector<8x128xf32>
      %84 = arith.addf %67, %83 : vector<8x128xf32>
      %c0_32 = arith.constant 0 : index
      %c3 = arith.constant 3 : index
      %c0_33 = arith.constant 0 : index
      %c0_34 = arith.constant 0 : index
      %85 = vector.load %arg4[%c0_32, %c3, %c0_33, %c0_34] : memref<1x8x8x128xbf16, #tpu.memory_space<vmem>>, vector<1x1x8x128xbf16>
      %86 = vector.shape_cast %85 : vector<1x1x8x128xbf16> to vector<8x128xbf16>
      %87 = arith.extf %86 : vector<8x128xbf16> to vector<8x128xf32>
      %88 = arith.mulf %81, %87 : vector<8x128xf32>
      %89 = arith.addf %84, %88 : vector<8x128xf32>
      %90 = arith.truncf %89 : vector<8x128xf32> to vector<8x128xbf16>
      %cst_35 = arith.constant dense<0.000000e+00> : vector<8x256xf32>
      %91 = tpu.matmul %90, %3, %cst_35 {dimension_numbers = #tpu.dot_dimension_numbers<[1], [0], [0], [1], [0, 0, 1, 1], [], []>} : vector<8x128xbf16>, vector<128x256xbf16>, vector<8x256xf32> -> vector<8x256xf32>
      %92 = arith.truncf %91 : vector<8x256xf32> to vector<8x256xbf16>
      %93 = math.tanh %92 : vector<8x256xbf16>
      %94 = arith.extf %93 : vector<8x256xbf16> to vector<8x256xf32>
      %95 = vector.extract_strided_slice %94 {offsets = [0, 0], sizes = [8, 128], strides = [1, 1]} : vector<8x256xf32> to vector<8x128xf32>
      %96 = vector.extract_strided_slice %94 {offsets = [0, 128], sizes = [8, 128], strides = [1, 1]} : vector<8x256xf32> to vector<8x128xf32>
      %cst_36 = arith.constant 2.500000e-02 : f32
      %97 = vector.broadcast %cst_36 : f32 to vector<8x128xf32>
      %98 = arith.mulf %95, %97 : vector<8x128xf32>
      %99 = arith.addf %89, %98 : vector<8x128xf32>
      %c0_37 = arith.constant 0 : index
      %c4 = arith.constant 4 : index
      %c0_38 = arith.constant 0 : index
      %c0_39 = arith.constant 0 : index
      %100 = vector.load %arg4[%c0_37, %c4, %c0_38, %c0_39] : memref<1x8x8x128xbf16, #tpu.memory_space<vmem>>, vector<1x1x8x128xbf16>
      %101 = vector.shape_cast %100 : vector<1x1x8x128xbf16> to vector<8x128xbf16>
      %102 = arith.extf %101 : vector<8x128xbf16> to vector<8x128xf32>
      %103 = arith.mulf %96, %102 : vector<8x128xf32>
      %104 = arith.addf %99, %103 : vector<8x128xf32>
      %105 = arith.truncf %104 : vector<8x128xf32> to vector<8x128xbf16>
      %cst_40 = arith.constant dense<0.000000e+00> : vector<8x256xf32>
      %106 = tpu.matmul %105, %3, %cst_40 {dimension_numbers = #tpu.dot_dimension_numbers<[1], [0], [0], [1], [0, 0, 1, 1], [], []>} : vector<8x128xbf16>, vector<128x256xbf16>, vector<8x256xf32> -> vector<8x256xf32>
      %107 = arith.truncf %106 : vector<8x256xf32> to vector<8x256xbf16>
      %108 = math.tanh %107 : vector<8x256xbf16>
      %109 = arith.extf %108 : vector<8x256xbf16> to vector<8x256xf32>
      %110 = vector.extract_strided_slice %109 {offsets = [0, 0], sizes = [8, 128], strides = [1, 1]} : vector<8x256xf32> to vector<8x128xf32>
      %111 = vector.extract_strided_slice %109 {offsets = [0, 128], sizes = [8, 128], strides = [1, 1]} : vector<8x256xf32> to vector<8x128xf32>
      %cst_41 = arith.constant 2.500000e-02 : f32
      %112 = vector.broadcast %cst_41 : f32 to vector<8x128xf32>
      %113 = arith.mulf %110, %112 : vector<8x128xf32>
      %114 = arith.addf %104, %113 : vector<8x128xf32>
      %c0_42 = arith.constant 0 : index
      %c5 = arith.constant 5 : index
      %c0_43 = arith.constant 0 : index
      %c0_44 = arith.constant 0 : index
      %115 = vector.load %arg4[%c0_42, %c5, %c0_43, %c0_44] : memref<1x8x8x128xbf16, #tpu.memory_space<vmem>>, vector<1x1x8x128xbf16>
      %116 = vector.shape_cast %115 : vector<1x1x8x128xbf16> to vector<8x128xbf16>
      %117 = arith.extf %116 : vector<8x128xbf16> to vector<8x128xf32>
      %118 = arith.mulf %111, %117 : vector<8x128xf32>
      %119 = arith.addf %114, %118 : vector<8x128xf32>
      %120 = arith.subf %119, %104 : vector<8x128xf32>
      %cst_45 = arith.constant 0.333333343 : f32
      %121 = vector.broadcast %cst_45 : f32 to vector<8x128xf32>
      %122 = arith.mulf %120, %121 : vector<8x128xf32>
      %123 = arith.addf %104, %122 : vector<8x128xf32>
      %c8 = arith.constant 8 : index
      %c0_46 = arith.constant 0 : index
      %c0_47 = arith.constant 0 : index
      %124 = vector.load %arg7[%c8, %c0_46, %c0_47] : memref<16x8x128xf32, #tpu.memory_space<vmem>>, vector<1x8x128xf32>
      %125 = vector.shape_cast %124 : vector<1x8x128xf32> to vector<8x128xf32>
      %126 = vector.shape_cast %123 : vector<8x128xf32> to vector<1x8x128xf32>
      tpu.vector_store %arg7[%c8, %c0_46, %c0_47], %126 {strides = array<i32>} : memref<16x8x128xf32, #tpu.memory_space<vmem>>, vector<1x8x128xf32>,
      %127 = arith.truncf %119 : vector<8x128xf32> to vector<8x128xbf16>
      %cst_48 = arith.constant dense<0.000000e+00> : vector<8x256xf32>
      %128 = tpu.matmul %127, %3, %cst_48 {dimension_numbers = #tpu.dot_dimension_numbers<[1], [0], [0], [1], [0, 0, 1, 1], [], []>} : vector<8x128xbf16>, vector<128x256xbf16>, vector<8x256xf32> -> vector<8x256xf32>
      %129 = arith.truncf %128 : vector<8x256xf32> to vector<8x256xbf16>
      %130 = math.tanh %129 : vector<8x256xbf16>
      %131 = arith.extf %130 : vector<8x256xbf16> to vector<8x256xf32>
      %132 = vector.extract_strided_slice %131 {offsets = [0, 0], sizes = [8, 128], strides = [1, 1]} : vector<8x256xf32> to vector<8x128xf32>
      %133 = vector.extract_strided_slice %131 {offsets = [0, 128], sizes = [8, 128], strides = [1, 1]} : vector<8x256xf32> to vector<8x128xf32>
      %cst_49 = arith.constant 2.500000e-02 : f32
      %134 = vector.broadcast %cst_49 : f32 to vector<8x128xf32>
      %135 = arith.mulf %132, %134 : vector<8x128xf32>
      %136 = arith.addf %119, %135 : vector<8x128xf32>
      %c0_50 = arith.constant 0 : index
      %c6 = arith.constant 6 : index
      %c0_51 = arith.constant 0 : index
      %c0_52 = arith.constant 0 : index
      %137 = vector.load %arg4[%c0_50, %c6, %c0_51, %c0_52] : memref<1x8x8x128xbf16, #tpu.memory_space<vmem>>, vector<1x1x8x128xbf16>
      %138 = vector.shape_cast %137 : vector<1x1x8x128xbf16> to vector<8x128xbf16>
      %139 = arith.extf %138 : vector<8x128xbf16> to vector<8x128xf32>
      %140 = arith.mulf %133, %139 : vector<8x128xf32>
      %141 = arith.addf %136, %140 : vector<8x128xf32>
      %142 = arith.truncf %141 : vector<8x128xf32> to vector<8x128xbf16>
      %cst_53 = arith.constant dense<0.000000e+00> : vector<8x256xf32>
      %143 = tpu.matmul %142, %3, %cst_53 {dimension_numbers = #tpu.dot_dimension_numbers<[1], [0], [0], [1], [0, 0, 1, 1], [], []>} : vector<8x128xbf16>, vector<128x256xbf16>, vector<8x256xf32> -> vector<8x256xf32>
      %144 = arith.truncf %143 : vector<8x256xf32> to vector<8x256xbf16>
      %145 = math.tanh %144 : vector<8x256xbf16>
      %146 = arith.extf %145 : vector<8x256xbf16> to vector<8x256xf32>
      %147 = vector.extract_strided_slice %146 {offsets = [0, 0], sizes = [8, 128], strides = [1, 1]} : vector<8x256xf32> to vector<8x128xf32>
      %148 = vector.extract_strided_slice %146 {offsets = [0, 128], sizes = [8, 128], strides = [1, 1]} : vector<8x256xf32> to vector<8x128xf32>
      %cst_54 = arith.constant 2.500000e-02 : f32
      %149 = vector.broadcast %cst_54 : f32 to vector<8x128xf32>
      %150 = arith.mulf %147, %149 : vector<8x128xf32>
      %151 = arith.addf %141, %150 : vector<8x128xf32>
      %c0_55 = arith.constant 0 : index
      %c7_56 = arith.constant 7 : index
      %c0_57 = arith.constant 0 : index
      %c0_58 = arith.constant 0 : index
      %152 = vector.load %arg4[%c0_55, %c7_56, %c0_57, %c0_58] : memref<1x8x8x128xbf16, #tpu.memory_space<vmem>>, vector<1x1x8x128xbf16>
      %153 = vector.shape_cast %152 : vector<1x1x8x128xbf16> to vector<8x128xbf16>
      %154 = arith.extf %153 : vector<8x128xbf16> to vector<8x128xf32>
      %155 = arith.mulf %148, %154 : vector<8x128xf32>
      %156 = arith.addf %151, %155 : vector<8x128xf32>
      %157 = arith.subf %156, %141 : vector<8x128xf32>
      %cst_59 = arith.constant 1.000000e+00 : f32
      %158 = vector.broadcast %cst_59 : f32 to vector<8x128xf32>
      %159 = arith.mulf %157, %158 : vector<8x128xf32>
      %160 = arith.addf %141, %159 : vector<8x128xf32>
      %c9 = arith.constant 9 : index
      %c0_60 = arith.constant 0 : index
      %c0_61 = arith.constant 0 : index
      %161 = vector.load %arg7[%c9, %c0_60, %c0_61] : memref<16x8x128xf32, #tpu.memory_space<vmem>>, vector<1x8x128xf32>
      %162 = vector.shape_cast %161 : vector<1x8x128xf32> to vector<8x128xf32>
      %163 = vector.shape_cast %160 : vector<8x128xf32> to vector<1x8x128xf32>
      tpu.vector_store %arg7[%c9, %c0_60, %c0_61], %163 {strides = array<i32>} : memref<16x8x128xf32, #tpu.memory_space<vmem>>, vector<1x8x128xf32>,
      %c0_62 = arith.constant 0 : index
      %c0_63 = arith.constant 0 : index
      %164 = vector.load %arg6[%c0_62, %c0_63] : memref<8x128xf32, #tpu.memory_space<vmem>>, vector<8x128xf32>
      tpu.vector_store %arg6[%c0_62, %c0_63], %156 {strides = array<i32>} : memref<8x128xf32, #tpu.memory_space<vmem>>, vector<8x128xf32>,
    } else {
    }
    %c3_i32 = arith.constant 3 : i32
    %13 = arith.cmpi eq, %arg1, %c3_i32 : i32
    %14 = arith.extui %13 : i1 to i32
    %c0_i32_6 = arith.constant 0 : i32
    %15 = arith.cmpi ne, %14, %c0_i32_6 : i32
    scf.if %15 {
      %c0_10 = arith.constant 0 : index
      %c0_11 = arith.constant 0 : index
      %22 = vector.load %arg6[%c0_10, %c0_11] : memref<8x128xf32, #tpu.memory_space<vmem>>, vector<8x128xf32>
      %23 = arith.truncf %22 : vector<8x128xf32> to vector<8x128xbf16>
      %cst = arith.constant dense<0.000000e+00> : vector<8x256xf32>
      %24 = tpu.matmul %23, %3, %cst {dimension_numbers = #tpu.dot_dimension_numbers<[1], [0], [0], [1], [0, 0, 1, 1], [], []>} : vector<8x128xbf16>, vector<128x256xbf16>, vector<8x256xf32> -> vector<8x256xf32>
      %25 = arith.truncf %24 : vector<8x256xf32> to vector<8x256xbf16>
      %26 = math.tanh %25 : vector<8x256xbf16>
      %27 = arith.extf %26 : vector<8x256xbf16> to vector<8x256xf32>
      %28 = vector.extract_strided_slice %27 {offsets = [0, 0], sizes = [8, 128], strides = [1, 1]} : vector<8x256xf32> to vector<8x128xf32>
      %29 = vector.extract_strided_slice %27 {offsets = [0, 128], sizes = [8, 128], strides = [1, 1]} : vector<8x256xf32> to vector<8x128xf32>
      %cst_12 = arith.constant 2.500000e-02 : f32
      %30 = vector.broadcast %cst_12 : f32 to vector<8x128xf32>
      %31 = arith.mulf %28, %30 : vector<8x128xf32>
      %32 = arith.addf %22, %31 : vector<8x128xf32>
      %c0_13 = arith.constant 0 : index
      %c0_14 = arith.constant 0 : index
      %c0_15 = arith.constant 0 : index
      %c0_16 = arith.constant 0 : index
      %33 = vector.load %arg4[%c0_13, %c0_14, %c0_15, %c0_16] : memref<1x8x8x128xbf16, #tpu.memory_space<vmem>>, vector<1x1x8x128xbf16>
      %34 = vector.shape_cast %33 : vector<1x1x8x128xbf16> to vector<8x128xbf16>
      %35 = arith.extf %34 : vector<8x128xbf16> to vector<8x128xf32>
      %36 = arith.mulf %29, %35 : vector<8x128xf32>
      %37 = arith.addf %32, %36 : vector<8x128xf32>
      %38 = arith.truncf %37 : vector<8x128xf32> to vector<8x128xbf16>
      %cst_17 = arith.constant dense<0.000000e+00> : vector<8x256xf32>
      %39 = tpu.matmul %38, %3, %cst_17 {dimension_numbers = #tpu.dot_dimension_numbers<[1], [0], [0], [1], [0, 0, 1, 1], [], []>} : vector<8x128xbf16>, vector<128x256xbf16>, vector<8x256xf32> -> vector<8x256xf32>
      %40 = arith.truncf %39 : vector<8x256xf32> to vector<8x256xbf16>
      %41 = math.tanh %40 : vector<8x256xbf16>
      %42 = arith.extf %41 : vector<8x256xbf16> to vector<8x256xf32>
      %43 = vector.extract_strided_slice %42 {offsets = [0, 0], sizes = [8, 128], strides = [1, 1]} : vector<8x256xf32> to vector<8x128xf32>
      %44 = vector.extract_strided_slice %42 {offsets = [0, 128], sizes = [8, 128], strides = [1, 1]} : vector<8x256xf32> to vector<8x128xf32>
      %cst_18 = arith.constant 2.500000e-02 : f32
      %45 = vector.broadcast %cst_18 : f32 to vector<8x128xf32>
      %46 = arith.mulf %43, %45 : vector<8x128xf32>
      %47 = arith.addf %37, %46 : vector<8x128xf32>
      %c0_19 = arith.constant 0 : index
      %c1 = arith.constant 1 : index
      %c0_20 = arith.constant 0 : index
      %c0_21 = arith.constant 0 : index
      %48 = vector.load %arg4[%c0_19, %c1, %c0_20, %c0_21] : memref<1x8x8x128xbf16, #tpu.memory_space<vmem>>, vector<1x1x8x128xbf16>
      %49 = vector.shape_cast %48 : vector<1x1x8x128xbf16> to vector<8x128xbf16>
      %50 = arith.extf %49 : vector<8x128xbf16> to vector<8x128xf32>
      %51 = arith.mulf %44, %50 : vector<8x128xf32>
      %52 = arith.addf %47, %51 : vector<8x128xf32>
      %53 = arith.truncf %52 : vector<8x128xf32> to vector<8x128xbf16>
      %cst_22 = arith.constant dense<0.000000e+00> : vector<8x256xf32>
      %54 = tpu.matmul %53, %3, %cst_22 {dimension_numbers = #tpu.dot_dimension_numbers<[1], [0], [0], [1], [0, 0, 1, 1], [], []>} : vector<8x128xbf16>, vector<128x256xbf16>, vector<8x256xf32> -> vector<8x256xf32>
      %55 = arith.truncf %54 : vector<8x256xf32> to vector<8x256xbf16>
      %56 = math.tanh %55 : vector<8x256xbf16>
      %57 = arith.extf %56 : vector<8x256xbf16> to vector<8x256xf32>
      %58 = vector.extract_strided_slice %57 {offsets = [0, 0], sizes = [8, 128], strides = [1, 1]} : vector<8x256xf32> to vector<8x128xf32>
      %59 = vector.extract_strided_slice %57 {offsets = [0, 128], sizes = [8, 128], strides = [1, 1]} : vector<8x256xf32> to vector<8x128xf32>
      %cst_23 = arith.constant 2.500000e-02 : f32
      %60 = vector.broadcast %cst_23 : f32 to vector<8x128xf32>
      %61 = arith.mulf %58, %60 : vector<8x128xf32>
      %62 = arith.addf %52, %61 : vector<8x128xf32>
      %c0_24 = arith.constant 0 : index
      %c2 = arith.constant 2 : index
      %c0_25 = arith.constant 0 : index
      %c0_26 = arith.constant 0 : index
      %63 = vector.load %arg4[%c0_24, %c2, %c0_25, %c0_26] : memref<1x8x8x128xbf16, #tpu.memory_space<vmem>>, vector<1x1x8x128xbf16>
      %64 = vector.shape_cast %63 : vector<1x1x8x128xbf16> to vector<8x128xbf16>
      %65 = arith.extf %64 : vector<8x128xbf16> to vector<8x128xf32>
      %66 = arith.mulf %59, %65 : vector<8x128xf32>
      %67 = arith.addf %62, %66 : vector<8x128xf32>
      %68 = arith.subf %67, %52 : vector<8x128xf32>
      %cst_27 = arith.constant 0.666666686 : f32
      %69 = vector.broadcast %cst_27 : f32 to vector<8x128xf32>
      %70 = arith.mulf %68, %69 : vector<8x128xf32>
      %71 = arith.addf %52, %70 : vector<8x128xf32>
      %c10 = arith.constant 10 : index
      %c0_28 = arith.constant 0 : index
      %c0_29 = arith.constant 0 : index
      %72 = vector.load %arg7[%c10, %c0_28, %c0_29] : memref<16x8x128xf32, #tpu.memory_space<vmem>>, vector<1x8x128xf32>
      %73 = vector.shape_cast %72 : vector<1x8x128xf32> to vector<8x128xf32>
      %74 = vector.shape_cast %71 : vector<8x128xf32> to vector<1x8x128xf32>
      tpu.vector_store %arg7[%c10, %c0_28, %c0_29], %74 {strides = array<i32>} : memref<16x8x128xf32, #tpu.memory_space<vmem>>, vector<1x8x128xf32>,
      %75 = arith.truncf %67 : vector<8x128xf32> to vector<8x128xbf16>
      %cst_30 = arith.constant dense<0.000000e+00> : vector<8x256xf32>
      %76 = tpu.matmul %75, %3, %cst_30 {dimension_numbers = #tpu.dot_dimension_numbers<[1], [0], [0], [1], [0, 0, 1, 1], [], []>} : vector<8x128xbf16>, vector<128x256xbf16>, vector<8x256xf32> -> vector<8x256xf32>
      %77 = arith.truncf %76 : vector<8x256xf32> to vector<8x256xbf16>
      %78 = math.tanh %77 : vector<8x256xbf16>
      %79 = arith.extf %78 : vector<8x256xbf16> to vector<8x256xf32>
      %80 = vector.extract_strided_slice %79 {offsets = [0, 0], sizes = [8, 128], strides = [1, 1]} : vector<8x256xf32> to vector<8x128xf32>
      %81 = vector.extract_strided_slice %79 {offsets = [0, 128], sizes = [8, 128], strides = [1, 1]} : vector<8x256xf32> to vector<8x128xf32>
      %cst_31 = arith.constant 2.500000e-02 : f32
      %82 = vector.broadcast %cst_31 : f32 to vector<8x128xf32>
      %83 = arith.mulf %80, %82 : vector<8x128xf32>
      %84 = arith.addf %67, %83 : vector<8x128xf32>
      %c0_32 = arith.constant 0 : index
      %c3 = arith.constant 3 : index
      %c0_33 = arith.constant 0 : index
      %c0_34 = arith.constant 0 : index
      %85 = vector.load %arg4[%c0_32, %c3, %c0_33, %c0_34] : memref<1x8x8x128xbf16, #tpu.memory_space<vmem>>, vector<1x1x8x128xbf16>
      %86 = vector.shape_cast %85 : vector<1x1x8x128xbf16> to vector<8x128xbf16>
      %87 = arith.extf %86 : vector<8x128xbf16> to vector<8x128xf32>
      %88 = arith.mulf %81, %87 : vector<8x128xf32>
      %89 = arith.addf %84, %88 : vector<8x128xf32>
      %90 = arith.truncf %89 : vector<8x128xf32> to vector<8x128xbf16>
      %cst_35 = arith.constant dense<0.000000e+00> : vector<8x256xf32>
      %91 = tpu.matmul %90, %3, %cst_35 {dimension_numbers = #tpu.dot_dimension_numbers<[1], [0], [0], [1], [0, 0, 1, 1], [], []>} : vector<8x128xbf16>, vector<128x256xbf16>, vector<8x256xf32> -> vector<8x256xf32>
      %92 = arith.truncf %91 : vector<8x256xf32> to vector<8x256xbf16>
      %93 = math.tanh %92 : vector<8x256xbf16>
      %94 = arith.extf %93 : vector<8x256xbf16> to vector<8x256xf32>
      %95 = vector.extract_strided_slice %94 {offsets = [0, 0], sizes = [8, 128], strides = [1, 1]} : vector<8x256xf32> to vector<8x128xf32>
      %96 = vector.extract_strided_slice %94 {offsets = [0, 128], sizes = [8, 128], strides = [1, 1]} : vector<8x256xf32> to vector<8x128xf32>
      %cst_36 = arith.constant 2.500000e-02 : f32
      %97 = vector.broadcast %cst_36 : f32 to vector<8x128xf32>
      %98 = arith.mulf %95, %97 : vector<8x128xf32>
      %99 = arith.addf %89, %98 : vector<8x128xf32>
      %c0_37 = arith.constant 0 : index
      %c4 = arith.constant 4 : index
      %c0_38 = arith.constant 0 : index
      %c0_39 = arith.constant 0 : index
      %100 = vector.load %arg4[%c0_37, %c4, %c0_38, %c0_39] : memref<1x8x8x128xbf16, #tpu.memory_space<vmem>>, vector<1x1x8x128xbf16>
      %101 = vector.shape_cast %100 : vector<1x1x8x128xbf16> to vector<8x128xbf16>
      %102 = arith.extf %101 : vector<8x128xbf16> to vector<8x128xf32>
      %103 = arith.mulf %96, %102 : vector<8x128xf32>
      %104 = arith.addf %99, %103 : vector<8x128xf32>
      %105 = arith.truncf %104 : vector<8x128xf32> to vector<8x128xbf16>
      %cst_40 = arith.constant dense<0.000000e+00> : vector<8x256xf32>
      %106 = tpu.matmul %105, %3, %cst_40 {dimension_numbers = #tpu.dot_dimension_numbers<[1], [0], [0], [1], [0, 0, 1, 1], [], []>} : vector<8x128xbf16>, vector<128x256xbf16>, vector<8x256xf32> -> vector<8x256xf32>
      %107 = arith.truncf %106 : vector<8x256xf32> to vector<8x256xbf16>
      %108 = math.tanh %107 : vector<8x256xbf16>
      %109 = arith.extf %108 : vector<8x256xbf16> to vector<8x256xf32>
      %110 = vector.extract_strided_slice %109 {offsets = [0, 0], sizes = [8, 128], strides = [1, 1]} : vector<8x256xf32> to vector<8x128xf32>
      %111 = vector.extract_strided_slice %109 {offsets = [0, 128], sizes = [8, 128], strides = [1, 1]} : vector<8x256xf32> to vector<8x128xf32>
      %cst_41 = arith.constant 2.500000e-02 : f32
      %112 = vector.broadcast %cst_41 : f32 to vector<8x128xf32>
      %113 = arith.mulf %110, %112 : vector<8x128xf32>
      %114 = arith.addf %104, %113 : vector<8x128xf32>
      %c0_42 = arith.constant 0 : index
      %c5 = arith.constant 5 : index
      %c0_43 = arith.constant 0 : index
      %c0_44 = arith.constant 0 : index
      %115 = vector.load %arg4[%c0_42, %c5, %c0_43, %c0_44] : memref<1x8x8x128xbf16, #tpu.memory_space<vmem>>, vector<1x1x8x128xbf16>
      %116 = vector.shape_cast %115 : vector<1x1x8x128xbf16> to vector<8x128xbf16>
      %117 = arith.extf %116 : vector<8x128xbf16> to vector<8x128xf32>
      %118 = arith.mulf %111, %117 : vector<8x128xf32>
      %119 = arith.addf %114, %118 : vector<8x128xf32>
      %120 = arith.subf %119, %104 : vector<8x128xf32>
      %cst_45 = arith.constant 0.333333343 : f32
      %121 = vector.broadcast %cst_45 : f32 to vector<8x128xf32>
      %122 = arith.mulf %120, %121 : vector<8x128xf32>
      %123 = arith.addf %104, %122 : vector<8x128xf32>
      %c11 = arith.constant 11 : index
      %c0_46 = arith.constant 0 : index
      %c0_47 = arith.constant 0 : index
      %124 = vector.load %arg7[%c11, %c0_46, %c0_47] : memref<16x8x128xf32, #tpu.memory_space<vmem>>, vector<1x8x128xf32>
      %125 = vector.shape_cast %124 : vector<1x8x128xf32> to vector<8x128xf32>
      %126 = vector.shape_cast %123 : vector<8x128xf32> to vector<1x8x128xf32>
      tpu.vector_store %arg7[%c11, %c0_46, %c0_47], %126 {strides = array<i32>} : memref<16x8x128xf32, #tpu.memory_space<vmem>>, vector<1x8x128xf32>,
      %127 = arith.truncf %119 : vector<8x128xf32> to vector<8x128xbf16>
      %cst_48 = arith.constant dense<0.000000e+00> : vector<8x256xf32>
      %128 = tpu.matmul %127, %3, %cst_48 {dimension_numbers = #tpu.dot_dimension_numbers<[1], [0], [0], [1], [0, 0, 1, 1], [], []>} : vector<8x128xbf16>, vector<128x256xbf16>, vector<8x256xf32> -> vector<8x256xf32>
      %129 = arith.truncf %128 : vector<8x256xf32> to vector<8x256xbf16>
      %130 = math.tanh %129 : vector<8x256xbf16>
      %131 = arith.extf %130 : vector<8x256xbf16> to vector<8x256xf32>
      %132 = vector.extract_strided_slice %131 {offsets = [0, 0], sizes = [8, 128], strides = [1, 1]} : vector<8x256xf32> to vector<8x128xf32>
      %133 = vector.extract_strided_slice %131 {offsets = [0, 128], sizes = [8, 128], strides = [1, 1]} : vector<8x256xf32> to vector<8x128xf32>
      %cst_49 = arith.constant 2.500000e-02 : f32
      %134 = vector.broadcast %cst_49 : f32 to vector<8x128xf32>
      %135 = arith.mulf %132, %134 : vector<8x128xf32>
      %136 = arith.addf %119, %135 : vector<8x128xf32>
      %c0_50 = arith.constant 0 : index
      %c6 = arith.constant 6 : index
      %c0_51 = arith.constant 0 : index
      %c0_52 = arith.constant 0 : index
      %137 = vector.load %arg4[%c0_50, %c6, %c0_51, %c0_52] : memref<1x8x8x128xbf16, #tpu.memory_space<vmem>>, vector<1x1x8x128xbf16>
      %138 = vector.shape_cast %137 : vector<1x1x8x128xbf16> to vector<8x128xbf16>
      %139 = arith.extf %138 : vector<8x128xbf16> to vector<8x128xf32>
      %140 = arith.mulf %133, %139 : vector<8x128xf32>
      %141 = arith.addf %136, %140 : vector<8x128xf32>
      %142 = arith.truncf %141 : vector<8x128xf32> to vector<8x128xbf16>
      %cst_53 = arith.constant dense<0.000000e+00> : vector<8x256xf32>
      %143 = tpu.matmul %142, %3, %cst_53 {dimension_numbers = #tpu.dot_dimension_numbers<[1], [0], [0], [1], [0, 0, 1, 1], [], []>} : vector<8x128xbf16>, vector<128x256xbf16>, vector<8x256xf32> -> vector<8x256xf32>
      %144 = arith.truncf %143 : vector<8x256xf32> to vector<8x256xbf16>
      %145 = math.tanh %144 : vector<8x256xbf16>
      %146 = arith.extf %145 : vector<8x256xbf16> to vector<8x256xf32>
      %147 = vector.extract_strided_slice %146 {offsets = [0, 0], sizes = [8, 128], strides = [1, 1]} : vector<8x256xf32> to vector<8x128xf32>
      %148 = vector.extract_strided_slice %146 {offsets = [0, 128], sizes = [8, 128], strides = [1, 1]} : vector<8x256xf32> to vector<8x128xf32>
      %cst_54 = arith.constant 2.500000e-02 : f32
      %149 = vector.broadcast %cst_54 : f32 to vector<8x128xf32>
      %150 = arith.mulf %147, %149 : vector<8x128xf32>
      %151 = arith.addf %141, %150 : vector<8x128xf32>
      %c0_55 = arith.constant 0 : index
      %c7 = arith.constant 7 : index
      %c0_56 = arith.constant 0 : index
      %c0_57 = arith.constant 0 : index
      %152 = vector.load %arg4[%c0_55, %c7, %c0_56, %c0_57] : memref<1x8x8x128xbf16, #tpu.memory_space<vmem>>, vector<1x1x8x128xbf16>
      %153 = vector.shape_cast %152 : vector<1x1x8x128xbf16> to vector<8x128xbf16>
      %154 = arith.extf %153 : vector<8x128xbf16> to vector<8x128xf32>
      %155 = arith.mulf %148, %154 : vector<8x128xf32>
      %156 = arith.addf %151, %155 : vector<8x128xf32>
      %157 = arith.subf %156, %141 : vector<8x128xf32>
      %cst_58 = arith.constant 1.000000e+00 : f32
      %158 = vector.broadcast %cst_58 : f32 to vector<8x128xf32>
      %159 = arith.mulf %157, %158 : vector<8x128xf32>
      %160 = arith.addf %141, %159 : vector<8x128xf32>
      %c12 = arith.constant 12 : index
      %c0_59 = arith.constant 0 : index
      %c0_60 = arith.constant 0 : index
      %161 = vector.load %arg7[%c12, %c0_59, %c0_60] : memref<16x8x128xf32, #tpu.memory_space<vmem>>, vector<1x8x128xf32>
      %162 = vector.shape_cast %161 : vector<1x8x128xf32> to vector<8x128xf32>
      %163 = vector.shape_cast %160 : vector<8x128xf32> to vector<1x8x128xf32>
      tpu.vector_store %arg7[%c12, %c0_59, %c0_60], %163 {strides = array<i32>} : memref<16x8x128xf32, #tpu.memory_space<vmem>>, vector<1x8x128xf32>,
      %c0_61 = arith.constant 0 : index
      %c0_62 = arith.constant 0 : index
      %164 = vector.load %arg6[%c0_61, %c0_62] : memref<8x128xf32, #tpu.memory_space<vmem>>, vector<8x128xf32>
      tpu.vector_store %arg6[%c0_61, %c0_62], %156 {strides = array<i32>} : memref<8x128xf32, #tpu.memory_space<vmem>>, vector<8x128xf32>,
    } else {
    }
    %c4_i32 = arith.constant 4 : i32
    %16 = arith.cmpi eq, %arg1, %c4_i32 : i32
    %17 = arith.extui %16 : i1 to i32
    %c0_i32_7 = arith.constant 0 : i32
    %18 = arith.cmpi ne, %17, %c0_i32_7 : i32
    scf.if %18 {
      %c0_10 = arith.constant 0 : index
      %c0_11 = arith.constant 0 : index
      %22 = vector.load %arg6[%c0_10, %c0_11] : memref<8x128xf32, #tpu.memory_space<vmem>>, vector<8x128xf32>
      %23 = arith.truncf %22 : vector<8x128xf32> to vector<8x128xbf16>
      %cst = arith.constant dense<0.000000e+00> : vector<8x256xf32>
      %24 = tpu.matmul %23, %3, %cst {dimension_numbers = #tpu.dot_dimension_numbers<[1], [0], [0], [1], [0, 0, 1, 1], [], []>} : vector<8x128xbf16>, vector<128x256xbf16>, vector<8x256xf32> -> vector<8x256xf32>
      %25 = arith.truncf %24 : vector<8x256xf32> to vector<8x256xbf16>
      %26 = math.tanh %25 : vector<8x256xbf16>
      %27 = arith.extf %26 : vector<8x256xbf16> to vector<8x256xf32>
      %28 = vector.extract_strided_slice %27 {offsets = [0, 0], sizes = [8, 128], strides = [1, 1]} : vector<8x256xf32> to vector<8x128xf32>
      %29 = vector.extract_strided_slice %27 {offsets = [0, 128], sizes = [8, 128], strides = [1, 1]} : vector<8x256xf32> to vector<8x128xf32>
      %cst_12 = arith.constant 2.500000e-02 : f32
      %30 = vector.broadcast %cst_12 : f32 to vector<8x128xf32>
      %31 = arith.mulf %28, %30 : vector<8x128xf32>
      %32 = arith.addf %22, %31 : vector<8x128xf32>
      %c0_13 = arith.constant 0 : index
      %c0_14 = arith.constant 0 : index
      %c0_15 = arith.constant 0 : index
      %c0_16 = arith.constant 0 : index
      %33 = vector.load %arg4[%c0_13, %c0_14, %c0_15, %c0_16] : memref<1x8x8x128xbf16, #tpu.memory_space<vmem>>, vector<1x1x8x128xbf16>
      %34 = vector.shape_cast %33 : vector<1x1x8x128xbf16> to vector<8x128xbf16>
      %35 = arith.extf %34 : vector<8x128xbf16> to vector<8x128xf32>
      %36 = arith.mulf %29, %35 : vector<8x128xf32>
      %37 = arith.addf %32, %36 : vector<8x128xf32>
      %38 = arith.truncf %37 : vector<8x128xf32> to vector<8x128xbf16>
      %cst_17 = arith.constant dense<0.000000e+00> : vector<8x256xf32>
      %39 = tpu.matmul %38, %3, %cst_17 {dimension_numbers = #tpu.dot_dimension_numbers<[1], [0], [0], [1], [0, 0, 1, 1], [], []>} : vector<8x128xbf16>, vector<128x256xbf16>, vector<8x256xf32> -> vector<8x256xf32>
      %40 = arith.truncf %39 : vector<8x256xf32> to vector<8x256xbf16>
      %41 = math.tanh %40 : vector<8x256xbf16>
      %42 = arith.extf %41 : vector<8x256xbf16> to vector<8x256xf32>
      %43 = vector.extract_strided_slice %42 {offsets = [0, 0], sizes = [8, 128], strides = [1, 1]} : vector<8x256xf32> to vector<8x128xf32>
      %44 = vector.extract_strided_slice %42 {offsets = [0, 128], sizes = [8, 128], strides = [1, 1]} : vector<8x256xf32> to vector<8x128xf32>
      %cst_18 = arith.constant 2.500000e-02 : f32
      %45 = vector.broadcast %cst_18 : f32 to vector<8x128xf32>
      %46 = arith.mulf %43, %45 : vector<8x128xf32>
      %47 = arith.addf %37, %46 : vector<8x128xf32>
      %c0_19 = arith.constant 0 : index
      %c1 = arith.constant 1 : index
      %c0_20 = arith.constant 0 : index
      %c0_21 = arith.constant 0 : index
      %48 = vector.load %arg4[%c0_19, %c1, %c0_20, %c0_21] : memref<1x8x8x128xbf16, #tpu.memory_space<vmem>>, vector<1x1x8x128xbf16>
      %49 = vector.shape_cast %48 : vector<1x1x8x128xbf16> to vector<8x128xbf16>
      %50 = arith.extf %49 : vector<8x128xbf16> to vector<8x128xf32>
      %51 = arith.mulf %44, %50 : vector<8x128xf32>
      %52 = arith.addf %47, %51 : vector<8x128xf32>
      %53 = arith.truncf %52 : vector<8x128xf32> to vector<8x128xbf16>
      %cst_22 = arith.constant dense<0.000000e+00> : vector<8x256xf32>
      %54 = tpu.matmul %53, %3, %cst_22 {dimension_numbers = #tpu.dot_dimension_numbers<[1], [0], [0], [1], [0, 0, 1, 1], [], []>} : vector<8x128xbf16>, vector<128x256xbf16>, vector<8x256xf32> -> vector<8x256xf32>
      %55 = arith.truncf %54 : vector<8x256xf32> to vector<8x256xbf16>
      %56 = math.tanh %55 : vector<8x256xbf16>
      %57 = arith.extf %56 : vector<8x256xbf16> to vector<8x256xf32>
      %58 = vector.extract_strided_slice %57 {offsets = [0, 0], sizes = [8, 128], strides = [1, 1]} : vector<8x256xf32> to vector<8x128xf32>
      %59 = vector.extract_strided_slice %57 {offsets = [0, 128], sizes = [8, 128], strides = [1, 1]} : vector<8x256xf32> to vector<8x128xf32>
      %cst_23 = arith.constant 2.500000e-02 : f32
      %60 = vector.broadcast %cst_23 : f32 to vector<8x128xf32>
      %61 = arith.mulf %58, %60 : vector<8x128xf32>
      %62 = arith.addf %52, %61 : vector<8x128xf32>
      %c0_24 = arith.constant 0 : index
      %c2 = arith.constant 2 : index
      %c0_25 = arith.constant 0 : index
      %c0_26 = arith.constant 0 : index
      %63 = vector.load %arg4[%c0_24, %c2, %c0_25, %c0_26] : memref<1x8x8x128xbf16, #tpu.memory_space<vmem>>, vector<1x1x8x128xbf16>
      %64 = vector.shape_cast %63 : vector<1x1x8x128xbf16> to vector<8x128xbf16>
      %65 = arith.extf %64 : vector<8x128xbf16> to vector<8x128xf32>
      %66 = arith.mulf %59, %65 : vector<8x128xf32>
      %67 = arith.addf %62, %66 : vector<8x128xf32>
      %68 = arith.subf %67, %52 : vector<8x128xf32>
      %cst_27 = arith.constant 0.666666686 : f32
      %69 = vector.broadcast %cst_27 : f32 to vector<8x128xf32>
      %70 = arith.mulf %68, %69 : vector<8x128xf32>
      %71 = arith.addf %52, %70 : vector<8x128xf32>
      %c13 = arith.constant 13 : index
      %c0_28 = arith.constant 0 : index
      %c0_29 = arith.constant 0 : index
      %72 = vector.load %arg7[%c13, %c0_28, %c0_29] : memref<16x8x128xf32, #tpu.memory_space<vmem>>, vector<1x8x128xf32>
      %73 = vector.shape_cast %72 : vector<1x8x128xf32> to vector<8x128xf32>
      %74 = vector.shape_cast %71 : vector<8x128xf32> to vector<1x8x128xf32>
      tpu.vector_store %arg7[%c13, %c0_28, %c0_29], %74 {strides = array<i32>} : memref<16x8x128xf32, #tpu.memory_space<vmem>>, vector<1x8x128xf32>,
      %75 = arith.truncf %67 : vector<8x128xf32> to vector<8x128xbf16>
      %cst_30 = arith.constant dense<0.000000e+00> : vector<8x256xf32>
      %76 = tpu.matmul %75, %3, %cst_30 {dimension_numbers = #tpu.dot_dimension_numbers<[1], [0], [0], [1], [0, 0, 1, 1], [], []>} : vector<8x128xbf16>, vector<128x256xbf16>, vector<8x256xf32> -> vector<8x256xf32>
      %77 = arith.truncf %76 : vector<8x256xf32> to vector<8x256xbf16>
      %78 = math.tanh %77 : vector<8x256xbf16>
      %79 = arith.extf %78 : vector<8x256xbf16> to vector<8x256xf32>
      %80 = vector.extract_strided_slice %79 {offsets = [0, 0], sizes = [8, 128], strides = [1, 1]} : vector<8x256xf32> to vector<8x128xf32>
      %81 = vector.extract_strided_slice %79 {offsets = [0, 128], sizes = [8, 128], strides = [1, 1]} : vector<8x256xf32> to vector<8x128xf32>
      %cst_31 = arith.constant 2.500000e-02 : f32
      %82 = vector.broadcast %cst_31 : f32 to vector<8x128xf32>
      %83 = arith.mulf %80, %82 : vector<8x128xf32>
      %84 = arith.addf %67, %83 : vector<8x128xf32>
      %c0_32 = arith.constant 0 : index
      %c3 = arith.constant 3 : index
      %c0_33 = arith.constant 0 : index
      %c0_34 = arith.constant 0 : index
      %85 = vector.load %arg4[%c0_32, %c3, %c0_33, %c0_34] : memref<1x8x8x128xbf16, #tpu.memory_space<vmem>>, vector<1x1x8x128xbf16>
      %86 = vector.shape_cast %85 : vector<1x1x8x128xbf16> to vector<8x128xbf16>
      %87 = arith.extf %86 : vector<8x128xbf16> to vector<8x128xf32>
      %88 = arith.mulf %81, %87 : vector<8x128xf32>
      %89 = arith.addf %84, %88 : vector<8x128xf32>
      %90 = arith.truncf %89 : vector<8x128xf32> to vector<8x128xbf16>
      %cst_35 = arith.constant dense<0.000000e+00> : vector<8x256xf32>
      %91 = tpu.matmul %90, %3, %cst_35 {dimension_numbers = #tpu.dot_dimension_numbers<[1], [0], [0], [1], [0, 0, 1, 1], [], []>} : vector<8x128xbf16>, vector<128x256xbf16>, vector<8x256xf32> -> vector<8x256xf32>
      %92 = arith.truncf %91 : vector<8x256xf32> to vector<8x256xbf16>
      %93 = math.tanh %92 : vector<8x256xbf16>
      %94 = arith.extf %93 : vector<8x256xbf16> to vector<8x256xf32>
      %95 = vector.extract_strided_slice %94 {offsets = [0, 0], sizes = [8, 128], strides = [1, 1]} : vector<8x256xf32> to vector<8x128xf32>
      %96 = vector.extract_strided_slice %94 {offsets = [0, 128], sizes = [8, 128], strides = [1, 1]} : vector<8x256xf32> to vector<8x128xf32>
      %cst_36 = arith.constant 2.500000e-02 : f32
      %97 = vector.broadcast %cst_36 : f32 to vector<8x128xf32>
      %98 = arith.mulf %95, %97 : vector<8x128xf32>
      %99 = arith.addf %89, %98 : vector<8x128xf32>
      %c0_37 = arith.constant 0 : index
      %c4 = arith.constant 4 : index
      %c0_38 = arith.constant 0 : index
      %c0_39 = arith.constant 0 : index
      %100 = vector.load %arg4[%c0_37, %c4, %c0_38, %c0_39] : memref<1x8x8x128xbf16, #tpu.memory_space<vmem>>, vector<1x1x8x128xbf16>
      %101 = vector.shape_cast %100 : vector<1x1x8x128xbf16> to vector<8x128xbf16>
      %102 = arith.extf %101 : vector<8x128xbf16> to vector<8x128xf32>
      %103 = arith.mulf %96, %102 : vector<8x128xf32>
      %104 = arith.addf %99, %103 : vector<8x128xf32>
      %105 = arith.truncf %104 : vector<8x128xf32> to vector<8x128xbf16>
      %cst_40 = arith.constant dense<0.000000e+00> : vector<8x256xf32>
      %106 = tpu.matmul %105, %3, %cst_40 {dimension_numbers = #tpu.dot_dimension_numbers<[1], [0], [0], [1], [0, 0, 1, 1], [], []>} : vector<8x128xbf16>, vector<128x256xbf16>, vector<8x256xf32> -> vector<8x256xf32>
      %107 = arith.truncf %106 : vector<8x256xf32> to vector<8x256xbf16>
      %108 = math.tanh %107 : vector<8x256xbf16>
      %109 = arith.extf %108 : vector<8x256xbf16> to vector<8x256xf32>
      %110 = vector.extract_strided_slice %109 {offsets = [0, 0], sizes = [8, 128], strides = [1, 1]} : vector<8x256xf32> to vector<8x128xf32>
      %111 = vector.extract_strided_slice %109 {offsets = [0, 128], sizes = [8, 128], strides = [1, 1]} : vector<8x256xf32> to vector<8x128xf32>
      %cst_41 = arith.constant 2.500000e-02 : f32
      %112 = vector.broadcast %cst_41 : f32 to vector<8x128xf32>
      %113 = arith.mulf %110, %112 : vector<8x128xf32>
      %114 = arith.addf %104, %113 : vector<8x128xf32>
      %c0_42 = arith.constant 0 : index
      %c5 = arith.constant 5 : index
      %c0_43 = arith.constant 0 : index
      %c0_44 = arith.constant 0 : index
      %115 = vector.load %arg4[%c0_42, %c5, %c0_43, %c0_44] : memref<1x8x8x128xbf16, #tpu.memory_space<vmem>>, vector<1x1x8x128xbf16>
      %116 = vector.shape_cast %115 : vector<1x1x8x128xbf16> to vector<8x128xbf16>
      %117 = arith.extf %116 : vector<8x128xbf16> to vector<8x128xf32>
      %118 = arith.mulf %111, %117 : vector<8x128xf32>
      %119 = arith.addf %114, %118 : vector<8x128xf32>
      %120 = arith.subf %119, %104 : vector<8x128xf32>
      %cst_45 = arith.constant 0.333333343 : f32
      %121 = vector.broadcast %cst_45 : f32 to vector<8x128xf32>
      %122 = arith.mulf %120, %121 : vector<8x128xf32>
      %123 = arith.addf %104, %122 : vector<8x128xf32>
      %c14 = arith.constant 14 : index
      %c0_46 = arith.constant 0 : index
      %c0_47 = arith.constant 0 : index
      %124 = vector.load %arg7[%c14, %c0_46, %c0_47] : memref<16x8x128xf32, #tpu.memory_space<vmem>>, vector<1x8x128xf32>
      %125 = vector.shape_cast %124 : vector<1x8x128xf32> to vector<8x128xf32>
      %126 = vector.shape_cast %123 : vector<8x128xf32> to vector<1x8x128xf32>
      tpu.vector_store %arg7[%c14, %c0_46, %c0_47], %126 {strides = array<i32>} : memref<16x8x128xf32, #tpu.memory_space<vmem>>, vector<1x8x128xf32>,
      %127 = arith.truncf %119 : vector<8x128xf32> to vector<8x128xbf16>
      %cst_48 = arith.constant dense<0.000000e+00> : vector<8x256xf32>
      %128 = tpu.matmul %127, %3, %cst_48 {dimension_numbers = #tpu.dot_dimension_numbers<[1], [0], [0], [1], [0, 0, 1, 1], [], []>} : vector<8x128xbf16>, vector<128x256xbf16>, vector<8x256xf32> -> vector<8x256xf32>
      %129 = arith.truncf %128 : vector<8x256xf32> to vector<8x256xbf16>
      %130 = math.tanh %129 : vector<8x256xbf16>
      %131 = arith.extf %130 : vector<8x256xbf16> to vector<8x256xf32>
      %132 = vector.extract_strided_slice %131 {offsets = [0, 0], sizes = [8, 128], strides = [1, 1]} : vector<8x256xf32> to vector<8x128xf32>
      %133 = vector.extract_strided_slice %131 {offsets = [0, 128], sizes = [8, 128], strides = [1, 1]} : vector<8x256xf32> to vector<8x128xf32>
      %cst_49 = arith.constant 2.500000e-02 : f32
      %134 = vector.broadcast %cst_49 : f32 to vector<8x128xf32>
      %135 = arith.mulf %132, %134 : vector<8x128xf32>
      %136 = arith.addf %119, %135 : vector<8x128xf32>
      %c0_50 = arith.constant 0 : index
      %c6 = arith.constant 6 : index
      %c0_51 = arith.constant 0 : index
      %c0_52 = arith.constant 0 : index
      %137 = vector.load %arg4[%c0_50, %c6, %c0_51, %c0_52] : memref<1x8x8x128xbf16, #tpu.memory_space<vmem>>, vector<1x1x8x128xbf16>
      %138 = vector.shape_cast %137 : vector<1x1x8x128xbf16> to vector<8x128xbf16>
      %139 = arith.extf %138 : vector<8x128xbf16> to vector<8x128xf32>
      %140 = arith.mulf %133, %139 : vector<8x128xf32>
      %141 = arith.addf %136, %140 : vector<8x128xf32>
      %142 = arith.truncf %141 : vector<8x128xf32> to vector<8x128xbf16>
      %cst_53 = arith.constant dense<0.000000e+00> : vector<8x256xf32>
      %143 = tpu.matmul %142, %3, %cst_53 {dimension_numbers = #tpu.dot_dimension_numbers<[1], [0], [0], [1], [0, 0, 1, 1], [], []>} : vector<8x128xbf16>, vector<128x256xbf16>, vector<8x256xf32> -> vector<8x256xf32>
      %144 = arith.truncf %143 : vector<8x256xf32> to vector<8x256xbf16>
      %145 = math.tanh %144 : vector<8x256xbf16>
      %146 = arith.extf %145 : vector<8x256xbf16> to vector<8x256xf32>
      %147 = vector.extract_strided_slice %146 {offsets = [0, 0], sizes = [8, 128], strides = [1, 1]} : vector<8x256xf32> to vector<8x128xf32>
      %148 = vector.extract_strided_slice %146 {offsets = [0, 128], sizes = [8, 128], strides = [1, 1]} : vector<8x256xf32> to vector<8x128xf32>
      %cst_54 = arith.constant 2.500000e-02 : f32
      %149 = vector.broadcast %cst_54 : f32 to vector<8x128xf32>
      %150 = arith.mulf %147, %149 : vector<8x128xf32>
      %151 = arith.addf %141, %150 : vector<8x128xf32>
      %c0_55 = arith.constant 0 : index
      %c7 = arith.constant 7 : index
      %c0_56 = arith.constant 0 : index
      %c0_57 = arith.constant 0 : index
      %152 = vector.load %arg4[%c0_55, %c7, %c0_56, %c0_57] : memref<1x8x8x128xbf16, #tpu.memory_space<vmem>>, vector<1x1x8x128xbf16>
      %153 = vector.shape_cast %152 : vector<1x1x8x128xbf16> to vector<8x128xbf16>
      %154 = arith.extf %153 : vector<8x128xbf16> to vector<8x128xf32>
      %155 = arith.mulf %148, %154 : vector<8x128xf32>
      %156 = arith.addf %151, %155 : vector<8x128xf32>
      %157 = arith.subf %156, %141 : vector<8x128xf32>
      %cst_58 = arith.constant 1.000000e+00 : f32
      %158 = vector.broadcast %cst_58 : f32 to vector<8x128xf32>
      %159 = arith.mulf %157, %158 : vector<8x128xf32>
      %160 = arith.addf %141, %159 : vector<8x128xf32>
      %c15 = arith.constant 15 : index
      %c0_59 = arith.constant 0 : index
      %c0_60 = arith.constant 0 : index
      %161 = vector.load %arg7[%c15, %c0_59, %c0_60] : memref<16x8x128xf32, #tpu.memory_space<vmem>>, vector<1x8x128xf32>
      %162 = vector.shape_cast %161 : vector<1x8x128xf32> to vector<8x128xf32>
      %163 = vector.shape_cast %160 : vector<8x128xf32> to vector<1x8x128xf32>
      tpu.vector_store %arg7[%c15, %c0_59, %c0_60], %163 {strides = array<i32>} : memref<16x8x128xf32, #tpu.memory_space<vmem>>, vector<1x8x128xf32>,
      %c0_61 = arith.constant 0 : index
      %c0_62 = arith.constant 0 : index
      %164 = vector.load %arg6[%c0_61, %c0_62] : memref<8x128xf32, #tpu.memory_space<vmem>>, vector<8x128xf32>
      tpu.vector_store %arg6[%c0_61, %c0_62], %156 {strides = array<i32>} : memref<8x128xf32, #tpu.memory_space<vmem>>, vector<8x128xf32>,
    } else {
    }
    %c4_i32_8 = arith.constant 4 : i32
    %19 = arith.cmpi eq, %arg1, %c4_i32_8 : i32
    %20 = arith.extui %19 : i1 to i32
    %c0_i32_9 = arith.constant 0 : i32
    %21 = arith.cmpi ne, %20, %c0_i32_9 : i32
    scf.if %21 {
      %c0_10 = arith.constant 0 : index
      %c0_11 = arith.constant 0 : index
      %c0_12 = arith.constant 0 : index
      %22 = vector.load %arg7[%c0_10, %c0_11, %c0_12] : memref<16x8x128xf32, #tpu.memory_space<vmem>>, vector<16x8x128xf32>
      %c0_13 = arith.constant 0 : index
      %c0_14 = arith.constant 0 : index
      %c0_15 = arith.constant 0 : index
      %23 = vector.load %arg5[%c0_13, %c0_14, %c0_15] : memref<16x8x128xf32, #tpu.memory_space<vmem>>, vector<16x8x128xf32>
      tpu.vector_store %arg5[%c0_13, %c0_14, %c0_15], %22 {strides = array<i32>} : memref<16x8x128xf32, #tpu.memory_space<vmem>>, vector<16x8x128xf32>,
    } else {
    }
    return
  }
  func.func @transform_0(%arg0: i32, %arg1: i32) -> (i32, i32) {
    %c0_i32 = arith.constant 0 : i32
    %c0_i32_0 = arith.constant 0 : i32
    return %arg0, %c0_i32 : i32, i32
  }
  func.func @transform_1(%arg0: i32, %arg1: i32) -> (i32, i32) {
    %c0_i32 = arith.constant 0 : i32
    %c0_i32_0 = arith.constant 0 : i32
    %c0_i32_1 = arith.constant 0 : i32
    return %c0_i32, %c0_i32_0 : i32, i32
  }
  func.func @transform_2(%arg0: i32, %arg1: i32) -> (i32, i32, i32, i32) {
    %c0_i32 = arith.constant 0 : i32
    %c0_i32_0 = arith.constant 0 : i32
    %c0_i32_1 = arith.constant 0 : i32
    return %arg0, %arg1, %c0_i32, %c0_i32_0 : i32, i32, i32, i32
  }
  func.func @transform_3(%arg0: i32, %arg1: i32) -> (i32, i32, i32) {
    %c0_i32 = arith.constant 0 : i32
    %c0_i32_0 = arith.constant 0 : i32
    %c0_i32_1 = arith.constant 0 : i32
    return %c0_i32, %arg0, %c0_i32_0 : i32, i32, i32
  }
}

</mosaic_0001>

<bundles_post_ra>
// kernel: tpu_custom_call.1
= control target key start
LH: loop header
LB: loop body
LE: loop exit
PB: predicated region body
PF: predicated region fallthrough
CT: control target
= control target key end

     0   :  { %8 = vsyncpa [#allocation5], 0  ;;  %s4952_s0 = inlined_call_operand.hbm [shape: f32[8,128], index: 0, kind: input, shape index: {}]   ;;  %s4953_s1 = inlined_call_operand.hbm [shape: bf16[128,256], index: 1, kind: input, shape index: {}]   ;;  %s4954_s2 = inlined_call_operand.hbm [shape: bf16[1,40,8,128], index: 2, kind: input, shape index: {}]   ;;  %s4955_s3 = inlined_call_operand.hbm [shape: f32[16,8,128], index: 3, kind: output, shape index: {}]  }
   0x1   :  { %9 = vsyncpa [#allocation8], 0 }
   0x2   :  { %10 = vsyncpa [#allocation6], 0  ;;  %s3680_s12 = smov 0   ;;  %s3682_s13 = smov 0  }
   0x3   :  { %s3684_s14 = smov 0   ;;  %s3686_s15 = smov 0  }
   0x4   :  { %s3688_s16 = smov 0   ;;  %s3690_s17 = smov 0  }
   0x5 LB: > { %s3709_s18 = sadd.s32 4294967295, %s3643_s17   ;;  %s84_s19 = sadd.s32 1, %s3631_s14  ;;  %s3643_s17 = sphi %s3690_s17, %s16_s17   ;;  %s3639_s16 = sphi %s3688_s16, %s4975_s16   ;;  %s3635_s15 = sphi %s3686_s15, %s4974_s15   ;;  %s3631_s14 = sphi %s3684_s14, %s4973_s14   ;;  %s3627_s13 = sphi %s3682_s13, %s4972_s13   ;;  %s3623_s12 = sphi %s3680_s12, %s4971_s12  }
   0x6   : > { %p91_p0 = scmp.ne.s32.totalorder %s3631_s14, %s3627_s13  ;;  %p92_p1 = scmp.eq.s32.totalorder %s3643_s17, 0 }
   0x7   : > { %p97_p2 = scmp.ne.s32.totalorder %s3627_s13, %s3623_s12  ;;  %p4956_p3 = scmp.eq.s32.totalorder %s3709_s18, 0 }
   0x8   : > { %p93_p4 = por %p92_p1, %p91_p0  ;;  %p3078_p5 = scmp.ge.s32.totalorder %s3643_s17, 1 }
   0x9   : > { %p3720_p6 = por %p4956_p3, %p97_p2  ;;  %p134_p7 = scmp.lt.s32.totalorder %s3643_s17, 6 }
   0xa   : > { %s3645_s22 = smov [#allocation4]   ;;  %p3242_p10 = scmp.lt.s32.totalorder %s3643_s17, 5 }
   0xb   : > { %s4960_s20 = scalar_select %p3720_p6, 1, 0 }
   0xc   : > { %p3725_p8 = pnand %p3078_p5, %p134_p7  ;;  %s149_s23 = sshll.u32 %s3645_s22, 4  ;;  %s150_s23 = int_to_ptr.vmem [resolvable:$true] %s149_s23 }
   0xd   : > { %p3738_p12 = pnand %p3242_p10, %p93_p4  ;;  %s3646_s26 = smov [#allocation7]  }
   0xe   : > { %s4961_s21 = scalar_select %p3725_p8, 1, 0 }
   0xf   : > { %p3229_p9 = pneg %p3725_p8  ;;  %s159_s27 = sshll.u32 %s3646_s26, 4  ;;  %s160_s27 = int_to_ptr.vmem [resolvable:$true] %s159_s27 }
  0x10   : > { %s4963_s25 = scalar_select %p3738_p12, 1, 0 }
  0x11   : > { %p3734_p11 = pnand %p3229_p9, %p4956_p3  ;;  %s3469_s30 = scalar_lea.hbm %s4952_s0, 128 }
  0x12   : > { %p3470_p13 = scmp.ne.s32.totalorder %s4952_s0, %s3469_s30  ;;  %p3476_p4 = scmp.lt.u32.totalorder %s3469_s30, %s4952_s0 }
  0x13   : > { %p3471_p0 = pneg %p3734_p11 }
  0x15   : > { %p3472_p1 = pnand %p3471_p0, %p3470_p13 }
  0x17   : > { %p3473_p2 = pneg %p3472_p1 }
  0x19   : > { %p3478_p5 = pnand %p3476_p4, %p3473_p2 }
  0x1b   : > { %3481 = shalt.err (!%p3478_p5)
}
  0x1c   : > { %s3482_s8 = scalar_lea.vmem %s150_s23, 128  ;;  %p3490_p3 = scmp.lt.s32.totalorder %s150_s23, %s150_s23 }
  0x1d   : > { %p3483_p7 = scmp.ne.s32.totalorder %s150_s23, %s3482_s8  ;;  %p3491_p6 = scmp.lt.s32.totalorder %s3482_s8, %s3482_s8 }
  0x1f   : > { %p3485_p9 = pnand %p3483_p7, %p3471_p0  ;;  %p3492_p8 = por %p3491_p6, %p3490_p3 }
  0x21   : > { %p3486_p10 = pneg %p3485_p9 }
  0x23   : > { %p3493_p12 = pnand %p3492_p8, %p3486_p10 }
  0x25   : > { %3496 = shalt.err (!%p3493_p12)
}
  0x26   : > { %3232 = dma.hbm_to_vmem [thread:$0]  (!%p3734_p11), %s4952_s0, 128, %s150_s23, [#allocation5]  }
  0x27   : > { %s3497_s22 = scalar_lea.hbm %s4953_s1, 2048 }
  0x28   : > { %p3498_p13 = scmp.ne.s32.totalorder %s4953_s1, %s3497_s22  ;;  %p3504_p8 = scmp.lt.u32.totalorder %s3497_s22, %s4953_s1 }
  0x2a   : > { %p3500_p3 = pnand %p3498_p13, %p3471_p0 }
  0x2c   : > { %p3501_p6 = pneg %p3500_p3 }
  0x2e   : > { %p3506_p12 = pnand %p3504_p8, %p3501_p6 }
  0x30   : > { %3509 = shalt.err (!%p3506_p12)
}
  0x31   : > { %s3510_s23 = scalar_lea.vmem %s160_s27, 2048  ;;  %p3518_p5 = scmp.lt.s32.totalorder %s160_s27, %s160_s27 }
  0x32   : > { %p3511_p1 = scmp.ne.s32.totalorder %s160_s27, %s3510_s23  ;;  %p3519_p7 = scmp.lt.s32.totalorder %s3510_s23, %s3510_s23 }
  0x34   : > { %p3513_p2 = pnand %p3511_p1, %p3471_p0  ;;  %p3520_p9 = por %p3519_p7, %p3518_p5 }
  0x36   : > { %p3514_p4 = pneg %p3513_p2 }
  0x38   : > { %p3521_p10 = pnand %p3520_p9, %p3514_p4 }
  0x3a   : > { %3524 = shalt.err (!%p3521_p10)
}
  0x3b   : > { %s3647_s4 = smov 128   ;;  %s3648_s5 = smov 8  }
  0x3c   : > { %3235 = dma.hbm_to_vmem [thread:$0]  (!%p3734_p11), %s4953_s1, 2048, %s160_s27, [#allocation8], %s3647_s4, %s3647_s4, %s3648_s5  }
  0x3d   : > { %s173_s8 = sand.u32 1, %s3643_s17   ;;  %s25_s9 = sadd.s32 1, %s3639_s16 }
  0x3e   : > { %p26_p0 = scmp.ge.s32.totalorder %s25_s9, 5  ;;  %s175_s10 = sand.u32 1, %s3631_s14  }
  0x3f   : > { %s3082_s11 = sshll.u32 %s175_s10, 5  ;;  %s3214_s12 = sshll.u32 %s3639_s16, 9 }
  0x40   : > { %s4977_s9 = smov (%p26_p0, %s25_s9), 0  ;;  %s3793_s28 = scalar_lea.hbm %s4954_s2, %s3214_s12 }
  0x41   : > { %s80_s24 = ssub.s32 %s3639_s16, %s4977_s9  ;;  %s177_s27 = scalar_lea.vmem [#allocation9], %s3082_s11 }
  0x42   : > { %s186_s29 = sshll.u32 %s177_s27, 4  ;;  %p82_p11 = scmp.eq.s32.totalorder %s80_s24, 0  ;;  %s3797_s29 = int_to_ptr.vmem [resolvable:$true] %s186_s29 }
  0x43   : > { %s3804_s23 = scalar_lea.sflag [#allocation5], %s173_s8  ;;  %s3525_s4 = scalar_lea.hbm %s3793_s28, 512 }
  0x44   : > { %s3802_s30 = scalar_select %p82_p11, %s3631_s14, %s84_s19  }
  0x45   : > { %p3526_p13 = scmp.ne.s32.totalorder %s3793_s28, %s3525_s4  ;;  %p4964_p3 = scmp.ne.s32.totalorder %s4963_s25, 0 }
  0x46   : > { %s3530_s7 = scalar_lea.hbm %s4954_s2, 2560  ;;  %p3531_p1 = scmp.lt.u32.totalorder %s3793_s28, %s4954_s2 }
  0x47   : > { %p3527_p6 = pneg %p4964_p3  ;;  %p3532_p2 = scmp.lt.u32.totalorder %s3530_s7, %s3525_s4 }
  0x48   : > { %p3534_p5 = scmp.lt.u32.totalorder %s3525_s4, %s3793_s28 }
  0x49   : > { %p3528_p8 = pnand %p3527_p6, %p3526_p13  ;;  %p3533_p4 = por %p3532_p2, %p3531_p1 }
  0x4b   : > { %p3529_p12 = pneg %p3528_p8  ;;  %p3535_p7 = por %p3534_p5, %p3533_p4 }
  0x4d   : > { %p3536_p9 = pnand %p3535_p7, %p3529_p12 }
  0x4f   : > { %3539 = shalt.err (!%p3536_p9)
}
  0x50   : > { %s3540_s19 = scalar_lea.vmem %s3797_s29, 512  ;;  %s3649_s8 = smov [#allocation9]  }
  0x51   : > { %p3541_p10 = scmp.ne.s32.totalorder %s3797_s29, %s3540_s19  ;;  %s3545_s12 = sshll.u32 %s3649_s8, 4  ;;  %s3546_s12 = int_to_ptr.vmem [resolvable:$false] %s3545_s12 }
  0x52   : > { %s3547_s22 = scalar_lea.vmem %s3546_s12, 1024  ;;  %p3548_p13 = scmp.lt.s32.totalorder %s3797_s29, %s3546_s12 }
  0x53   : > { %p3543_p0 = pnand %p3541_p10, %p3527_p6  ;;  %p3549_p8 = scmp.lt.s32.totalorder %s3547_s22, %s3540_s19 }
  0x55   : > { %p3544_p11 = pneg %p3543_p0  ;;  %p3550_p1 = por %p3549_p8, %p3548_p13 }
  0x57   : > { %p3551_p2 = pnand %p3550_p1, %p3544_p11 }
  0x59   : > { %3554 = shalt.err (!%p3551_p2)
}
  0x5a   : > { %s3650_s26 = smov 64   ;;  %s3651_s24 = smov 4  }
  0x5b   : > { %3239 = dma.hbm_to_vmem [thread:$0]  (!%p4964_p3), %s3793_s28, 512, %s3797_s29, %s3804_s23, %s3650_s26, %s3650_s26, %s3651_s24  }
  0x5c   : > { %p4965_p6 = scmp.ne.s32.totalorder %s4961_s21, 0 }
  0x5d   : > { %p4966_p12 = scmp.eq.s32.totalorder (!%p4965_p6), %s3709_s18, 0 }
  0x5e   : > { %198 = sbr.rel (%p4965_p6) target bundleno = 9776 (0x2630), region = 32 }
  0x65   : > { %3606 = dma.done.wait (%p4966_p12), [#allocation5], 128   ;;  %p4967_p4 = pmov %p4966_p12 }
  0x67   : > { %3608 = vsyncadd (%p4967_p4), [#allocation5], 4294967168  ;;  %p4968_p5 = pmov %p4967_p4 }
  0x68   : > { %p4969_p7 = pmov %p4967_p4 }
  0x69   : > { %3610 = dma.done.wait (%p4968_p5), [#allocation8], 2048  }
  0x6a   : > { %3612 = vsyncadd (%p4969_p7), [#allocation8], 4294965248  ;;  %s208_s25 = sand.u32 1, %s3709_s18   ;;  %s210_s28 = sand.u32 1, %s3627_s13  }
  0x6b   : > { %s3088_s27 = sshll.u32 %s210_s28, 5  ;;  %s209_s21 = scalar_lea.sflag [#allocation5], %s208_s25 }
  0x6c   : > { %s3844_s29 = scalar_lea.vmem [#allocation9], %s3088_s27  ;;  %p4970_p3 = scmp.ne.s32.totalorder %s4960_s20, 0 }
  0x6e   : > { %3614 = dma.done.wait (%p4970_p3), %s209_s21, 512  }
  0x6f   : > { %3616 = vsyncadd (%p4970_p3), %s209_s21, 4294966784  ;;  %p3089_p9 = scmp.ne.s32.totalorder %s3635_s15, 0 }
  0x70   : > { %v236_v0 = vld [vmem:[#allocation4] sm:$0xff] (!%p3089_p9) }
  0x71   : > { %235 = sbr.rel (%p3089_p9) target bundleno = 120 (0x78), region = 48  ;;  %237 = vst [vmem:[#allocation2] sm:$0xff] (!%p3089_p9), %v236_v0  ;;  %238 = vst [vmem:[#allocation3] sm:$0xff] (!%p3089_p9), %v236_v0 }
  0x78 PF: > { %v3853_v1 = vld [vmem:[#allocation7] sm:$0xff]  ;;  %v3855_v2 = vld [vmem:[#allocation7 + $0x8] sm:$0xff]  ;;  %v3857_v3 = vld [vmem:[#allocation7 + $0x10] sm:$0xff]  ;;  %257 = sbr.rel (%p3089_p9) target bundleno = 2046 (0x7fe), region = 52  ;;  %v3652_v22 = vmov (!%p3089_p9), 0  }
  0x79   : > { %v3859_v4 = vld [vmem:[#allocation7 + $0x18] sm:$0xff]  ;;  %v3861_v5 = vld [vmem:[#allocation7 + $0x20] sm:$0xff]  ;;  %v3863_v6 = vld [vmem:[#allocation7 + $0x28] sm:$0xff]  ;;  %v3889_v17 = vcombine.high (!%p3089_p9), %v3853_v1, %v3855_v2  ;;  %v3893_v18 = vcombine.low (!%p3089_p9), %v3853_v1, %v3855_v2  ;;  %372 = vmatprep.mubr.bf16.mxu0 (!%p3089_p9), %v3652_v22  ;;  %426 = vmatprep.mubr.bf16.mxu1 (!%p3089_p9), %v3652_v22 }
  0x7a   : > { %v3865_v7 = vld [vmem:[#allocation7 + $0x30] sm:$0xff]  ;;  %v3867_v8 = vld [vmem:[#allocation7 + $0x38] sm:$0xff]  ;;  %v3869_v9 = vld [vmem:[#allocation7 + $0x40] sm:$0xff]  ;;  %v3897_v19 = vcombine.high (!%p3089_p9), %v3857_v3, %v3859_v4  ;;  %v3903_v20 = vcombine.low (!%p3089_p9), %v3857_v3, %v3859_v4  ;;  %v3908_v21 = vcombine.high (!%p3089_p9), %v3861_v5, %v3863_v6  ;;  %v3918_v23 = vcombine.low (!%p3089_p9), %v3861_v5, %v3863_v6 }
  0x7b   : > { %v3871_v10 = vld [vmem:[#allocation7 + $0x48] sm:$0xff]  ;;  %v3873_v11 = vld [vmem:[#allocation7 + $0x50] sm:$0xff]  ;;  %v3875_v12 = vld [vmem:[#allocation7 + $0x58] sm:$0xff]  ;;  %340 = vmatprep.subr.bf16.mxu0 (!%p3089_p9), %v3889_v17  ;;  %394 = vmatprep.subr.bf16.mxu1 (!%p3089_p9), %v3889_v17  ;;  %v3923_v24 = vcombine.high (!%p3089_p9), %v3865_v7, %v3867_v8  ;;  %v3930_v25 = vcombine.low (!%p3089_p9), %v3865_v7, %v3867_v8 }
  0x7c   : > { %v3877_v13 = vld [vmem:[#allocation7 + $0x60] sm:$0xff]  ;;  %v3879_v14 = vld [vmem:[#allocation7 + $0x68] sm:$0xff]  ;;  %v3881_v15 = vld [vmem:[#allocation7 + $0x70] sm:$0xff]  ;;  %341 = vmatpush1.bf16.msra.mxu0 (!%p3089_p9), %v3893_v18  ;;  %395 = vmatpush1.bf16.msra.mxu1 (!%p3089_p9), %v3893_v18  ;;  %v3935_v26 = vcombine.high (!%p3089_p9), %v3869_v9, %v3871_v10  ;;  %v3942_v27 = vcombine.low (!%p3089_p9), %v3869_v9, %v3871_v10  ;;  %v3947_v28 = vcombine.high (!%p3089_p9), %v3873_v11, %v3875_v12 }
  0x7d   : > { %v3883_v16 = vld [vmem:[#allocation7 + $0x78] sm:$0xff]  ;;  %342 = vmatprep.subr.bf16.mxu0 (!%p3089_p9), %v3897_v19  ;;  %396 = vmatprep.subr.bf16.mxu1 (!%p3089_p9), %v3897_v19  ;;  %v3954_v29 = vcombine.low (!%p3089_p9), %v3873_v11, %v3875_v12  ;;  %v3959_v30 = vcombine.high (!%p3089_p9), %v3877_v13, %v3879_v14  ;;  %v3966_v31 = vcombine.low (!%p3089_p9), %v3877_v13, %v3879_v14  ;;  %v258_v34 = vld [vmem:[#allocation2] sm:$0xff] (!%p3089_p9)  ;;  %v389_v42 = vld [vmem:[%s3844_s29] sm:$0xff] (!%p3089_p9)  }
  0x7e   : > { %v3971_v32 = vcombine.high (!%p3089_p9), %v3881_v15, %v3883_v16  ;;  %v3978_v33 = vcombine.low (!%p3089_p9), %v3881_v15, %v3883_v16  ;;  %v259_v35 = vpack.c.bf16 (!%p3089_p9), %v258_v34, %v258_v34  ;;  %v390_v44 = vunpack.c.l.bf16 (!%p3089_p9), %v389_v42 }
  0x7f   : > { %v445_v60 = vunpack.c.h.bf16 %v389_v42 }
  0x80   : > { %343 = vmatpush1.bf16.msra.mxu0 %v3903_v20  ;;  %397 = vmatpush1.bf16.msra.mxu1 %v3903_v20 }
  0x81   : > { %344 = vmatprep.subr.bf16.mxu0 %v3908_v21  ;;  %398 = vmatprep.subr.bf16.mxu1 %v3908_v21 }
  0x84   : > { %345 = vmatpush1.bf16.msra.mxu0 %v3918_v23  ;;  %399 = vmatpush1.bf16.msra.mxu1 %v3918_v23 }
  0x85   : > { %346 = vmatprep.subr.bf16.mxu0 %v3923_v24  ;;  %400 = vmatprep.subr.bf16.mxu1 %v3923_v24 }
  0x88   : > { %347 = vmatpush1.bf16.msra.mxu0 %v3930_v25  ;;  %401 = vmatpush1.bf16.msra.mxu1 %v3930_v25 }
  0x89   : > { %348 = vmatprep.subr.bf16.mxu0 %v3935_v26  ;;  %402 = vmatprep.subr.bf16.mxu1 %v3935_v26 }
  0x8c   : > { %349 = vmatpush1.bf16.msra.mxu0 %v3942_v27  ;;  %403 = vmatpush1.bf16.msra.mxu1 %v3942_v27 }
  0x8d   : > { %350 = vmatprep.subr.bf16.mxu0 %v3947_v28  ;;  %404 = vmatprep.subr.bf16.mxu1 %v3947_v28 }
  0x90   : > { %351 = vmatpush1.bf16.msra.mxu0 %v3954_v29  ;;  %405 = vmatpush1.bf16.msra.mxu1 %v3954_v29 }
  0x91   : > { %352 = vmatprep.subr.bf16.mxu0 %v3959_v30  ;;  %406 = vmatprep.subr.bf16.mxu1 %v3959_v30 }
  0x94   : > { %353 = vmatpush1.bf16.msra.mxu0 %v3966_v31  ;;  %407 = vmatpush1.bf16.msra.mxu1 %v3966_v31 }
  0x95   : > { %354 = vmatprep.subr.bf16.mxu0 %v3971_v32  ;;  %408 = vmatprep.subr.bf16.mxu1 %v3971_v32 }
  0x98   : > { %355 = vmatpush1.bf16.msra.mxu0 %v3978_v33  ;;  %409 = vmatpush1.bf16.msra.mxu1 %v3978_v33 }
  0x99   : > { %449 = vmatprep.subr.bf16.mxu0 %v3889_v17  ;;  %509 = vmatprep.subr.bf16.mxu1 %v3889_v17 }
  0x9b   : > { %373 = vmatmul.mubr.bf16.vlgmr.msra.gmra.mrb[0].mxu0 %v259_v35 }
  0x9c   : > { %450 = vmatpush1.bf16.msra.mxu0 %v3893_v18  ;;  %481 = vmatprep.mubr.bf16.mxu0 %v3652_v22 }
  0x9d   : > { %451 = vmatprep.subr.bf16.mxu0 %v3897_v19 }
  0xa0   : > { %452 = vmatpush1.bf16.msra.mxu0 %v3903_v20 }
  0xa1   : > { %453 = vmatprep.subr.bf16.mxu0 %v3908_v21 }
  0xa4   : > { %454 = vmatpush1.bf16.msra.mxu0 %v3918_v23 }
  0xa5   : > { %455 = vmatprep.subr.bf16.mxu0 %v3923_v24 }
  0xa8   : > { %456 = vmatpush1.bf16.msra.mxu0 %v3930_v25 }
  0xa9   : > { %457 = vmatprep.subr.bf16.mxu0 %v3935_v26 }
  0xac   : > { %458 = vmatpush1.bf16.msra.mxu0 %v3942_v27 }
  0xad   : > { %459 = vmatprep.subr.bf16.mxu0 %v3947_v28 }
  0xb0   : > { %460 = vmatpush1.bf16.msra.mxu0 %v3954_v29 }
  0xb1   : > { %461 = vmatprep.subr.bf16.mxu0 %v3959_v30 }
  0xb4   : > { %462 = vmatpush1.bf16.msra.mxu0 %v3966_v31 }
  0xb5   : > { %463 = vmatprep.subr.bf16.mxu0 %v3971_v32 }
  0xb8   : > { %464 = vmatpush1.bf16.msra.mxu0 %v3978_v33 }
  0xb9   : > { %564 = vmatprep.subr.bf16.mxu0 %v3889_v17 }
 0x16e   : > { %v374_v36 = vpop.f32.mrb[0].mxu0 }
 0x16f   : > { %v381_v37 = vpack.c.bf16 %v374_v36, %v374_v36  ;;  %v376_v38 = vpop.f32.mrb[1].mxu0 }
 0x170   : > { %v382_v39 = vpack.c.bf16 %v376_v38, %v376_v38  ;;  %v378_v40 = vpop.f32.mrb[2].mxu0 }
 0x171   : > { %3309 = vtanh.bf16 %v381_v37  ;;  %v379_v41 = vpop.f32.mrb[3].mxu0 }
 0x172   : > { %3311 = vtanh.bf16 %v382_v39 }
 0x17c   : > { %v3310_v43 = vpop.eup %3309 }
 0x17d   : > { %v3312_v45 = vpop.eup %3311  ;;  %v385_v46 = vunpack.c.l.bf16 %v3310_v43 }
 0x17e   : > { %v386_v47 = vunpack.c.l.bf16 %v3312_v45 }
 0x17f   : > { %v387_v48 = vmul.f32 0.025, %v385_v46 }
 0x180   : > { %v391_v49 = vmul.f32 %v390_v44, %v386_v47  ;;  %v3108_v44 = vld [vmem:[%s3844_s29 + $0x8] sm:$0xff]  }
 0x181   : > { %v388_v50 = vadd.f32 %v387_v48, %v258_v34  ;;  %v500_v46 = vunpack.c.l.bf16 %v3108_v44 }
 0x183   : > { %v392_v51 = vadd.f32 %v391_v49, %v388_v50 }
 0x185   : > { %v393_v52 = vpack.c.bf16 %v392_v51, %v392_v51 }
 0x187   : > { %427 = vmatmul.mubr.bf16.vlgmr.msra.gmra.mrb[0].mxu1 %v393_v52 }
 0x188   : > { %510 = vmatpush1.bf16.msra.mxu1 %v3893_v18  ;;  %541 = vmatprep.mubr.bf16.mxu1 %v3652_v22 }
 0x189   : > { %511 = vmatprep.subr.bf16.mxu1 %v3897_v19 }
 0x18c   : > { %512 = vmatpush1.bf16.msra.mxu1 %v3903_v20 }
 0x18d   : > { %513 = vmatprep.subr.bf16.mxu1 %v3908_v21 }
 0x190   : > { %514 = vmatpush1.bf16.msra.mxu1 %v3918_v23 }
 0x191   : > { %515 = vmatprep.subr.bf16.mxu1 %v3923_v24 }
 0x194   : > { %516 = vmatpush1.bf16.msra.mxu1 %v3930_v25 }
 0x195   : > { %517 = vmatprep.subr.bf16.mxu1 %v3935_v26 }
 0x198   : > { %518 = vmatpush1.bf16.msra.mxu1 %v3942_v27 }
 0x199   : > { %519 = vmatprep.subr.bf16.mxu1 %v3947_v28 }
 0x19c   : > { %520 = vmatpush1.bf16.msra.mxu1 %v3954_v29 }
 0x19d   : > { %521 = vmatprep.subr.bf16.mxu1 %v3959_v30 }
 0x1a0   : > { %522 = vmatpush1.bf16.msra.mxu1 %v3966_v31 }
 0x1a1   : > { %523 = vmatprep.subr.bf16.mxu1 %v3971_v32 }
 0x1a4   : > { %524 = vmatpush1.bf16.msra.mxu1 %v3978_v33 }
 0x1a5   : > { %619 = vmatprep.subr.bf16.mxu1 %v3889_v17 }
 0x25a   : > { %v428_v53 = vpop.f32.mrb[0].mxu1 }
 0x25b   : > { %v435_v54 = vpack.c.bf16 %v428_v53, %v428_v53  ;;  %v430_v55 = vpop.f32.mrb[1].mxu1 }
 0x25c   : > { %v436_v56 = vpack.c.bf16 %v430_v55, %v430_v55  ;;  %v432_v57 = vpop.f32.mrb[2].mxu1 }
 0x25d   : > { %3313 = vtanh.bf16 %v435_v54  ;;  %v433_v58 = vpop.f32.mrb[3].mxu1 }
 0x25e   : > { %3315 = vtanh.bf16 %v436_v56 }
 0x268   : > { %v3314_v59 = vpop.eup %3313 }
 0x269   : > { %v3316_v61 = vpop.eup %3315  ;;  %v439_v62 = vunpack.c.l.bf16 %v3314_v59 }
 0x26a   : > { %v440_v63 = vunpack.c.l.bf16 %v3316_v61 }
 0x26b   : > { %v441_v0 = vmul.f32 0.025, %v439_v62 }
 0x26c   : > { %v446_v34 = vmul.f32 %v445_v60, %v440_v63 }
 0x26d   : > { %v442_v35 = vadd.f32 %v441_v0, %v392_v51 }
 0x26f   : > { %v447_v36 = vadd.f32 %v446_v34, %v442_v35  ;;  %v560_v34 = vunpack.c.h.bf16 %v3108_v44 }
 0x271   : > { %v448_v37 = vpack.c.bf16 %v447_v36, %v447_v36 }
 0x273   : > { %482 = vmatmul.mubr.bf16.vlgmr.msra.gmra.mrb[4].mxu0 %v448_v37 }
 0x274   : > { %565 = vmatpush1.bf16.msra.mxu0 %v3893_v18  ;;  %596 = vmatprep.mubr.bf16.mxu0 %v3652_v22 }
 0x275   : > { %566 = vmatprep.subr.bf16.mxu0 %v3897_v19 }
 0x278   : > { %567 = vmatpush1.bf16.msra.mxu0 %v3903_v20 }
 0x279   : > { %568 = vmatprep.subr.bf16.mxu0 %v3908_v21 }
 0x27c   : > { %569 = vmatpush1.bf16.msra.mxu0 %v3918_v23 }
 0x27d   : > { %570 = vmatprep.subr.bf16.mxu0 %v3923_v24 }
 0x280   : > { %571 = vmatpush1.bf16.msra.mxu0 %v3930_v25 }
 0x281   : > { %572 = vmatprep.subr.bf16.mxu0 %v3935_v26 }
 0x284   : > { %573 = vmatpush1.bf16.msra.mxu0 %v3942_v27 }
 0x285   : > { %574 = vmatprep.subr.bf16.mxu0 %v3947_v28 }
 0x288   : > { %575 = vmatpush1.bf16.msra.mxu0 %v3954_v29 }
 0x289   : > { %576 = vmatprep.subr.bf16.mxu0 %v3959_v30 }
 0x28c   : > { %577 = vmatpush1.bf16.msra.mxu0 %v3966_v31 }
 0x28d   : > { %578 = vmatprep.subr.bf16.mxu0 %v3971_v32 }
 0x290   : > { %579 = vmatpush1.bf16.msra.mxu0 %v3978_v33 }
 0x291   : > { %679 = vmatprep.subr.bf16.mxu0 %v3889_v17 }
 0x346   : > { %v483_v38 = vpop.f32.mrb[4].mxu0 }
 0x347   : > { %v490_v39 = vpack.c.bf16 %v483_v38, %v483_v38  ;;  %v485_v40 = vpop.f32.mrb[5].mxu0 }
 0x348   : > { %v491_v41 = vpack.c.bf16 %v485_v40, %v485_v40  ;;  %v487_v42 = vpop.f32.mrb[6].mxu0 }
 0x349   : > { %3317 = vtanh.bf16 %v490_v39  ;;  %v488_v43 = vpop.f32.mrb[7].mxu0 }
 0x34a   : > { %3319 = vtanh.bf16 %v491_v41 }
 0x354   : > { %v3318_v45 = vpop.eup %3317 }
 0x355   : > { %v3320_v47 = vpop.eup %3319  ;;  %v494_v48 = vunpack.c.l.bf16 %v3318_v45 }
 0x356   : > { %v495_v49 = vunpack.c.l.bf16 %v3320_v47 }
 0x357   : > { %v496_v50 = vmul.f32 0.025, %v494_v48  ;;  %v3110_v48 = vld [vmem:[%s3844_s29 + $0x10] sm:$0xff]  }
 0x358   : > { %v501_v51 = vmul.f32 %v500_v46, %v495_v49 }
 0x359   : > { %v497_v52 = vadd.f32 %v496_v50, %v447_v36  ;;  %v615_v50 = vunpack.c.l.bf16 %v3110_v48 }
 0x35b   : > { %v502_v53 = vadd.f32 %v501_v51, %v497_v52 }
 0x35d   : > { %v503_v54 = vsub.f32 %v502_v53, %v447_v36  ;;  %v508_v55 = vpack.c.bf16 %v502_v53, %v502_v53 }
 0x35f   : > { %v504_v56 = vmul.f32 0.6666667, %v503_v54  ;;  %542 = vmatmul.mubr.bf16.vlgmr.msra.gmra.mrb[4].mxu1 %v508_v55 }
 0x360   : > { %620 = vmatpush1.bf16.msra.mxu1 %v3893_v18  ;;  %651 = vmatprep.mubr.bf16.mxu1 %v3652_v22 }
 0x361   : > { %v505_v57 = vadd.f32 %v504_v56, %v447_v36  ;;  %621 = vmatprep.subr.bf16.mxu1 %v3897_v19 }
 0x363   : > { %507 = vst [vmem:[#allocation3 + $0x8] sm:$0xff] %v505_v57 }
 0x364   : > { %622 = vmatpush1.bf16.msra.mxu1 %v3903_v20 }
 0x365   : > { %623 = vmatprep.subr.bf16.mxu1 %v3908_v21 }
 0x368   : > { %624 = vmatpush1.bf16.msra.mxu1 %v3918_v23 }
 0x369   : > { %625 = vmatprep.subr.bf16.mxu1 %v3923_v24 }
 0x36c   : > { %626 = vmatpush1.bf16.msra.mxu1 %v3930_v25 }
 0x36d   : > { %627 = vmatprep.subr.bf16.mxu1 %v3935_v26 }
 0x370   : > { %628 = vmatpush1.bf16.msra.mxu1 %v3942_v27 }
 0x371   : > { %629 = vmatprep.subr.bf16.mxu1 %v3947_v28 }
 0x374   : > { %630 = vmatpush1.bf16.msra.mxu1 %v3954_v29 }
 0x375   : > { %631 = vmatprep.subr.bf16.mxu1 %v3959_v30 }
 0x378   : > { %632 = vmatpush1.bf16.msra.mxu1 %v3966_v31 }
 0x379   : > { %633 = vmatprep.subr.bf16.mxu1 %v3971_v32 }
 0x37c   : > { %634 = vmatpush1.bf16.msra.mxu1 %v3978_v33 }
 0x37d   : > { %734 = vmatprep.subr.bf16.mxu1 %v3889_v17 }
 0x432   : > { %v543_v58 = vpop.f32.mrb[4].mxu1 }
 0x433   : > { %v550_v59 = vpack.c.bf16 %v543_v58, %v543_v58  ;;  %v545_v60 = vpop.f32.mrb[5].mxu1 }
 0x434   : > { %v551_v61 = vpack.c.bf16 %v545_v60, %v545_v60  ;;  %v547_v62 = vpop.f32.mrb[6].mxu1 }
 0x435   : > { %3321 = vtanh.bf16 %v550_v59  ;;  %v548_v63 = vpop.f32.mrb[7].mxu1 }
 0x436   : > { %3323 = vtanh.bf16 %v551_v61 }
 0x440   : > { %v3322_v0 = vpop.eup %3321 }
 0x441   : > { %v3324_v35 = vpop.eup %3323  ;;  %v554_v36 = vunpack.c.l.bf16 %v3322_v0 }
 0x442   : > { %v555_v37 = vunpack.c.l.bf16 %v3324_v35 }
 0x443   : > { %v556_v38 = vmul.f32 0.025, %v554_v36 }
 0x444   : > { %v561_v39 = vmul.f32 %v560_v34, %v555_v37  ;;  %v3112_v37 = vld [vmem:[%s3844_s29 + $0x18] sm:$0xff]  }
 0x445   : > { %v557_v40 = vadd.f32 %v556_v38, %v502_v53 }
 0x447   : > { %v562_v41 = vadd.f32 %v561_v39, %v557_v40  ;;  %v730_v39 = vunpack.c.l.bf16 %v3112_v37 }
 0x449   : > { %v563_v42 = vpack.c.bf16 %v562_v41, %v562_v41 }
 0x44b   : > { %597 = vmatmul.mubr.bf16.vlgmr.msra.gmra.mrb[8].mxu0 %v563_v42 }
 0x44c   : > { %680 = vmatpush1.bf16.msra.mxu0 %v3893_v18  ;;  %711 = vmatprep.mubr.bf16.mxu0 %v3652_v22 }
 0x44d   : > { %681 = vmatprep.subr.bf16.mxu0 %v3897_v19 }
 0x450   : > { %682 = vmatpush1.bf16.msra.mxu0 %v3903_v20 }
 0x451   : > { %683 = vmatprep.subr.bf16.mxu0 %v3908_v21 }
 0x454   : > { %684 = vmatpush1.bf16.msra.mxu0 %v3918_v23 }
 0x455   : > { %685 = vmatprep.subr.bf16.mxu0 %v3923_v24 }
 0x458   : > { %686 = vmatpush1.bf16.msra.mxu0 %v3930_v25 }
 0x459   : > { %687 = vmatprep.subr.bf16.mxu0 %v3935_v26 }
 0x45c   : > { %688 = vmatpush1.bf16.msra.mxu0 %v3942_v27 }
 0x45d   : > { %689 = vmatprep.subr.bf16.mxu0 %v3947_v28 }
 0x460   : > { %690 = vmatpush1.bf16.msra.mxu0 %v3954_v29 }
 0x461   : > { %691 = vmatprep.subr.bf16.mxu0 %v3959_v30 }
 0x464   : > { %692 = vmatpush1.bf16.msra.mxu0 %v3966_v31 }
 0x465   : > { %693 = vmatprep.subr.bf16.mxu0 %v3971_v32 }
 0x468   : > { %694 = vmatpush1.bf16.msra.mxu0 %v3978_v33 }
 0x51e   : > { %v598_v17 = vpop.f32.mrb[8].mxu0 }
 0x51f   : > { %v605_v43 = vpack.c.bf16 %v598_v17, %v598_v17  ;;  %v600_v44 = vpop.f32.mrb[9].mxu0 }
 0x520   : > { %v606_v45 = vpack.c.bf16 %v600_v44, %v600_v44  ;;  %v602_v46 = vpop.f32.mrb[10].mxu0 }
 0x521   : > { %3325 = vtanh.bf16 %v605_v43  ;;  %v603_v47 = vpop.f32.mrb[11].mxu0 }
 0x522   : > { %3327 = vtanh.bf16 %v606_v45 }
 0x52c   : > { %v3326_v49 = vpop.eup %3325 }
 0x52d   : > { %v3328_v51 = vpop.eup %3327  ;;  %v609_v52 = vunpack.c.l.bf16 %v3326_v49 }
 0x52e   : > { %v610_v53 = vunpack.c.l.bf16 %v3328_v51 }
 0x52f   : > { %v611_v54 = vmul.f32 0.025, %v609_v52 }
 0x530   : > { %v616_v55 = vmul.f32 %v615_v50, %v610_v53 }
 0x531   : > { %v612_v56 = vadd.f32 %v611_v54, %v562_v41  ;;  %v785_v54 = vunpack.c.h.bf16 %v3112_v37 }
 0x533   : > { %v617_v57 = vadd.f32 %v616_v55, %v612_v56 }
 0x535   : > { %v618_v58 = vpack.c.bf16 %v617_v57, %v617_v57 }
 0x537   : > { %652 = vmatmul.mubr.bf16.vlgmr.msra.gmra.mrb[8].mxu1 %v618_v58 }
 0x538   : > { %735 = vmatpush1.bf16.msra.mxu1 %v3893_v18  ;;  %766 = vmatprep.mubr.bf16.mxu1 %v3652_v22 }
 0x539   : > { %736 = vmatprep.subr.bf16.mxu1 %v3897_v19 }
 0x53c   : > { %737 = vmatpush1.bf16.msra.mxu1 %v3903_v20 }
 0x53d   : > { %738 = vmatprep.subr.bf16.mxu1 %v3908_v21 }
 0x540   : > { %739 = vmatpush1.bf16.msra.mxu1 %v3918_v23 }
 0x541   : > { %740 = vmatprep.subr.bf16.mxu1 %v3923_v24 }
 0x544   : > { %741 = vmatpush1.bf16.msra.mxu1 %v3930_v25  ;;  %v670_v25 = vunpack.c.h.bf16 %v3110_v48 }
 0x545   : > { %742 = vmatprep.subr.bf16.mxu1 %v3935_v26 }
 0x548   : > { %743 = vmatpush1.bf16.msra.mxu1 %v3942_v27 }
 0x549   : > { %744 = vmatprep.subr.bf16.mxu1 %v3947_v28 }
 0x54c   : > { %745 = vmatpush1.bf16.msra.mxu1 %v3954_v29 }
 0x54d   : > { %746 = vmatprep.subr.bf16.mxu1 %v3959_v30 }
 0x550   : > { %747 = vmatpush1.bf16.msra.mxu1 %v3966_v31 }
 0x551   : > { %748 = vmatprep.subr.bf16.mxu1 %v3971_v32 }
 0x554   : > { %749 = vmatpush1.bf16.msra.mxu1 %v3978_v33 }
 0x60a   : > { %v653_v18 = vpop.f32.mrb[8].mxu1 }
 0x60b   : > { %v660_v19 = vpack.c.bf16 %v653_v18, %v653_v18  ;;  %v655_v20 = vpop.f32.mrb[9].mxu1 }
 0x60c   : > { %v661_v21 = vpack.c.bf16 %v655_v20, %v655_v20  ;;  %v657_v22 = vpop.f32.mrb[10].mxu1 }
 0x60d   : > { %3329 = vtanh.bf16 %v660_v19  ;;  %v658_v23 = vpop.f32.mrb[11].mxu1 }
 0x60e   : > { %3331 = vtanh.bf16 %v661_v21 }
 0x618   : > { %v3330_v24 = vpop.eup %3329 }
 0x619   : > { %v3332_v26 = vpop.eup %3331  ;;  %v664_v27 = vunpack.c.l.bf16 %v3330_v24 }
 0x61a   : > { %v665_v28 = vunpack.c.l.bf16 %v3332_v26 }
 0x61b   : > { %v666_v29 = vmul.f32 0.025, %v664_v27 }
 0x61c   : > { %v671_v30 = vmul.f32 %v670_v25, %v665_v28 }
 0x61d   : > { %v667_v31 = vadd.f32 %v666_v29, %v617_v57 }
 0x61f   : > { %v672_v32 = vadd.f32 %v671_v30, %v667_v31 }
 0x621   : > { %v673_v59 = vsub.f32 %v672_v32, %v617_v57  ;;  %v678_v33 = vpack.c.bf16 %v672_v32, %v672_v32 }
 0x623   : > { %v674_v60 = vmul.f32 0.33333334, %v673_v59  ;;  %712 = vmatmul.mubr.bf16.vlgmr.msra.gmra.mrb[12].mxu0 %v678_v33 }
 0x625   : > { %v675_v61 = vadd.f32 %v674_v60, %v617_v57 }
 0x627   : > { %677 = vst [vmem:[#allocation3 + $0x10] sm:$0xff] %v675_v61 }
 0x6f6   : > { %v713_v62 = vpop.f32.mrb[12].mxu0 }
 0x6f7   : > { %v720_v63 = vpack.c.bf16 %v713_v62, %v713_v62  ;;  %v715_v0 = vpop.f32.mrb[13].mxu0 }
 0x6f8   : > { %v721_v34 = vpack.c.bf16 %v715_v0, %v715_v0  ;;  %v717_v35 = vpop.f32.mrb[14].mxu0 }
 0x6f9   : > { %3333 = vtanh.bf16 %v720_v63  ;;  %v718_v36 = vpop.f32.mrb[15].mxu0 }
 0x6fa   : > { %3335 = vtanh.bf16 %v721_v34 }
 0x704   : > { %v3334_v38 = vpop.eup %3333 }
 0x705   : > { %v3336_v40 = vpop.eup %3335  ;;  %v724_v41 = vunpack.c.l.bf16 %v3334_v38 }
 0x706   : > { %v725_v42 = vunpack.c.l.bf16 %v3336_v40 }
 0x707   : > { %v726_v17 = vmul.f32 0.025, %v724_v41 }
 0x708   : > { %v731_v43 = vmul.f32 %v730_v39, %v725_v42 }
 0x709   : > { %v727_v44 = vadd.f32 %v726_v17, %v672_v32 }
 0x70b   : > { %v732_v45 = vadd.f32 %v731_v43, %v727_v44 }
 0x70d   : > { %v733_v46 = vpack.c.bf16 %v732_v45, %v732_v45 }
 0x70f   : > { %767 = vmatmul.mubr.bf16.vlgmr.msra.gmra.mrb[12].mxu1 %v733_v46 }
 0x7e2   : > { %v768_v47 = vpop.f32.mrb[12].mxu1 }
 0x7e3   : > { %v775_v48 = vpack.c.bf16 %v768_v47, %v768_v47  ;;  %v770_v49 = vpop.f32.mrb[13].mxu1 }
 0x7e4   : > { %v776_v50 = vpack.c.bf16 %v770_v49, %v770_v49  ;;  %v772_v51 = vpop.f32.mrb[14].mxu1 }
 0x7e5   : > { %3337 = vtanh.bf16 %v775_v48  ;;  %v773_v52 = vpop.f32.mrb[15].mxu1 }
 0x7e6   : > { %3339 = vtanh.bf16 %v776_v50 }
 0x7f0   : > { %v3338_v53 = vpop.eup %3337 }
 0x7f1   : > { %v3340_v55 = vpop.eup %3339  ;;  %v779_v56 = vunpack.c.l.bf16 %v3338_v53 }
 0x7f2   : > { %v780_v57 = vunpack.c.l.bf16 %v3340_v55 }
 0x7f3   : > { %v781_v58 = vmul.f32 0.025, %v779_v56 }
 0x7f4   : > { %v786_v18 = vmul.f32 %v785_v54, %v780_v57 }
 0x7f5   : > { %v782_v19 = vadd.f32 %v781_v58, %v732_v45 }
 0x7f7   : > { %v787_v20 = vadd.f32 %v786_v18, %v782_v19 }
 0x7f9   : > { %v788_v21 = vsub.f32 %v787_v20, %v732_v45  ;;  %792 = vst [vmem:[#allocation2] sm:$0xff] %v787_v20 }
 0x7fb   : > { %v789_v22 = vadd.f32 %v788_v21, %v732_v45 }
 0x7fd   : > { %791 = vst [vmem:[#allocation3 + $0x18] sm:$0xff] %v789_v22 }
 0x7fe PF: > { %p3114_p10 = scmp.ne.s32.totalorder %s3635_s15, 1 }
 0x7ff   : > { %v4094_v23 = vcombine.high (!%p3114_p10), %v3853_v1, %v3855_v2  ;;  %v4098_v24 = vcombine.low (!%p3114_p10), %v3853_v1, %v3855_v2  ;;  %v4102_v25 = vcombine.high (!%p3114_p10), %v3857_v3, %v3859_v4  ;;  %v4108_v26 = vcombine.low (!%p3114_p10), %v3857_v3, %v3859_v4  ;;  %v928_v42 = vld [vmem:[%s3844_s29] sm:$0xff] (!%p3114_p10)  }
 0x800   : > { %796 = sbr.rel (%p3114_p10) target bundleno = 3972 (0xf84), region = 56  ;;  %v4113_v27 = vcombine.high (!%p3114_p10), %v3861_v5, %v3863_v6  ;;  %v3653_v28 = vmov (!%p3114_p10), 0   ;;  %v4123_v29 = vcombine.low (!%p3114_p10), %v3861_v5, %v3863_v6  ;;  %v4128_v30 = vcombine.high (!%p3114_p10), %v3865_v7, %v3867_v8  ;;  %v797_v34 = vld [vmem:[#allocation2] sm:$0xff] (!%p3114_p10) }
 0x801   : > { %879 = vmatprep.subr.bf16.mxu0 (!%p3114_p10), %v4094_v23  ;;  %933 = vmatprep.subr.bf16.mxu1 (!%p3114_p10), %v4094_v23  ;;  %v4135_v31 = vcombine.low (!%p3114_p10), %v3865_v7, %v3867_v8  ;;  %v4140_v32 = vcombine.high (!%p3114_p10), %v3869_v9, %v3871_v10  ;;  %v4147_v59 = vcombine.low (!%p3114_p10), %v3869_v9, %v3871_v10  ;;  %v929_v43 = vunpack.c.l.bf16 (!%p3114_p10), %v928_v42 }
 0x802   : > { %880 = vmatpush1.bf16.msra.mxu0 (!%p3114_p10), %v4098_v24  ;;  %911 = vmatprep.mubr.bf16.mxu0 (!%p3114_p10), %v3653_v28  ;;  %v4152_v33 = vcombine.high (!%p3114_p10), %v3873_v11, %v3875_v12  ;;  %v4159_v60 = vcombine.low (!%p3114_p10), %v3873_v11, %v3875_v12  ;;  %v4164_v61 = vcombine.high (!%p3114_p10), %v3877_v13, %v3879_v14  ;;  %v984_v18 = vunpack.c.h.bf16 (!%p3114_p10), %v928_v42 }
 0x803   : > { %881 = vmatprep.subr.bf16.mxu0 (!%p3114_p10), %v4102_v25  ;;  %934 = vmatpush1.bf16.msra.mxu1 (!%p3114_p10), %v4098_v24  ;;  %v4171_v62 = vcombine.low (!%p3114_p10), %v3877_v13, %v3879_v14  ;;  %v4176_v63 = vcombine.high (!%p3114_p10), %v3881_v15, %v3883_v16  ;;  %v4183_v0 = vcombine.low (!%p3114_p10), %v3881_v15, %v3883_v16 }
 0x804   : > { %935 = vmatprep.subr.bf16.mxu1 (!%p3114_p10), %v4102_v25  ;;  %965 = vmatprep.mubr.bf16.mxu1 (!%p3114_p10), %v3653_v28  ;;  %v798_v35 = vpack.c.bf16 (!%p3114_p10), %v797_v34, %v797_v34 }
 0x806   : > { %882 = vmatpush1.bf16.msra.mxu0 (!%p3114_p10), %v4108_v26 }
 0x807   : > { %883 = vmatprep.subr.bf16.mxu0 %v4113_v27  ;;  %936 = vmatpush1.bf16.msra.mxu1 %v4108_v26 }
 0x808   : > { %937 = vmatprep.subr.bf16.mxu1 %v4113_v27 }
 0x80a   : > { %884 = vmatpush1.bf16.msra.mxu0 %v4123_v29 }
 0x80b   : > { %885 = vmatprep.subr.bf16.mxu0 %v4128_v30  ;;  %938 = vmatpush1.bf16.msra.mxu1 %v4123_v29 }
 0x80c   : > { %939 = vmatprep.subr.bf16.mxu1 %v4128_v30 }
 0x80e   : > { %886 = vmatpush1.bf16.msra.mxu0 %v4135_v31 }
 0x80f   : > { %887 = vmatprep.subr.bf16.mxu0 %v4140_v32  ;;  %940 = vmatpush1.bf16.msra.mxu1 %v4135_v31 }
 0x810   : > { %941 = vmatprep.subr.bf16.mxu1 %v4140_v32 }
 0x812   : > { %888 = vmatpush1.bf16.msra.mxu0 %v4147_v59 }
 0x813   : > { %889 = vmatprep.subr.bf16.mxu0 %v4152_v33  ;;  %942 = vmatpush1.bf16.msra.mxu1 %v4147_v59 }
 0x814   : > { %943 = vmatprep.subr.bf16.mxu1 %v4152_v33 }
 0x816   : > { %890 = vmatpush1.bf16.msra.mxu0 %v4159_v60 }
 0x817   : > { %891 = vmatprep.subr.bf16.mxu0 %v4164_v61  ;;  %944 = vmatpush1.bf16.msra.mxu1 %v4159_v60 }
 0x818   : > { %945 = vmatprep.subr.bf16.mxu1 %v4164_v61 }
 0x81a   : > { %892 = vmatpush1.bf16.msra.mxu0 %v4171_v62 }
 0x81b   : > { %893 = vmatprep.subr.bf16.mxu0 %v4176_v63  ;;  %946 = vmatpush1.bf16.msra.mxu1 %v4171_v62 }
 0x81c   : > { %947 = vmatprep.subr.bf16.mxu1 %v4176_v63 }
 0x81e   : > { %894 = vmatpush1.bf16.msra.mxu0 %v4183_v0 }
 0x81f   : > { %988 = vmatprep.subr.bf16.mxu0 %v4094_v23  ;;  %948 = vmatpush1.bf16.msra.mxu1 %v4183_v0 }
 0x820   : > { %1048 = vmatprep.subr.bf16.mxu1 %v4094_v23 }
 0x821   : > { %912 = vmatmul.mubr.bf16.vlgmr.msra.gmra.mrb[0].mxu0 %v798_v35 }
 0x822   : > { %989 = vmatpush1.bf16.msra.mxu0 %v4098_v24  ;;  %1020 = vmatprep.mubr.bf16.mxu0 %v3653_v28 }
 0x823   : > { %990 = vmatprep.subr.bf16.mxu0 %v4102_v25 }
 0x826   : > { %991 = vmatpush1.bf16.msra.mxu0 %v4108_v26 }
 0x827   : > { %992 = vmatprep.subr.bf16.mxu0 %v4113_v27 }
 0x82a   : > { %993 = vmatpush1.bf16.msra.mxu0 %v4123_v29 }
 0x82b   : > { %994 = vmatprep.subr.bf16.mxu0 %v4128_v30 }
 0x82e   : > { %995 = vmatpush1.bf16.msra.mxu0 %v4135_v31 }
 0x82f   : > { %996 = vmatprep.subr.bf16.mxu0 %v4140_v32 }
 0x832   : > { %997 = vmatpush1.bf16.msra.mxu0 %v4147_v59 }
 0x833   : > { %998 = vmatprep.subr.bf16.mxu0 %v4152_v33 }
 0x836   : > { %999 = vmatpush1.bf16.msra.mxu0 %v4159_v60 }
 0x837   : > { %1000 = vmatprep.subr.bf16.mxu0 %v4164_v61 }
 0x83a   : > { %1001 = vmatpush1.bf16.msra.mxu0 %v4171_v62 }
 0x83b   : > { %1002 = vmatprep.subr.bf16.mxu0 %v4176_v63 }
 0x83e   : > { %1003 = vmatpush1.bf16.msra.mxu0 %v4183_v0 }
 0x83f   : > { %1103 = vmatprep.subr.bf16.mxu0 %v4094_v23 }
 0x8f4   : > { %v913_v36 = vpop.f32.mrb[0].mxu0 }
 0x8f5   : > { %v920_v37 = vpack.c.bf16 %v913_v36, %v913_v36  ;;  %v915_v38 = vpop.f32.mrb[1].mxu0 }
 0x8f6   : > { %v921_v39 = vpack.c.bf16 %v915_v38, %v915_v38  ;;  %v917_v40 = vpop.f32.mrb[2].mxu0 }
 0x8f7   : > { %3341 = vtanh.bf16 %v920_v37  ;;  %v918_v41 = vpop.f32.mrb[3].mxu0 }
 0x8f8   : > { %3343 = vtanh.bf16 %v921_v39 }
 0x902   : > { %v3342_v17 = vpop.eup %3341 }
 0x903   : > { %v3344_v44 = vpop.eup %3343  ;;  %v924_v45 = vunpack.c.l.bf16 %v3342_v17 }
 0x904   : > { %v925_v46 = vunpack.c.l.bf16 %v3344_v44 }
 0x905   : > { %v926_v47 = vmul.f32 0.025, %v924_v45 }
 0x906   : > { %v930_v48 = vmul.f32 %v929_v43, %v925_v46  ;;  %v3132_v43 = vld [vmem:[%s3844_s29 + $0x8] sm:$0xff]  }
 0x907   : > { %v927_v49 = vadd.f32 %v926_v47, %v797_v34  ;;  %v1039_v45 = vunpack.c.l.bf16 %v3132_v43 }
 0x909   : > { %v931_v50 = vadd.f32 %v930_v48, %v927_v49 }
 0x90b   : > { %v932_v51 = vpack.c.bf16 %v931_v50, %v931_v50 }
 0x90d   : > { %966 = vmatmul.mubr.bf16.vlgmr.msra.gmra.mrb[0].mxu1 %v932_v51 }
 0x90e   : > { %1049 = vmatpush1.bf16.msra.mxu1 %v4098_v24  ;;  %1080 = vmatprep.mubr.bf16.mxu1 %v3653_v28 }
 0x90f   : > { %1050 = vmatprep.subr.bf16.mxu1 %v4102_v25 }
 0x912   : > { %1051 = vmatpush1.bf16.msra.mxu1 %v4108_v26 }
 0x913   : > { %1052 = vmatprep.subr.bf16.mxu1 %v4113_v27 }
 0x916   : > { %1053 = vmatpush1.bf16.msra.mxu1 %v4123_v29 }
 0x917   : > { %1054 = vmatprep.subr.bf16.mxu1 %v4128_v30 }
 0x91a   : > { %1055 = vmatpush1.bf16.msra.mxu1 %v4135_v31 }
 0x91b   : > { %1056 = vmatprep.subr.bf16.mxu1 %v4140_v32 }
 0x91e   : > { %1057 = vmatpush1.bf16.msra.mxu1 %v4147_v59 }
 0x91f   : > { %1058 = vmatprep.subr.bf16.mxu1 %v4152_v33 }
 0x922   : > { %1059 = vmatpush1.bf16.msra.mxu1 %v4159_v60 }
 0x923   : > { %1060 = vmatprep.subr.bf16.mxu1 %v4164_v61 }
 0x926   : > { %1061 = vmatpush1.bf16.msra.mxu1 %v4171_v62 }
 0x927   : > { %1062 = vmatprep.subr.bf16.mxu1 %v4176_v63 }
 0x92a   : > { %1063 = vmatpush1.bf16.msra.mxu1 %v4183_v0 }
 0x92b   : > { %1158 = vmatprep.subr.bf16.mxu1 %v4094_v23 }
 0x9e0   : > { %v967_v52 = vpop.f32.mrb[0].mxu1 }
 0x9e1   : > { %v974_v53 = vpack.c.bf16 %v967_v52, %v967_v52  ;;  %v969_v54 = vpop.f32.mrb[1].mxu1 }
 0x9e2   : > { %v975_v55 = vpack.c.bf16 %v969_v54, %v969_v54  ;;  %v971_v56 = vpop.f32.mrb[2].mxu1 }
 0x9e3   : > { %3345 = vtanh.bf16 %v974_v53  ;;  %v972_v57 = vpop.f32.mrb[3].mxu1 }
 0x9e4   : > { %3347 = vtanh.bf16 %v975_v55 }
 0x9ee   : > { %v3346_v58 = vpop.eup %3345 }
 0x9ef   : > { %v3348_v19 = vpop.eup %3347  ;;  %v978_v20 = vunpack.c.l.bf16 %v3346_v58 }
 0x9f0   : > { %v979_v21 = vunpack.c.l.bf16 %v3348_v19 }
 0x9f1   : > { %v980_v22 = vmul.f32 0.025, %v978_v20 }
 0x9f2   : > { %v985_v34 = vmul.f32 %v984_v18, %v979_v21 }
 0x9f3   : > { %v981_v35 = vadd.f32 %v980_v22, %v931_v50 }
 0x9f5   : > { %v986_v36 = vadd.f32 %v985_v34, %v981_v35  ;;  %v1099_v34 = vunpack.c.h.bf16 %v3132_v43 }
 0x9f7   : > { %v987_v37 = vpack.c.bf16 %v986_v36, %v986_v36 }
 0x9f9   : > { %1021 = vmatmul.mubr.bf16.vlgmr.msra.gmra.mrb[4].mxu0 %v987_v37 }
 0x9fa   : > { %1104 = vmatpush1.bf16.msra.mxu0 %v4098_v24  ;;  %1135 = vmatprep.mubr.bf16.mxu0 %v3653_v28 }
 0x9fb   : > { %1105 = vmatprep.subr.bf16.mxu0 %v4102_v25 }
 0x9fe   : > { %1106 = vmatpush1.bf16.msra.mxu0 %v4108_v26 }
 0x9ff   : > { %1107 = vmatprep.subr.bf16.mxu0 %v4113_v27 }
 0xa02   : > { %1108 = vmatpush1.bf16.msra.mxu0 %v4123_v29 }
 0xa03   : > { %1109 = vmatprep.subr.bf16.mxu0 %v4128_v30 }
 0xa06   : > { %1110 = vmatpush1.bf16.msra.mxu0 %v4135_v31 }
 0xa07   : > { %1111 = vmatprep.subr.bf16.mxu0 %v4140_v32 }
 0xa0a   : > { %1112 = vmatpush1.bf16.msra.mxu0 %v4147_v59 }
 0xa0b   : > { %1113 = vmatprep.subr.bf16.mxu0 %v4152_v33 }
 0xa0e   : > { %1114 = vmatpush1.bf16.msra.mxu0 %v4159_v60 }
 0xa0f   : > { %1115 = vmatprep.subr.bf16.mxu0 %v4164_v61 }
 0xa12   : > { %1116 = vmatpush1.bf16.msra.mxu0 %v4171_v62 }
 0xa13   : > { %1117 = vmatprep.subr.bf16.mxu0 %v4176_v63 }
 0xa16   : > { %1118 = vmatpush1.bf16.msra.mxu0 %v4183_v0 }
 0xa17   : > { %1218 = vmatprep.subr.bf16.mxu0 %v4094_v23 }
 0xacc   : > { %v1022_v38 = vpop.f32.mrb[4].mxu0 }
 0xacd   : > { %v1029_v39 = vpack.c.bf16 %v1022_v38, %v1022_v38  ;;  %v1024_v40 = vpop.f32.mrb[5].mxu0 }
 0xace   : > { %v1030_v41 = vpack.c.bf16 %v1024_v40, %v1024_v40  ;;  %v1026_v42 = vpop.f32.mrb[6].mxu0 }
 0xacf   : > { %3349 = vtanh.bf16 %v1029_v39  ;;  %v1027_v17 = vpop.f32.mrb[7].mxu0 }
 0xad0   : > { %3351 = vtanh.bf16 %v1030_v41 }
 0xada   : > { %v3350_v44 = vpop.eup %3349 }
 0xadb   : > { %v3352_v46 = vpop.eup %3351  ;;  %v1033_v47 = vunpack.c.l.bf16 %v3350_v44 }
 0xadc   : > { %v1034_v48 = vunpack.c.l.bf16 %v3352_v46 }
 0xadd   : > { %v1035_v49 = vmul.f32 0.025, %v1033_v47  ;;  %v3134_v47 = vld [vmem:[%s3844_s29 + $0x10] sm:$0xff]  }
 0xade   : > { %v1040_v50 = vmul.f32 %v1039_v45, %v1034_v48 }
 0xadf   : > { %v1036_v51 = vadd.f32 %v1035_v49, %v986_v36  ;;  %v1154_v49 = vunpack.c.l.bf16 %v3134_v47 }
 0xae1   : > { %v1041_v52 = vadd.f32 %v1040_v50, %v1036_v51 }
 0xae3   : > { %v1042_v53 = vsub.f32 %v1041_v52, %v986_v36  ;;  %v1047_v54 = vpack.c.bf16 %v1041_v52, %v1041_v52 }
 0xae5   : > { %v1043_v55 = vmul.f32 0.6666667, %v1042_v53  ;;  %1081 = vmatmul.mubr.bf16.vlgmr.msra.gmra.mrb[4].mxu1 %v1047_v54 }
 0xae6   : > { %1159 = vmatpush1.bf16.msra.mxu1 %v4098_v24  ;;  %1190 = vmatprep.mubr.bf16.mxu1 %v3653_v28 }
 0xae7   : > { %v1044_v56 = vadd.f32 %v1043_v55, %v986_v36  ;;  %1160 = vmatprep.subr.bf16.mxu1 %v4102_v25 }
 0xae9   : > { %1046 = vst [vmem:[#allocation3 + $0x20] sm:$0xff] %v1044_v56 }
 0xaea   : > { %1161 = vmatpush1.bf16.msra.mxu1 %v4108_v26 }
 0xaeb   : > { %1162 = vmatprep.subr.bf16.mxu1 %v4113_v27 }
 0xaee   : > { %1163 = vmatpush1.bf16.msra.mxu1 %v4123_v29 }
 0xaef   : > { %1164 = vmatprep.subr.bf16.mxu1 %v4128_v30 }
 0xaf2   : > { %1165 = vmatpush1.bf16.msra.mxu1 %v4135_v31 }
 0xaf3   : > { %1166 = vmatprep.subr.bf16.mxu1 %v4140_v32 }
 0xaf6   : > { %1167 = vmatpush1.bf16.msra.mxu1 %v4147_v59 }
 0xaf7   : > { %1168 = vmatprep.subr.bf16.mxu1 %v4152_v33 }
 0xafa   : > { %1169 = vmatpush1.bf16.msra.mxu1 %v4159_v60 }
 0xafb   : > { %1170 = vmatprep.subr.bf16.mxu1 %v4164_v61 }
 0xafe   : > { %1171 = vmatpush1.bf16.msra.mxu1 %v4171_v62 }
 0xaff   : > { %1172 = vmatprep.subr.bf16.mxu1 %v4176_v63 }
 0xb02   : > { %1173 = vmatpush1.bf16.msra.mxu1 %v4183_v0 }
 0xb03   : > { %1273 = vmatprep.subr.bf16.mxu1 %v4094_v23 }
 0xbb8   : > { %v1082_v57 = vpop.f32.mrb[4].mxu1 }
 0xbb9   : > { %v1089_v58 = vpack.c.bf16 %v1082_v57, %v1082_v57  ;;  %v1084_v18 = vpop.f32.mrb[5].mxu1 }
 0xbba   : > { %v1090_v19 = vpack.c.bf16 %v1084_v18, %v1084_v18  ;;  %v1086_v20 = vpop.f32.mrb[6].mxu1 }
 0xbbb   : > { %3353 = vtanh.bf16 %v1089_v58  ;;  %v1087_v21 = vpop.f32.mrb[7].mxu1 }
 0xbbc   : > { %3355 = vtanh.bf16 %v1090_v19 }
 0xbc6   : > { %v3354_v22 = vpop.eup %3353 }
 0xbc7   : > { %v3356_v35 = vpop.eup %3355  ;;  %v1093_v36 = vunpack.c.l.bf16 %v3354_v22 }
 0xbc8   : > { %v1094_v37 = vunpack.c.l.bf16 %v3356_v35 }
 0xbc9   : > { %v1095_v38 = vmul.f32 0.025, %v1093_v36 }
 0xbca   : > { %v1100_v39 = vmul.f32 %v1099_v34, %v1094_v37  ;;  %v3136_v37 = vld [vmem:[%s3844_s29 + $0x18] sm:$0xff]  }
 0xbcb   : > { %v1096_v40 = vadd.f32 %v1095_v38, %v1041_v52 }
 0xbcd   : > { %v1101_v41 = vadd.f32 %v1100_v39, %v1096_v40  ;;  %v1269_v39 = vunpack.c.l.bf16 %v3136_v37 }
 0xbcf   : > { %v1102_v42 = vpack.c.bf16 %v1101_v41, %v1101_v41 }
 0xbd1   : > { %1136 = vmatmul.mubr.bf16.vlgmr.msra.gmra.mrb[8].mxu0 %v1102_v42 }
 0xbd2   : > { %1219 = vmatpush1.bf16.msra.mxu0 %v4098_v24  ;;  %1250 = vmatprep.mubr.bf16.mxu0 %v3653_v28 }
 0xbd3   : > { %1220 = vmatprep.subr.bf16.mxu0 %v4102_v25 }
 0xbd6   : > { %1221 = vmatpush1.bf16.msra.mxu0 %v4108_v26 }
 0xbd7   : > { %1222 = vmatprep.subr.bf16.mxu0 %v4113_v27 }
 0xbda   : > { %1223 = vmatpush1.bf16.msra.mxu0 %v4123_v29 }
 0xbdb   : > { %1224 = vmatprep.subr.bf16.mxu0 %v4128_v30 }
 0xbde   : > { %1225 = vmatpush1.bf16.msra.mxu0 %v4135_v31 }
 0xbdf   : > { %1226 = vmatprep.subr.bf16.mxu0 %v4140_v32 }
 0xbe2   : > { %1227 = vmatpush1.bf16.msra.mxu0 %v4147_v59 }
 0xbe3   : > { %1228 = vmatprep.subr.bf16.mxu0 %v4152_v33 }
 0xbe6   : > { %1229 = vmatpush1.bf16.msra.mxu0 %v4159_v60 }
 0xbe7   : > { %1230 = vmatprep.subr.bf16.mxu0 %v4164_v61 }
 0xbea   : > { %1231 = vmatpush1.bf16.msra.mxu0 %v4171_v62 }
 0xbeb   : > { %1232 = vmatprep.subr.bf16.mxu0 %v4176_v63 }
 0xbee   : > { %1233 = vmatpush1.bf16.msra.mxu0 %v4183_v0 }
 0xca4   : > { %v1137_v23 = vpop.f32.mrb[8].mxu0 }
 0xca5   : > { %v1144_v17 = vpack.c.bf16 %v1137_v23, %v1137_v23  ;;  %v1139_v43 = vpop.f32.mrb[9].mxu0 }
 0xca6   : > { %v1145_v44 = vpack.c.bf16 %v1139_v43, %v1139_v43  ;;  %v1141_v45 = vpop.f32.mrb[10].mxu0 }
 0xca7   : > { %3357 = vtanh.bf16 %v1144_v17  ;;  %v1142_v46 = vpop.f32.mrb[11].mxu0 }
 0xca8   : > { %3359 = vtanh.bf16 %v1145_v44 }
 0xcb2   : > { %v3358_v48 = vpop.eup %3357 }
 0xcb3   : > { %v3360_v50 = vpop.eup %3359  ;;  %v1148_v51 = vunpack.c.l.bf16 %v3358_v48 }
 0xcb4   : > { %v1149_v52 = vunpack.c.l.bf16 %v3360_v50 }
 0xcb5   : > { %v1150_v53 = vmul.f32 0.025, %v1148_v51 }
 0xcb6   : > { %v1155_v54 = vmul.f32 %v1154_v49, %v1149_v52 }
 0xcb7   : > { %v1151_v55 = vadd.f32 %v1150_v53, %v1101_v41  ;;  %v1324_v53 = vunpack.c.h.bf16 %v3136_v37 }
 0xcb9   : > { %v1156_v56 = vadd.f32 %v1155_v54, %v1151_v55 }
 0xcbb   : > { %v1157_v57 = vpack.c.bf16 %v1156_v56, %v1156_v56 }
 0xcbd   : > { %1191 = vmatmul.mubr.bf16.vlgmr.msra.gmra.mrb[8].mxu1 %v1157_v57 }
 0xcbe   : > { %1274 = vmatpush1.bf16.msra.mxu1 %v4098_v24  ;;  %1305 = vmatprep.mubr.bf16.mxu1 %v3653_v28 }
 0xcbf   : > { %1275 = vmatprep.subr.bf16.mxu1 %v4102_v25 }
 0xcc2   : > { %1276 = vmatpush1.bf16.msra.mxu1 %v4108_v26 }
 0xcc3   : > { %1277 = vmatprep.subr.bf16.mxu1 %v4113_v27 }
 0xcc6   : > { %1278 = vmatpush1.bf16.msra.mxu1 %v4123_v29 }
 0xcc7   : > { %1279 = vmatprep.subr.bf16.mxu1 %v4128_v30 }
 0xcca   : > { %1280 = vmatpush1.bf16.msra.mxu1 %v4135_v31  ;;  %v1209_v31 = vunpack.c.h.bf16 %v3134_v47 }
 0xccb   : > { %1281 = vmatprep.subr.bf16.mxu1 %v4140_v32 }
 0xcce   : > { %1282 = vmatpush1.bf16.msra.mxu1 %v4147_v59 }
 0xccf   : > { %1283 = vmatprep.subr.bf16.mxu1 %v4152_v33 }
 0xcd2   : > { %1284 = vmatpush1.bf16.msra.mxu1 %v4159_v60 }
 0xcd3   : > { %1285 = vmatprep.subr.bf16.mxu1 %v4164_v61 }
 0xcd6   : > { %1286 = vmatpush1.bf16.msra.mxu1 %v4171_v62 }
 0xcd7   : > { %1287 = vmatprep.subr.bf16.mxu1 %v4176_v63 }
 0xcda   : > { %1288 = vmatpush1.bf16.msra.mxu1 %v4183_v0 }
 0xd90   : > { %v1192_v24 = vpop.f32.mrb[8].mxu1 }
 0xd91   : > { %v1199_v25 = vpack.c.bf16 %v1192_v24, %v1192_v24  ;;  %v1194_v26 = vpop.f32.mrb[9].mxu1 }
 0xd92   : > { %v1200_v27 = vpack.c.bf16 %v1194_v26, %v1194_v26  ;;  %v1196_v28 = vpop.f32.mrb[10].mxu1 }
 0xd93   : > { %3361 = vtanh.bf16 %v1199_v25  ;;  %v1197_v29 = vpop.f32.mrb[11].mxu1 }
 0xd94   : > { %3363 = vtanh.bf16 %v1200_v27 }
 0xd9e   : > { %v3362_v30 = vpop.eup %3361 }
 0xd9f   : > { %v3364_v32 = vpop.eup %3363  ;;  %v1203_v59 = vunpack.c.l.bf16 %v3362_v30 }
 0xda0   : > { %v1204_v33 = vunpack.c.l.bf16 %v3364_v32 }
 0xda1   : > { %v1205_v60 = vmul.f32 0.025, %v1203_v59 }
 0xda2   : > { %v1210_v61 = vmul.f32 %v1209_v31, %v1204_v33 }
 0xda3   : > { %v1206_v62 = vadd.f32 %v1205_v60, %v1156_v56 }
 0xda5   : > { %v1211_v63 = vadd.f32 %v1210_v61, %v1206_v62 }
 0xda7   : > { %v1212_v58 = vsub.f32 %v1211_v63, %v1156_v56  ;;  %v1217_v0 = vpack.c.bf16 %v1211_v63, %v1211_v63 }
 0xda9   : > { %v1213_v18 = vmul.f32 0.33333334, %v1212_v58  ;;  %1251 = vmatmul.mubr.bf16.vlgmr.msra.gmra.mrb[12].mxu0 %v1217_v0 }
 0xdab   : > { %v1214_v19 = vadd.f32 %v1213_v18, %v1156_v56 }
 0xdad   : > { %1216 = vst [vmem:[#allocation3 + $0x28] sm:$0xff] %v1214_v19 }
 0xe7c   : > { %v1252_v20 = vpop.f32.mrb[12].mxu0 }
 0xe7d   : > { %v1259_v21 = vpack.c.bf16 %v1252_v20, %v1252_v20  ;;  %v1254_v22 = vpop.f32.mrb[13].mxu0 }
 0xe7e   : > { %v1260_v34 = vpack.c.bf16 %v1254_v22, %v1254_v22  ;;  %v1256_v35 = vpop.f32.mrb[14].mxu0 }
 0xe7f   : > { %3365 = vtanh.bf16 %v1259_v21  ;;  %v1257_v36 = vpop.f32.mrb[15].mxu0 }
 0xe80   : > { %3367 = vtanh.bf16 %v1260_v34 }
 0xe8a   : > { %v3366_v38 = vpop.eup %3365 }
 0xe8b   : > { %v3368_v40 = vpop.eup %3367  ;;  %v1263_v41 = vunpack.c.l.bf16 %v3366_v38 }
 0xe8c   : > { %v1264_v42 = vunpack.c.l.bf16 %v3368_v40 }
 0xe8d   : > { %v1265_v23 = vmul.f32 0.025, %v1263_v41 }
 0xe8e   : > { %v1270_v17 = vmul.f32 %v1269_v39, %v1264_v42 }
 0xe8f   : > { %v1266_v43 = vadd.f32 %v1265_v23, %v1211_v63 }
 0xe91   : > { %v1271_v44 = vadd.f32 %v1270_v17, %v1266_v43 }
 0xe93   : > { %v1272_v45 = vpack.c.bf16 %v1271_v44, %v1271_v44 }
 0xe95   : > { %1306 = vmatmul.mubr.bf16.vlgmr.msra.gmra.mrb[12].mxu1 %v1272_v45 }
 0xf68   : > { %v1307_v46 = vpop.f32.mrb[12].mxu1 }
 0xf69   : > { %v1314_v47 = vpack.c.bf16 %v1307_v46, %v1307_v46  ;;  %v1309_v48 = vpop.f32.mrb[13].mxu1 }
 0xf6a   : > { %v1315_v49 = vpack.c.bf16 %v1309_v48, %v1309_v48  ;;  %v1311_v50 = vpop.f32.mrb[14].mxu1 }
 0xf6b   : > { %3369 = vtanh.bf16 %v1314_v47  ;;  %v1312_v51 = vpop.f32.mrb[15].mxu1 }
 0xf6c   : > { %3371 = vtanh.bf16 %v1315_v49 }
 0xf76   : > { %v3370_v52 = vpop.eup %3369 }
 0xf77   : > { %v3372_v54 = vpop.eup %3371  ;;  %v1318_v55 = vunpack.c.l.bf16 %v3370_v52 }
 0xf78   : > { %v1319_v56 = vunpack.c.l.bf16 %v3372_v54 }
 0xf79   : > { %v1320_v57 = vmul.f32 0.025, %v1318_v55 }
 0xf7a   : > { %v1325_v24 = vmul.f32 %v1324_v53, %v1319_v56 }
 0xf7b   : > { %v1321_v25 = vadd.f32 %v1320_v57, %v1271_v44 }
 0xf7d   : > { %v1326_v26 = vadd.f32 %v1325_v24, %v1321_v25 }
 0xf7f   : > { %v1327_v27 = vsub.f32 %v1326_v26, %v1271_v44  ;;  %1331 = vst [vmem:[#allocation2] sm:$0xff] %v1326_v26 }
 0xf81   : > { %v1328_v28 = vadd.f32 %v1327_v27, %v1271_v44 }
 0xf83   : > { %1330 = vst [vmem:[#allocation3 + $0x30] sm:$0xff] %v1328_v28 }
 0xf84 PF: > { %p3138_p0 = scmp.ne.s32.totalorder %s3635_s15, 2 }
 0xf85   : > { %v4299_v29 = vcombine.high (!%p3138_p0), %v3853_v1, %v3855_v2  ;;  %v4303_v30 = vcombine.low (!%p3138_p0), %v3853_v1, %v3855_v2  ;;  %v4307_v31 = vcombine.high (!%p3138_p0), %v3857_v3, %v3859_v4  ;;  %v4313_v32 = vcombine.low (!%p3138_p0), %v3857_v3, %v3859_v4  ;;  %v1467_v42 = vld [vmem:[%s3844_s29] sm:$0xff] (!%p3138_p0)  }
 0xf86   : > { %1335 = sbr.rel (%p3138_p0) target bundleno = 5898 (0x170a), region = 60  ;;  %v4318_v59 = vcombine.high (!%p3138_p0), %v3861_v5, %v3863_v6  ;;  %v3654_v33 = vmov (!%p3138_p0), 0   ;;  %v4328_v60 = vcombine.low (!%p3138_p0), %v3861_v5, %v3863_v6  ;;  %v4333_v61 = vcombine.high (!%p3138_p0), %v3865_v7, %v3867_v8  ;;  %v1336_v34 = vld [vmem:[#allocation2] sm:$0xff] (!%p3138_p0) }
 0xf87   : > { %1418 = vmatprep.subr.bf16.mxu0 (!%p3138_p0), %v4299_v29  ;;  %1472 = vmatprep.subr.bf16.mxu1 (!%p3138_p0), %v4299_v29  ;;  %v4340_v62 = vcombine.low (!%p3138_p0), %v3865_v7, %v3867_v8  ;;  %v4345_v63 = vcombine.high (!%p3138_p0), %v3869_v9, %v3871_v10  ;;  %v4352_v58 = vcombine.low (!%p3138_p0), %v3869_v9, %v3871_v10  ;;  %v1468_v17 = vunpack.c.l.bf16 (!%p3138_p0), %v1467_v42 }
 0xf88   : > { %1419 = vmatpush1.bf16.msra.mxu0 (!%p3138_p0), %v4303_v30  ;;  %1450 = vmatprep.mubr.bf16.mxu0 (!%p3138_p0), %v3654_v33  ;;  %v4357_v0 = vcombine.high (!%p3138_p0), %v3873_v11, %v3875_v12  ;;  %v4364_v18 = vcombine.low (!%p3138_p0), %v3873_v11, %v3875_v12  ;;  %v4369_v19 = vcombine.high (!%p3138_p0), %v3877_v13, %v3879_v14  ;;  %v1523_v24 = vunpack.c.h.bf16 (!%p3138_p0), %v1467_v42 }
 0xf89   : > { %1420 = vmatprep.subr.bf16.mxu0 (!%p3138_p0), %v4307_v31  ;;  %1473 = vmatpush1.bf16.msra.mxu1 (!%p3138_p0), %v4303_v30  ;;  %v4376_v20 = vcombine.low (!%p3138_p0), %v3877_v13, %v3879_v14  ;;  %v4381_v21 = vcombine.high (!%p3138_p0), %v3881_v15, %v3883_v16  ;;  %v4388_v22 = vcombine.low (!%p3138_p0), %v3881_v15, %v3883_v16 }
 0xf8a   : > { %1474 = vmatprep.subr.bf16.mxu1 (!%p3138_p0), %v4307_v31  ;;  %1504 = vmatprep.mubr.bf16.mxu1 (!%p3138_p0), %v3654_v33  ;;  %v1337_v35 = vpack.c.bf16 (!%p3138_p0), %v1336_v34, %v1336_v34 }
 0xf8c   : > { %1421 = vmatpush1.bf16.msra.mxu0 (!%p3138_p0), %v4313_v32 }
 0xf8d   : > { %1422 = vmatprep.subr.bf16.mxu0 %v4318_v59  ;;  %1475 = vmatpush1.bf16.msra.mxu1 %v4313_v32 }
 0xf8e   : > { %1476 = vmatprep.subr.bf16.mxu1 %v4318_v59 }
 0xf90   : > { %1423 = vmatpush1.bf16.msra.mxu0 %v4328_v60 }
 0xf91   : > { %1424 = vmatprep.subr.bf16.mxu0 %v4333_v61  ;;  %1477 = vmatpush1.bf16.msra.mxu1 %v4328_v60 }
 0xf92   : > { %1478 = vmatprep.subr.bf16.mxu1 %v4333_v61 }
 0xf94   : > { %1425 = vmatpush1.bf16.msra.mxu0 %v4340_v62 }
 0xf95   : > { %1426 = vmatprep.subr.bf16.mxu0 %v4345_v63  ;;  %1479 = vmatpush1.bf16.msra.mxu1 %v4340_v62 }
 0xf96   : > { %1480 = vmatprep.subr.bf16.mxu1 %v4345_v63 }
 0xf98   : > { %1427 = vmatpush1.bf16.msra.mxu0 %v4352_v58 }
 0xf99   : > { %1428 = vmatprep.subr.bf16.mxu0 %v4357_v0  ;;  %1481 = vmatpush1.bf16.msra.mxu1 %v4352_v58 }
 0xf9a   : > { %1482 = vmatprep.subr.bf16.mxu1 %v4357_v0 }
 0xf9c   : > { %1429 = vmatpush1.bf16.msra.mxu0 %v4364_v18 }
 0xf9d   : > { %1430 = vmatprep.subr.bf16.mxu0 %v4369_v19  ;;  %1483 = vmatpush1.bf16.msra.mxu1 %v4364_v18 }
 0xf9e   : > { %1484 = vmatprep.subr.bf16.mxu1 %v4369_v19 }
 0xfa0   : > { %1431 = vmatpush1.bf16.msra.mxu0 %v4376_v20 }
 0xfa1   : > { %1432 = vmatprep.subr.bf16.mxu0 %v4381_v21  ;;  %1485 = vmatpush1.bf16.msra.mxu1 %v4376_v20 }
 0xfa2   : > { %1486 = vmatprep.subr.bf16.mxu1 %v4381_v21 }
 0xfa4   : > { %1433 = vmatpush1.bf16.msra.mxu0 %v4388_v22 }
 0xfa5   : > { %1527 = vmatprep.subr.bf16.mxu0 %v4299_v29  ;;  %1487 = vmatpush1.bf16.msra.mxu1 %v4388_v22 }
 0xfa6   : > { %1587 = vmatprep.subr.bf16.mxu1 %v4299_v29 }
 0xfa7   : > { %1451 = vmatmul.mubr.bf16.vlgmr.msra.gmra.mrb[0].mxu0 %v1337_v35 }
 0xfa8   : > { %1528 = vmatpush1.bf16.msra.mxu0 %v4303_v30  ;;  %1559 = vmatprep.mubr.bf16.mxu0 %v3654_v33 }
 0xfa9   : > { %1529 = vmatprep.subr.bf16.mxu0 %v4307_v31 }
 0xfac   : > { %1530 = vmatpush1.bf16.msra.mxu0 %v4313_v32 }
 0xfad   : > { %1531 = vmatprep.subr.bf16.mxu0 %v4318_v59 }
 0xfb0   : > { %1532 = vmatpush1.bf16.msra.mxu0 %v4328_v60 }
 0xfb1   : > { %1533 = vmatprep.subr.bf16.mxu0 %v4333_v61 }
 0xfb4   : > { %1534 = vmatpush1.bf16.msra.mxu0 %v4340_v62 }
 0xfb5   : > { %1535 = vmatprep.subr.bf16.mxu0 %v4345_v63 }
 0xfb8   : > { %1536 = vmatpush1.bf16.msra.mxu0 %v4352_v58 }
 0xfb9   : > { %1537 = vmatprep.subr.bf16.mxu0 %v4357_v0 }
 0xfbc   : > { %1538 = vmatpush1.bf16.msra.mxu0 %v4364_v18 }
 0xfbd   : > { %1539 = vmatprep.subr.bf16.mxu0 %v4369_v19 }
 0xfc0   : > { %1540 = vmatpush1.bf16.msra.mxu0 %v4376_v20 }
 0xfc1   : > { %1541 = vmatprep.subr.bf16.mxu0 %v4381_v21 }
 0xfc4   : > { %1542 = vmatpush1.bf16.msra.mxu0 %v4388_v22 }
 0xfc5   : > { %1642 = vmatprep.subr.bf16.mxu0 %v4299_v29 }
0x107a   : > { %v1452_v36 = vpop.f32.mrb[0].mxu0 }
0x107b   : > { %v1459_v37 = vpack.c.bf16 %v1452_v36, %v1452_v36  ;;  %v1454_v38 = vpop.f32.mrb[1].mxu0 }
0x107c   : > { %v1460_v39 = vpack.c.bf16 %v1454_v38, %v1454_v38  ;;  %v1456_v40 = vpop.f32.mrb[2].mxu0 }
0x107d   : > { %3373 = vtanh.bf16 %v1459_v37  ;;  %v1457_v41 = vpop.f32.mrb[3].mxu0 }
0x107e   : > { %3375 = vtanh.bf16 %v1460_v39 }
0x1088   : > { %v3374_v23 = vpop.eup %3373 }
0x1089   : > { %v3376_v43 = vpop.eup %3375  ;;  %v1463_v44 = vunpack.c.l.bf16 %v3374_v23 }
0x108a   : > { %v1464_v45 = vunpack.c.l.bf16 %v3376_v43 }
0x108b   : > { %v1465_v46 = vmul.f32 0.025, %v1463_v44 }
0x108c   : > { %v1469_v47 = vmul.f32 %v1468_v17, %v1464_v45  ;;  %v3156_v17 = vld [vmem:[%s3844_s29 + $0x8] sm:$0xff]  }
0x108d   : > { %v1466_v48 = vadd.f32 %v1465_v46, %v1336_v34  ;;  %v1578_v44 = vunpack.c.l.bf16 %v3156_v17 }
0x108f   : > { %v1470_v49 = vadd.f32 %v1469_v47, %v1466_v48 }
0x1091   : > { %v1471_v50 = vpack.c.bf16 %v1470_v49, %v1470_v49 }
0x1093   : > { %1505 = vmatmul.mubr.bf16.vlgmr.msra.gmra.mrb[0].mxu1 %v1471_v50 }
0x1094   : > { %1588 = vmatpush1.bf16.msra.mxu1 %v4303_v30  ;;  %1619 = vmatprep.mubr.bf16.mxu1 %v3654_v33 }
0x1095   : > { %1589 = vmatprep.subr.bf16.mxu1 %v4307_v31 }
0x1098   : > { %1590 = vmatpush1.bf16.msra.mxu1 %v4313_v32 }
0x1099   : > { %1591 = vmatprep.subr.bf16.mxu1 %v4318_v59 }
0x109c   : > { %1592 = vmatpush1.bf16.msra.mxu1 %v4328_v60 }
0x109d   : > { %1593 = vmatprep.subr.bf16.mxu1 %v4333_v61 }
0x10a0   : > { %1594 = vmatpush1.bf16.msra.mxu1 %v4340_v62 }
0x10a1   : > { %1595 = vmatprep.subr.bf16.mxu1 %v4345_v63 }
0x10a4   : > { %1596 = vmatpush1.bf16.msra.mxu1 %v4352_v58 }
0x10a5   : > { %1597 = vmatprep.subr.bf16.mxu1 %v4357_v0 }
0x10a8   : > { %1598 = vmatpush1.bf16.msra.mxu1 %v4364_v18 }
0x10a9   : > { %1599 = vmatprep.subr.bf16.mxu1 %v4369_v19 }
0x10ac   : > { %1600 = vmatpush1.bf16.msra.mxu1 %v4376_v20 }
0x10ad   : > { %1601 = vmatprep.subr.bf16.mxu1 %v4381_v21 }
0x10b0   : > { %1602 = vmatpush1.bf16.msra.mxu1 %v4388_v22 }
0x10b1   : > { %1697 = vmatprep.subr.bf16.mxu1 %v4299_v29 }
0x1166   : > { %v1506_v51 = vpop.f32.mrb[0].mxu1 }
0x1167   : > { %v1513_v52 = vpack.c.bf16 %v1506_v51, %v1506_v51  ;;  %v1508_v53 = vpop.f32.mrb[1].mxu1 }
0x1168   : > { %v1514_v54 = vpack.c.bf16 %v1508_v53, %v1508_v53  ;;  %v1510_v55 = vpop.f32.mrb[2].mxu1 }
0x1169   : > { %3377 = vtanh.bf16 %v1513_v52  ;;  %v1511_v56 = vpop.f32.mrb[3].mxu1 }
0x116a   : > { %3379 = vtanh.bf16 %v1514_v54 }
0x1174   : > { %v3378_v57 = vpop.eup %3377 }
0x1175   : > { %v3380_v25 = vpop.eup %3379  ;;  %v1517_v26 = vunpack.c.l.bf16 %v3378_v57 }
0x1176   : > { %v1518_v27 = vunpack.c.l.bf16 %v3380_v25 }
0x1177   : > { %v1519_v28 = vmul.f32 0.025, %v1517_v26 }
0x1178   : > { %v1524_v34 = vmul.f32 %v1523_v24, %v1518_v27 }
0x1179   : > { %v1520_v35 = vadd.f32 %v1519_v28, %v1470_v49 }
0x117b   : > { %v1525_v36 = vadd.f32 %v1524_v34, %v1520_v35  ;;  %v1638_v34 = vunpack.c.h.bf16 %v3156_v17 }
0x117d   : > { %v1526_v37 = vpack.c.bf16 %v1525_v36, %v1525_v36 }
0x117f   : > { %1560 = vmatmul.mubr.bf16.vlgmr.msra.gmra.mrb[4].mxu0 %v1526_v37 }
0x1180   : > { %1643 = vmatpush1.bf16.msra.mxu0 %v4303_v30  ;;  %1674 = vmatprep.mubr.bf16.mxu0 %v3654_v33 }
0x1181   : > { %1644 = vmatprep.subr.bf16.mxu0 %v4307_v31 }
0x1184   : > { %1645 = vmatpush1.bf16.msra.mxu0 %v4313_v32 }
0x1185   : > { %1646 = vmatprep.subr.bf16.mxu0 %v4318_v59 }
0x1188   : > { %1647 = vmatpush1.bf16.msra.mxu0 %v4328_v60 }
0x1189   : > { %1648 = vmatprep.subr.bf16.mxu0 %v4333_v61 }
0x118c   : > { %1649 = vmatpush1.bf16.msra.mxu0 %v4340_v62 }
0x118d   : > { %1650 = vmatprep.subr.bf16.mxu0 %v4345_v63 }
0x1190   : > { %1651 = vmatpush1.bf16.msra.mxu0 %v4352_v58 }
0x1191   : > { %1652 = vmatprep.subr.bf16.mxu0 %v4357_v0 }
0x1194   : > { %1653 = vmatpush1.bf16.msra.mxu0 %v4364_v18 }
0x1195   : > { %1654 = vmatprep.subr.bf16.mxu0 %v4369_v19 }
0x1198   : > { %1655 = vmatpush1.bf16.msra.mxu0 %v4376_v20 }
0x1199   : > { %1656 = vmatprep.subr.bf16.mxu0 %v4381_v21 }
0x119c   : > { %1657 = vmatpush1.bf16.msra.mxu0 %v4388_v22 }
0x119d   : > { %1757 = vmatprep.subr.bf16.mxu0 %v4299_v29 }
0x1252   : > { %v1561_v38 = vpop.f32.mrb[4].mxu0 }
0x1253   : > { %v1568_v39 = vpack.c.bf16 %v1561_v38, %v1561_v38  ;;  %v1563_v40 = vpop.f32.mrb[5].mxu0 }
0x1254   : > { %v1569_v41 = vpack.c.bf16 %v1563_v40, %v1563_v40  ;;  %v1565_v42 = vpop.f32.mrb[6].mxu0 }
0x1255   : > { %3381 = vtanh.bf16 %v1568_v39  ;;  %v1566_v23 = vpop.f32.mrb[7].mxu0 }
0x1256   : > { %3383 = vtanh.bf16 %v1569_v41 }
0x1260   : > { %v3382_v43 = vpop.eup %3381 }
0x1261   : > { %v3384_v45 = vpop.eup %3383  ;;  %v1572_v46 = vunpack.c.l.bf16 %v3382_v43 }
0x1262   : > { %v1573_v47 = vunpack.c.l.bf16 %v3384_v45 }
0x1263   : > { %v1574_v48 = vmul.f32 0.025, %v1572_v46  ;;  %v3158_v46 = vld [vmem:[%s3844_s29 + $0x10] sm:$0xff]  }
0x1264   : > { %v1579_v49 = vmul.f32 %v1578_v44, %v1573_v47 }
0x1265   : > { %v1575_v50 = vadd.f32 %v1574_v48, %v1525_v36  ;;  %v1693_v48 = vunpack.c.l.bf16 %v3158_v46 }
0x1267   : > { %v1580_v51 = vadd.f32 %v1579_v49, %v1575_v50 }
0x1269   : > { %v1581_v52 = vsub.f32 %v1580_v51, %v1525_v36  ;;  %v1586_v53 = vpack.c.bf16 %v1580_v51, %v1580_v51 }
0x126b   : > { %v1582_v54 = vmul.f32 0.6666667, %v1581_v52  ;;  %1620 = vmatmul.mubr.bf16.vlgmr.msra.gmra.mrb[4].mxu1 %v1586_v53 }
0x126c   : > { %1698 = vmatpush1.bf16.msra.mxu1 %v4303_v30  ;;  %1729 = vmatprep.mubr.bf16.mxu1 %v3654_v33 }
0x126d   : > { %v1583_v55 = vadd.f32 %v1582_v54, %v1525_v36  ;;  %1699 = vmatprep.subr.bf16.mxu1 %v4307_v31 }
0x126f   : > { %1585 = vst [vmem:[#allocation3 + $0x38] sm:$0xff] %v1583_v55 }
0x1270   : > { %1700 = vmatpush1.bf16.msra.mxu1 %v4313_v32 }
0x1271   : > { %1701 = vmatprep.subr.bf16.mxu1 %v4318_v59 }
0x1274   : > { %1702 = vmatpush1.bf16.msra.mxu1 %v4328_v60 }
0x1275   : > { %1703 = vmatprep.subr.bf16.mxu1 %v4333_v61 }
0x1278   : > { %1704 = vmatpush1.bf16.msra.mxu1 %v4340_v62 }
0x1279   : > { %1705 = vmatprep.subr.bf16.mxu1 %v4345_v63 }
0x127c   : > { %1706 = vmatpush1.bf16.msra.mxu1 %v4352_v58 }
0x127d   : > { %1707 = vmatprep.subr.bf16.mxu1 %v4357_v0 }
0x1280   : > { %1708 = vmatpush1.bf16.msra.mxu1 %v4364_v18 }
0x1281   : > { %1709 = vmatprep.subr.bf16.mxu1 %v4369_v19 }
0x1284   : > { %1710 = vmatpush1.bf16.msra.mxu1 %v4376_v20 }
0x1285   : > { %1711 = vmatprep.subr.bf16.mxu1 %v4381_v21 }
0x1288   : > { %1712 = vmatpush1.bf16.msra.mxu1 %v4388_v22 }
0x1289   : > { %1812 = vmatprep.subr.bf16.mxu1 %v4299_v29 }
0x133e   : > { %v1621_v56 = vpop.f32.mrb[4].mxu1 }
0x133f   : > { %v1628_v57 = vpack.c.bf16 %v1621_v56, %v1621_v56  ;;  %v1623_v24 = vpop.f32.mrb[5].mxu1 }
0x1340   : > { %v1629_v25 = vpack.c.bf16 %v1623_v24, %v1623_v24  ;;  %v1625_v26 = vpop.f32.mrb[6].mxu1 }
0x1341   : > { %3385 = vtanh.bf16 %v1628_v57  ;;  %v1626_v27 = vpop.f32.mrb[7].mxu1 }
0x1342   : > { %3387 = vtanh.bf16 %v1629_v25 }
0x134c   : > { %v3386_v28 = vpop.eup %3385 }
0x134d   : > { %v3388_v35 = vpop.eup %3387  ;;  %v1632_v36 = vunpack.c.l.bf16 %v3386_v28 }
0x134e   : > { %v1633_v37 = vunpack.c.l.bf16 %v3388_v35 }
0x134f   : > { %v1634_v38 = vmul.f32 0.025, %v1632_v36 }
0x1350   : > { %v1639_v39 = vmul.f32 %v1638_v34, %v1633_v37  ;;  %v3160_v37 = vld [vmem:[%s3844_s29 + $0x18] sm:$0xff]  }
0x1351   : > { %v1635_v40 = vadd.f32 %v1634_v38, %v1580_v51 }
0x1353   : > { %v1640_v41 = vadd.f32 %v1639_v39, %v1635_v40  ;;  %v1808_v39 = vunpack.c.l.bf16 %v3160_v37 }
0x1355   : > { %v1641_v42 = vpack.c.bf16 %v1640_v41, %v1640_v41 }
0x1357   : > { %1675 = vmatmul.mubr.bf16.vlgmr.msra.gmra.mrb[8].mxu0 %v1641_v42 }
0x1358   : > { %1758 = vmatpush1.bf16.msra.mxu0 %v4303_v30  ;;  %1789 = vmatprep.mubr.bf16.mxu0 %v3654_v33 }
0x1359   : > { %1759 = vmatprep.subr.bf16.mxu0 %v4307_v31 }
0x135c   : > { %1760 = vmatpush1.bf16.msra.mxu0 %v4313_v32 }
0x135d   : > { %1761 = vmatprep.subr.bf16.mxu0 %v4318_v59 }
0x1360   : > { %1762 = vmatpush1.bf16.msra.mxu0 %v4328_v60 }
0x1361   : > { %1763 = vmatprep.subr.bf16.mxu0 %v4333_v61 }
0x1364   : > { %1764 = vmatpush1.bf16.msra.mxu0 %v4340_v62 }
0x1365   : > { %1765 = vmatprep.subr.bf16.mxu0 %v4345_v63 }
0x1368   : > { %1766 = vmatpush1.bf16.msra.mxu0 %v4352_v58 }
0x1369   : > { %1767 = vmatprep.subr.bf16.mxu0 %v4357_v0 }
0x136c   : > { %1768 = vmatpush1.bf16.msra.mxu0 %v4364_v18 }
0x136d   : > { %1769 = vmatprep.subr.bf16.mxu0 %v4369_v19 }
0x1370   : > { %1770 = vmatpush1.bf16.msra.mxu0 %v4376_v20 }
0x1371   : > { %1771 = vmatprep.subr.bf16.mxu0 %v4381_v21 }
0x1374   : > { %1772 = vmatpush1.bf16.msra.mxu0 %v4388_v22 }
0x142a   : > { %v1676_v29 = vpop.f32.mrb[8].mxu0 }
0x142b   : > { %v1683_v23 = vpack.c.bf16 %v1676_v29, %v1676_v29  ;;  %v1678_v17 = vpop.f32.mrb[9].mxu0 }
0x142c   : > { %v1684_v43 = vpack.c.bf16 %v1678_v17, %v1678_v17  ;;  %v1680_v44 = vpop.f32.mrb[10].mxu0 }
0x142d   : > { %3389 = vtanh.bf16 %v1683_v23  ;;  %v1681_v45 = vpop.f32.mrb[11].mxu0 }
0x142e   : > { %3391 = vtanh.bf16 %v1684_v43 }
0x1438   : > { %v3390_v47 = vpop.eup %3389 }
0x1439   : > { %v3392_v49 = vpop.eup %3391  ;;  %v1687_v50 = vunpack.c.l.bf16 %v3390_v47 }
0x143a   : > { %v1688_v51 = vunpack.c.l.bf16 %v3392_v49 }
0x143b   : > { %v1689_v52 = vmul.f32 0.025, %v1687_v50 }
0x143c   : > { %v1694_v53 = vmul.f32 %v1693_v48, %v1688_v51 }
0x143d   : > { %v1690_v54 = vadd.f32 %v1689_v52, %v1640_v41  ;;  %v1863_v52 = vunpack.c.h.bf16 %v3160_v37 }
0x143f   : > { %v1695_v55 = vadd.f32 %v1694_v53, %v1690_v54 }
0x1441   : > { %v1696_v56 = vpack.c.bf16 %v1695_v55, %v1695_v55 }
0x1443   : > { %1730 = vmatmul.mubr.bf16.vlgmr.msra.gmra.mrb[8].mxu1 %v1696_v56 }
0x1444   : > { %1813 = vmatpush1.bf16.msra.mxu1 %v4303_v30  ;;  %1844 = vmatprep.mubr.bf16.mxu1 %v3654_v33 }
0x1445   : > { %1814 = vmatprep.subr.bf16.mxu1 %v4307_v31 }
0x1448   : > { %1815 = vmatpush1.bf16.msra.mxu1 %v4313_v32 }
0x1449   : > { %1816 = vmatprep.subr.bf16.mxu1 %v4318_v59 }
0x144c   : > { %1817 = vmatpush1.bf16.msra.mxu1 %v4328_v60 }
0x144d   : > { %1818 = vmatprep.subr.bf16.mxu1 %v4333_v61 }
0x1450   : > { %1819 = vmatpush1.bf16.msra.mxu1 %v4340_v62  ;;  %v1748_v62 = vunpack.c.h.bf16 %v3158_v46 }
0x1451   : > { %1820 = vmatprep.subr.bf16.mxu1 %v4345_v63 }
0x1454   : > { %1821 = vmatpush1.bf16.msra.mxu1 %v4352_v58 }
0x1455   : > { %1822 = vmatprep.subr.bf16.mxu1 %v4357_v0 }
0x1458   : > { %1823 = vmatpush1.bf16.msra.mxu1 %v4364_v18 }
0x1459   : > { %1824 = vmatprep.subr.bf16.mxu1 %v4369_v19 }
0x145c   : > { %1825 = vmatpush1.bf16.msra.mxu1 %v4376_v20 }
0x145d   : > { %1826 = vmatprep.subr.bf16.mxu1 %v4381_v21 }
0x1460   : > { %1827 = vmatpush1.bf16.msra.mxu1 %v4388_v22 }
0x1516   : > { %v1731_v30 = vpop.f32.mrb[8].mxu1 }
0x1517   : > { %v1738_v31 = vpack.c.bf16 %v1731_v30, %v1731_v30  ;;  %v1733_v32 = vpop.f32.mrb[9].mxu1 }
0x1518   : > { %v1739_v59 = vpack.c.bf16 %v1733_v32, %v1733_v32  ;;  %v1735_v33 = vpop.f32.mrb[10].mxu1 }
0x1519   : > { %3393 = vtanh.bf16 %v1738_v31  ;;  %v1736_v60 = vpop.f32.mrb[11].mxu1 }
0x151a   : > { %3395 = vtanh.bf16 %v1739_v59 }
0x1524   : > { %v3394_v61 = vpop.eup %3393 }
0x1525   : > { %v3396_v63 = vpop.eup %3395  ;;  %v1742_v58 = vunpack.c.l.bf16 %v3394_v61 }
0x1526   : > { %v1743_v0 = vunpack.c.l.bf16 %v3396_v63 }
0x1527   : > { %v1744_v18 = vmul.f32 0.025, %v1742_v58 }
0x1528   : > { %v1749_v19 = vmul.f32 %v1748_v62, %v1743_v0 }
0x1529   : > { %v1745_v20 = vadd.f32 %v1744_v18, %v1695_v55 }
0x152b   : > { %v1750_v21 = vadd.f32 %v1749_v19, %v1745_v20 }
0x152d   : > { %v1751_v57 = vsub.f32 %v1750_v21, %v1695_v55  ;;  %v1756_v22 = vpack.c.bf16 %v1750_v21, %v1750_v21 }
0x152f   : > { %v1752_v24 = vmul.f32 0.33333334, %v1751_v57  ;;  %1790 = vmatmul.mubr.bf16.vlgmr.msra.gmra.mrb[12].mxu0 %v1756_v22 }
0x1531   : > { %v1753_v25 = vadd.f32 %v1752_v24, %v1695_v55 }
0x1533   : > { %1755 = vst [vmem:[#allocation3 + $0x40] sm:$0xff] %v1753_v25 }
0x1602   : > { %v1791_v26 = vpop.f32.mrb[12].mxu0 }
0x1603   : > { %v1798_v27 = vpack.c.bf16 %v1791_v26, %v1791_v26  ;;  %v1793_v28 = vpop.f32.mrb[13].mxu0 }
0x1604   : > { %v1799_v34 = vpack.c.bf16 %v1793_v28, %v1793_v28  ;;  %v1795_v35 = vpop.f32.mrb[14].mxu0 }
0x1605   : > { %3397 = vtanh.bf16 %v1798_v27  ;;  %v1796_v36 = vpop.f32.mrb[15].mxu0 }
0x1606   : > { %3399 = vtanh.bf16 %v1799_v34 }
0x1610   : > { %v3398_v38 = vpop.eup %3397 }
0x1611   : > { %v3400_v40 = vpop.eup %3399  ;;  %v1802_v41 = vunpack.c.l.bf16 %v3398_v38 }
0x1612   : > { %v1803_v42 = vunpack.c.l.bf16 %v3400_v40 }
0x1613   : > { %v1804_v29 = vmul.f32 0.025, %v1802_v41 }
0x1614   : > { %v1809_v23 = vmul.f32 %v1808_v39, %v1803_v42 }
0x1615   : > { %v1805_v17 = vadd.f32 %v1804_v29, %v1750_v21 }
0x1617   : > { %v1810_v43 = vadd.f32 %v1809_v23, %v1805_v17 }
0x1619   : > { %v1811_v44 = vpack.c.bf16 %v1810_v43, %v1810_v43 }
0x161b   : > { %1845 = vmatmul.mubr.bf16.vlgmr.msra.gmra.mrb[12].mxu1 %v1811_v44 }
0x16ee   : > { %v1846_v45 = vpop.f32.mrb[12].mxu1 }
0x16ef   : > { %v1853_v46 = vpack.c.bf16 %v1846_v45, %v1846_v45  ;;  %v1848_v47 = vpop.f32.mrb[13].mxu1 }
0x16f0   : > { %v1854_v48 = vpack.c.bf16 %v1848_v47, %v1848_v47  ;;  %v1850_v49 = vpop.f32.mrb[14].mxu1 }
0x16f1   : > { %3401 = vtanh.bf16 %v1853_v46  ;;  %v1851_v50 = vpop.f32.mrb[15].mxu1 }
0x16f2   : > { %3403 = vtanh.bf16 %v1854_v48 }
0x16fc   : > { %v3402_v51 = vpop.eup %3401 }
0x16fd   : > { %v3404_v53 = vpop.eup %3403  ;;  %v1857_v54 = vunpack.c.l.bf16 %v3402_v51 }
0x16fe   : > { %v1858_v55 = vunpack.c.l.bf16 %v3404_v53 }
0x16ff   : > { %v1859_v56 = vmul.f32 0.025, %v1857_v54 }
0x1700   : > { %v1864_v30 = vmul.f32 %v1863_v52, %v1858_v55 }
0x1701   : > { %v1860_v31 = vadd.f32 %v1859_v56, %v1810_v43 }
0x1703   : > { %v1865_v32 = vadd.f32 %v1864_v30, %v1860_v31 }
0x1705   : > { %v1866_v59 = vsub.f32 %v1865_v32, %v1810_v43  ;;  %1870 = vst [vmem:[#allocation2] sm:$0xff] %v1865_v32 }
0x1707   : > { %v1867_v33 = vadd.f32 %v1866_v59, %v1810_v43 }
0x1709   : > { %1869 = vst [vmem:[#allocation3 + $0x48] sm:$0xff] %v1867_v33 }
0x170a PF: > { %p3162_p11 = scmp.ne.s32.totalorder %s3635_s15, 3 }
0x170b   : > { %v4504_v60 = vcombine.high (!%p3162_p11), %v3853_v1, %v3855_v2  ;;  %v4508_v61 = vcombine.low (!%p3162_p11), %v3853_v1, %v3855_v2  ;;  %v4512_v62 = vcombine.high (!%p3162_p11), %v3857_v3, %v3859_v4  ;;  %v4518_v63 = vcombine.low (!%p3162_p11), %v3857_v3, %v3859_v4  ;;  %v2006_v42 = vld [vmem:[%s3844_s29] sm:$0xff] (!%p3162_p11)  }
0x170c   : > { %1874 = sbr.rel (%p3162_p11) target bundleno = 7824 (0x1e90), region = 64  ;;  %v4523_v58 = vcombine.high (!%p3162_p11), %v3861_v5, %v3863_v6  ;;  %v3655_v0 = vmov (!%p3162_p11), 0   ;;  %v4533_v18 = vcombine.low (!%p3162_p11), %v3861_v5, %v3863_v6  ;;  %v4538_v19 = vcombine.high (!%p3162_p11), %v3865_v7, %v3867_v8  ;;  %v1875_v34 = vld [vmem:[#allocation2] sm:$0xff] (!%p3162_p11) }
0x170d   : > { %1957 = vmatprep.subr.bf16.mxu0 (!%p3162_p11), %v4504_v60  ;;  %2011 = vmatprep.subr.bf16.mxu1 (!%p3162_p11), %v4504_v60  ;;  %v4545_v20 = vcombine.low (!%p3162_p11), %v3865_v7, %v3867_v8  ;;  %v4550_v21 = vcombine.high (!%p3162_p11), %v3869_v9, %v3871_v10  ;;  %v4557_v57 = vcombine.low (!%p3162_p11), %v3869_v9, %v3871_v10  ;;  %v2007_v23 = vunpack.c.l.bf16 (!%p3162_p11), %v2006_v42 }
0x170e   : > { %1958 = vmatpush1.bf16.msra.mxu0 (!%p3162_p11), %v4508_v61  ;;  %1989 = vmatprep.mubr.bf16.mxu0 (!%p3162_p11), %v3655_v0  ;;  %v4562_v22 = vcombine.high (!%p3162_p11), %v3873_v11, %v3875_v12  ;;  %v4569_v24 = vcombine.low (!%p3162_p11), %v3873_v11, %v3875_v12  ;;  %v4574_v25 = vcombine.high (!%p3162_p11), %v3877_v13, %v3879_v14  ;;  %v2062_v30 = vunpack.c.h.bf16 (!%p3162_p11), %v2006_v42 }
0x170f   : > { %1959 = vmatprep.subr.bf16.mxu0 (!%p3162_p11), %v4512_v62  ;;  %2012 = vmatpush1.bf16.msra.mxu1 (!%p3162_p11), %v4508_v61  ;;  %v4581_v26 = vcombine.low (!%p3162_p11), %v3877_v13, %v3879_v14  ;;  %v4586_v27 = vcombine.high (!%p3162_p11), %v3881_v15, %v3883_v16  ;;  %v4593_v28 = vcombine.low (!%p3162_p11), %v3881_v15, %v3883_v16 }
0x1710   : > { %2013 = vmatprep.subr.bf16.mxu1 (!%p3162_p11), %v4512_v62  ;;  %2043 = vmatprep.mubr.bf16.mxu1 (!%p3162_p11), %v3655_v0  ;;  %v1876_v35 = vpack.c.bf16 (!%p3162_p11), %v1875_v34, %v1875_v34 }
0x1712   : > { %1960 = vmatpush1.bf16.msra.mxu0 (!%p3162_p11), %v4518_v63 }
0x1713   : > { %1961 = vmatprep.subr.bf16.mxu0 %v4523_v58  ;;  %2014 = vmatpush1.bf16.msra.mxu1 %v4518_v63 }
0x1714   : > { %2015 = vmatprep.subr.bf16.mxu1 %v4523_v58 }
0x1716   : > { %1962 = vmatpush1.bf16.msra.mxu0 %v4533_v18 }
0x1717   : > { %1963 = vmatprep.subr.bf16.mxu0 %v4538_v19  ;;  %2016 = vmatpush1.bf16.msra.mxu1 %v4533_v18 }
0x1718   : > { %2017 = vmatprep.subr.bf16.mxu1 %v4538_v19 }
0x171a   : > { %1964 = vmatpush1.bf16.msra.mxu0 %v4545_v20 }
0x171b   : > { %1965 = vmatprep.subr.bf16.mxu0 %v4550_v21  ;;  %2018 = vmatpush1.bf16.msra.mxu1 %v4545_v20 }
0x171c   : > { %2019 = vmatprep.subr.bf16.mxu1 %v4550_v21 }
0x171e   : > { %1966 = vmatpush1.bf16.msra.mxu0 %v4557_v57 }
0x171f   : > { %1967 = vmatprep.subr.bf16.mxu0 %v4562_v22  ;;  %2020 = vmatpush1.bf16.msra.mxu1 %v4557_v57 }
0x1720   : > { %2021 = vmatprep.subr.bf16.mxu1 %v4562_v22 }
0x1722   : > { %1968 = vmatpush1.bf16.msra.mxu0 %v4569_v24 }
0x1723   : > { %1969 = vmatprep.subr.bf16.mxu0 %v4574_v25  ;;  %2022 = vmatpush1.bf16.msra.mxu1 %v4569_v24 }
0x1724   : > { %2023 = vmatprep.subr.bf16.mxu1 %v4574_v25 }
0x1726   : > { %1970 = vmatpush1.bf16.msra.mxu0 %v4581_v26 }
0x1727   : > { %1971 = vmatprep.subr.bf16.mxu0 %v4586_v27  ;;  %2024 = vmatpush1.bf16.msra.mxu1 %v4581_v26 }
0x1728   : > { %2025 = vmatprep.subr.bf16.mxu1 %v4586_v27 }
0x172a   : > { %1972 = vmatpush1.bf16.msra.mxu0 %v4593_v28 }
0x172b   : > { %2066 = vmatprep.subr.bf16.mxu0 %v4504_v60  ;;  %2026 = vmatpush1.bf16.msra.mxu1 %v4593_v28 }
0x172c   : > { %2126 = vmatprep.subr.bf16.mxu1 %v4504_v60 }
0x172d   : > { %1990 = vmatmul.mubr.bf16.vlgmr.msra.gmra.mrb[0].mxu0 %v1876_v35 }
0x172e   : > { %2067 = vmatpush1.bf16.msra.mxu0 %v4508_v61  ;;  %2098 = vmatprep.mubr.bf16.mxu0 %v3655_v0 }
0x172f   : > { %2068 = vmatprep.subr.bf16.mxu0 %v4512_v62 }
0x1732   : > { %2069 = vmatpush1.bf16.msra.mxu0 %v4518_v63 }
0x1733   : > { %2070 = vmatprep.subr.bf16.mxu0 %v4523_v58 }
0x1736   : > { %2071 = vmatpush1.bf16.msra.mxu0 %v4533_v18 }
0x1737   : > { %2072 = vmatprep.subr.bf16.mxu0 %v4538_v19 }
0x173a   : > { %2073 = vmatpush1.bf16.msra.mxu0 %v4545_v20 }
0x173b   : > { %2074 = vmatprep.subr.bf16.mxu0 %v4550_v21 }
0x173e   : > { %2075 = vmatpush1.bf16.msra.mxu0 %v4557_v57 }
0x173f   : > { %2076 = vmatprep.subr.bf16.mxu0 %v4562_v22 }
0x1742   : > { %2077 = vmatpush1.bf16.msra.mxu0 %v4569_v24 }
0x1743   : > { %2078 = vmatprep.subr.bf16.mxu0 %v4574_v25 }
0x1746   : > { %2079 = vmatpush1.bf16.msra.mxu0 %v4581_v26 }
0x1747   : > { %2080 = vmatprep.subr.bf16.mxu0 %v4586_v27 }
0x174a   : > { %2081 = vmatpush1.bf16.msra.mxu0 %v4593_v28 }
0x174b   : > { %2181 = vmatprep.subr.bf16.mxu0 %v4504_v60 }
0x1800   : > { %v1991_v36 = vpop.f32.mrb[0].mxu0 }
0x1801   : > { %v1998_v37 = vpack.c.bf16 %v1991_v36, %v1991_v36  ;;  %v1993_v38 = vpop.f32.mrb[1].mxu0 }
0x1802   : > { %v1999_v39 = vpack.c.bf16 %v1993_v38, %v1993_v38  ;;  %v1995_v40 = vpop.f32.mrb[2].mxu0 }
0x1803   : > { %3405 = vtanh.bf16 %v1998_v37  ;;  %v1996_v41 = vpop.f32.mrb[3].mxu0 }
0x1804   : > { %3407 = vtanh.bf16 %v1999_v39 }
0x180e   : > { %v3406_v29 = vpop.eup %3405 }
0x180f   : > { %v3408_v17 = vpop.eup %3407  ;;  %v2002_v43 = vunpack.c.l.bf16 %v3406_v29 }
0x1810   : > { %v2003_v44 = vunpack.c.l.bf16 %v3408_v17 }
0x1811   : > { %v2004_v45 = vmul.f32 0.025, %v2002_v43 }
0x1812   : > { %v2008_v46 = vmul.f32 %v2007_v23, %v2003_v44  ;;  %v3180_v23 = vld [vmem:[%s3844_s29 + $0x8] sm:$0xff]  }
0x1813   : > { %v2005_v47 = vadd.f32 %v2004_v45, %v1875_v34  ;;  %v2117_v43 = vunpack.c.l.bf16 %v3180_v23 }
0x1815   : > { %v2009_v48 = vadd.f32 %v2008_v46, %v2005_v47 }
0x1817   : > { %v2010_v49 = vpack.c.bf16 %v2009_v48, %v2009_v48 }
0x1819   : > { %2044 = vmatmul.mubr.bf16.vlgmr.msra.gmra.mrb[0].mxu1 %v2010_v49 }
0x181a   : > { %2127 = vmatpush1.bf16.msra.mxu1 %v4508_v61  ;;  %2158 = vmatprep.mubr.bf16.mxu1 %v3655_v0 }
0x181b   : > { %2128 = vmatprep.subr.bf16.mxu1 %v4512_v62 }
0x181e   : > { %2129 = vmatpush1.bf16.msra.mxu1 %v4518_v63 }
0x181f   : > { %2130 = vmatprep.subr.bf16.mxu1 %v4523_v58 }
0x1822   : > { %2131 = vmatpush1.bf16.msra.mxu1 %v4533_v18 }
0x1823   : > { %2132 = vmatprep.subr.bf16.mxu1 %v4538_v19 }
0x1826   : > { %2133 = vmatpush1.bf16.msra.mxu1 %v4545_v20 }
0x1827   : > { %2134 = vmatprep.subr.bf16.mxu1 %v4550_v21 }
0x182a   : > { %2135 = vmatpush1.bf16.msra.mxu1 %v4557_v57 }
0x182b   : > { %2136 = vmatprep.subr.bf16.mxu1 %v4562_v22 }
0x182e   : > { %2137 = vmatpush1.bf16.msra.mxu1 %v4569_v24 }
0x182f   : > { %2138 = vmatprep.subr.bf16.mxu1 %v4574_v25 }
0x1832   : > { %2139 = vmatpush1.bf16.msra.mxu1 %v4581_v26 }
0x1833   : > { %2140 = vmatprep.subr.bf16.mxu1 %v4586_v27 }
0x1836   : > { %2141 = vmatpush1.bf16.msra.mxu1 %v4593_v28 }
0x1837   : > { %2236 = vmatprep.subr.bf16.mxu1 %v4504_v60 }
0x18ec   : > { %v2045_v50 = vpop.f32.mrb[0].mxu1 }
0x18ed   : > { %v2052_v51 = vpack.c.bf16 %v2045_v50, %v2045_v50  ;;  %v2047_v52 = vpop.f32.mrb[1].mxu1 }
0x18ee   : > { %v2053_v53 = vpack.c.bf16 %v2047_v52, %v2047_v52  ;;  %v2049_v54 = vpop.f32.mrb[2].mxu1 }
0x18ef   : > { %3409 = vtanh.bf16 %v2052_v51  ;;  %v2050_v55 = vpop.f32.mrb[3].mxu1 }
0x18f0   : > { %3411 = vtanh.bf16 %v2053_v53 }
0x18fa   : > { %v3410_v56 = vpop.eup %3409 }
0x18fb   : > { %v3412_v31 = vpop.eup %3411  ;;  %v2056_v32 = vunpack.c.l.bf16 %v3410_v56 }
0x18fc   : > { %v2057_v59 = vunpack.c.l.bf16 %v3412_v31 }
0x18fd   : > { %v2058_v33 = vmul.f32 0.025, %v2056_v32 }
0x18fe   : > { %v2063_v34 = vmul.f32 %v2062_v30, %v2057_v59 }
0x18ff   : > { %v2059_v35 = vadd.f32 %v2058_v33, %v2009_v48 }
0x1901   : > { %v2064_v36 = vadd.f32 %v2063_v34, %v2059_v35  ;;  %v2177_v34 = vunpack.c.h.bf16 %v3180_v23 }
0x1903   : > { %v2065_v37 = vpack.c.bf16 %v2064_v36, %v2064_v36 }
0x1905   : > { %2099 = vmatmul.mubr.bf16.vlgmr.msra.gmra.mrb[4].mxu0 %v2065_v37 }
0x1906   : > { %2182 = vmatpush1.bf16.msra.mxu0 %v4508_v61  ;;  %2213 = vmatprep.mubr.bf16.mxu0 %v3655_v0 }
0x1907   : > { %2183 = vmatprep.subr.bf16.mxu0 %v4512_v62 }
0x190a   : > { %2184 = vmatpush1.bf16.msra.mxu0 %v4518_v63 }
0x190b   : > { %2185 = vmatprep.subr.bf16.mxu0 %v4523_v58 }
0x190e   : > { %2186 = vmatpush1.bf16.msra.mxu0 %v4533_v18 }
0x190f   : > { %2187 = vmatprep.subr.bf16.mxu0 %v4538_v19 }
0x1912   : > { %2188 = vmatpush1.bf16.msra.mxu0 %v4545_v20 }
0x1913   : > { %2189 = vmatprep.subr.bf16.mxu0 %v4550_v21 }
0x1916   : > { %2190 = vmatpush1.bf16.msra.mxu0 %v4557_v57 }
0x1917   : > { %2191 = vmatprep.subr.bf16.mxu0 %v4562_v22 }
0x191a   : > { %2192 = vmatpush1.bf16.msra.mxu0 %v4569_v24 }
0x191b   : > { %2193 = vmatprep.subr.bf16.mxu0 %v4574_v25 }
0x191e   : > { %2194 = vmatpush1.bf16.msra.mxu0 %v4581_v26 }
0x191f   : > { %2195 = vmatprep.subr.bf16.mxu0 %v4586_v27 }
0x1922   : > { %2196 = vmatpush1.bf16.msra.mxu0 %v4593_v28 }
0x1923   : > { %2296 = vmatprep.subr.bf16.mxu0 %v4504_v60 }
0x19d8   : > { %v2100_v38 = vpop.f32.mrb[4].mxu0 }
0x19d9   : > { %v2107_v39 = vpack.c.bf16 %v2100_v38, %v2100_v38  ;;  %v2102_v40 = vpop.f32.mrb[5].mxu0 }
0x19da   : > { %v2108_v41 = vpack.c.bf16 %v2102_v40, %v2102_v40  ;;  %v2104_v42 = vpop.f32.mrb[6].mxu0 }
0x19db   : > { %3413 = vtanh.bf16 %v2107_v39  ;;  %v2105_v29 = vpop.f32.mrb[7].mxu0 }
0x19dc   : > { %3415 = vtanh.bf16 %v2108_v41 }
0x19e6   : > { %v3414_v17 = vpop.eup %3413 }
0x19e7   : > { %v3416_v44 = vpop.eup %3415  ;;  %v2111_v45 = vunpack.c.l.bf16 %v3414_v17 }
0x19e8   : > { %v2112_v46 = vunpack.c.l.bf16 %v3416_v44 }
0x19e9   : > { %v2113_v47 = vmul.f32 0.025, %v2111_v45  ;;  %v3182_v45 = vld [vmem:[%s3844_s29 + $0x10] sm:$0xff]  }
0x19ea   : > { %v2118_v48 = vmul.f32 %v2117_v43, %v2112_v46 }
0x19eb   : > { %v2114_v49 = vadd.f32 %v2113_v47, %v2064_v36  ;;  %v2232_v47 = vunpack.c.l.bf16 %v3182_v45 }
0x19ed   : > { %v2119_v50 = vadd.f32 %v2118_v48, %v2114_v49 }
0x19ef   : > { %v2120_v51 = vsub.f32 %v2119_v50, %v2064_v36  ;;  %v2125_v52 = vpack.c.bf16 %v2119_v50, %v2119_v50 }
0x19f1   : > { %v2121_v53 = vmul.f32 0.6666667, %v2120_v51  ;;  %2159 = vmatmul.mubr.bf16.vlgmr.msra.gmra.mrb[4].mxu1 %v2125_v52 }
0x19f2   : > { %2237 = vmatpush1.bf16.msra.mxu1 %v4508_v61  ;;  %2268 = vmatprep.mubr.bf16.mxu1 %v3655_v0 }
0x19f3   : > { %v2122_v54 = vadd.f32 %v2121_v53, %v2064_v36  ;;  %2238 = vmatprep.subr.bf16.mxu1 %v4512_v62 }
0x19f5   : > { %2124 = vst [vmem:[#allocation3 + $0x50] sm:$0xff] %v2122_v54 }
0x19f6   : > { %2239 = vmatpush1.bf16.msra.mxu1 %v4518_v63 }
0x19f7   : > { %2240 = vmatprep.subr.bf16.mxu1 %v4523_v58 }
0x19fa   : > { %2241 = vmatpush1.bf16.msra.mxu1 %v4533_v18 }
0x19fb   : > { %2242 = vmatprep.subr.bf16.mxu1 %v4538_v19 }
0x19fe   : > { %2243 = vmatpush1.bf16.msra.mxu1 %v4545_v20 }
0x19ff   : > { %2244 = vmatprep.subr.bf16.mxu1 %v4550_v21 }
0x1a02   : > { %2245 = vmatpush1.bf16.msra.mxu1 %v4557_v57 }
0x1a03   : > { %2246 = vmatprep.subr.bf16.mxu1 %v4562_v22 }
0x1a06   : > { %2247 = vmatpush1.bf16.msra.mxu1 %v4569_v24 }
0x1a07   : > { %2248 = vmatprep.subr.bf16.mxu1 %v4574_v25 }
0x1a0a   : > { %2249 = vmatpush1.bf16.msra.mxu1 %v4581_v26 }
0x1a0b   : > { %2250 = vmatprep.subr.bf16.mxu1 %v4586_v27 }
0x1a0e   : > { %2251 = vmatpush1.bf16.msra.mxu1 %v4593_v28 }
0x1a0f   : > { %2351 = vmatprep.subr.bf16.mxu1 %v4504_v60 }
0x1ac4   : > { %v2160_v55 = vpop.f32.mrb[4].mxu1 }
0x1ac5   : > { %v2167_v56 = vpack.c.bf16 %v2160_v55, %v2160_v55  ;;  %v2162_v30 = vpop.f32.mrb[5].mxu1 }
0x1ac6   : > { %v2168_v31 = vpack.c.bf16 %v2162_v30, %v2162_v30  ;;  %v2164_v32 = vpop.f32.mrb[6].mxu1 }
0x1ac7   : > { %3417 = vtanh.bf16 %v2167_v56  ;;  %v2165_v59 = vpop.f32.mrb[7].mxu1 }
0x1ac8   : > { %3419 = vtanh.bf16 %v2168_v31 }
0x1ad2   : > { %v3418_v33 = vpop.eup %3417 }
0x1ad3   : > { %v3420_v35 = vpop.eup %3419  ;;  %v2171_v36 = vunpack.c.l.bf16 %v3418_v33 }
0x1ad4   : > { %v2172_v37 = vunpack.c.l.bf16 %v3420_v35 }
0x1ad5   : > { %v2173_v38 = vmul.f32 0.025, %v2171_v36 }
0x1ad6   : > { %v2178_v39 = vmul.f32 %v2177_v34, %v2172_v37  ;;  %v3184_v37 = vld [vmem:[%s3844_s29 + $0x18] sm:$0xff]  }
0x1ad7   : > { %v2174_v40 = vadd.f32 %v2173_v38, %v2119_v50 }
0x1ad9   : > { %v2179_v41 = vadd.f32 %v2178_v39, %v2174_v40  ;;  %v2347_v39 = vunpack.c.l.bf16 %v3184_v37 }
0x1adb   : > { %v2180_v42 = vpack.c.bf16 %v2179_v41, %v2179_v41 }
0x1add   : > { %2214 = vmatmul.mubr.bf16.vlgmr.msra.gmra.mrb[8].mxu0 %v2180_v42 }
0x1ade   : > { %2297 = vmatpush1.bf16.msra.mxu0 %v4508_v61  ;;  %2328 = vmatprep.mubr.bf16.mxu0 %v3655_v0 }
0x1adf   : > { %2298 = vmatprep.subr.bf16.mxu0 %v4512_v62 }
0x1ae2   : > { %2299 = vmatpush1.bf16.msra.mxu0 %v4518_v63 }
0x1ae3   : > { %2300 = vmatprep.subr.bf16.mxu0 %v4523_v58 }
0x1ae6   : > { %2301 = vmatpush1.bf16.msra.mxu0 %v4533_v18 }
0x1ae7   : > { %2302 = vmatprep.subr.bf16.mxu0 %v4538_v19 }
0x1aea   : > { %2303 = vmatpush1.bf16.msra.mxu0 %v4545_v20 }
0x1aeb   : > { %2304 = vmatprep.subr.bf16.mxu0 %v4550_v21 }
0x1aee   : > { %2305 = vmatpush1.bf16.msra.mxu0 %v4557_v57 }
0x1aef   : > { %2306 = vmatprep.subr.bf16.mxu0 %v4562_v22 }
0x1af2   : > { %2307 = vmatpush1.bf16.msra.mxu0 %v4569_v24 }
0x1af3   : > { %2308 = vmatprep.subr.bf16.mxu0 %v4574_v25 }
0x1af6   : > { %2309 = vmatpush1.bf16.msra.mxu0 %v4581_v26 }
0x1af7   : > { %2310 = vmatprep.subr.bf16.mxu0 %v4586_v27 }
0x1afa   : > { %2311 = vmatpush1.bf16.msra.mxu0 %v4593_v28 }
0x1bb0   : > { %v2215_v60 = vpop.f32.mrb[8].mxu0 }
0x1bb1   : > { %v2222_v29 = vpack.c.bf16 %v2215_v60, %v2215_v60  ;;  %v2217_v23 = vpop.f32.mrb[9].mxu0 }
0x1bb2   : > { %v2223_v17 = vpack.c.bf16 %v2217_v23, %v2217_v23  ;;  %v2219_v43 = vpop.f32.mrb[10].mxu0 }
0x1bb3   : > { %3421 = vtanh.bf16 %v2222_v29  ;;  %v2220_v44 = vpop.f32.mrb[11].mxu0 }
0x1bb4   : > { %3423 = vtanh.bf16 %v2223_v17 }
0x1bbe   : > { %v3422_v46 = vpop.eup %3421 }
0x1bbf   : > { %v3424_v48 = vpop.eup %3423  ;;  %v2226_v49 = vunpack.c.l.bf16 %v3422_v46 }
0x1bc0   : > { %v2227_v50 = vunpack.c.l.bf16 %v3424_v48 }
0x1bc1   : > { %v2228_v51 = vmul.f32 0.025, %v2226_v49 }
0x1bc2   : > { %v2233_v52 = vmul.f32 %v2232_v47, %v2227_v50 }
0x1bc3   : > { %v2229_v53 = vadd.f32 %v2228_v51, %v2179_v41  ;;  %v2402_v51 = vunpack.c.h.bf16 %v3184_v37 }
0x1bc5   : > { %v2234_v54 = vadd.f32 %v2233_v52, %v2229_v53 }
0x1bc7   : > { %v2235_v55 = vpack.c.bf16 %v2234_v54, %v2234_v54 }
0x1bc9   : > { %2269 = vmatmul.mubr.bf16.vlgmr.msra.gmra.mrb[8].mxu1 %v2235_v55 }
0x1bca   : > { %2352 = vmatpush1.bf16.msra.mxu1 %v4508_v61  ;;  %2383 = vmatprep.mubr.bf16.mxu1 %v3655_v0 }
0x1bcb   : > { %2353 = vmatprep.subr.bf16.mxu1 %v4512_v62 }
0x1bce   : > { %2354 = vmatpush1.bf16.msra.mxu1 %v4518_v63 }
0x1bcf   : > { %2355 = vmatprep.subr.bf16.mxu1 %v4523_v58 }
0x1bd2   : > { %2356 = vmatpush1.bf16.msra.mxu1 %v4533_v18 }
0x1bd3   : > { %2357 = vmatprep.subr.bf16.mxu1 %v4538_v19 }
0x1bd6   : > { %2358 = vmatpush1.bf16.msra.mxu1 %v4545_v20  ;;  %v2287_v20 = vunpack.c.h.bf16 %v3182_v45 }
0x1bd7   : > { %2359 = vmatprep.subr.bf16.mxu1 %v4550_v21 }
0x1bda   : > { %2360 = vmatpush1.bf16.msra.mxu1 %v4557_v57 }
0x1bdb   : > { %2361 = vmatprep.subr.bf16.mxu1 %v4562_v22 }
0x1bde   : > { %2362 = vmatpush1.bf16.msra.mxu1 %v4569_v24 }
0x1bdf   : > { %2363 = vmatprep.subr.bf16.mxu1 %v4574_v25 }
0x1be2   : > { %2364 = vmatpush1.bf16.msra.mxu1 %v4581_v26 }
0x1be3   : > { %2365 = vmatprep.subr.bf16.mxu1 %v4586_v27 }
0x1be6   : > { %2366 = vmatpush1.bf16.msra.mxu1 %v4593_v28 }
0x1c9c   : > { %v2270_v61 = vpop.f32.mrb[8].mxu1 }
0x1c9d   : > { %v2277_v62 = vpack.c.bf16 %v2270_v61, %v2270_v61  ;;  %v2272_v63 = vpop.f32.mrb[9].mxu1 }
0x1c9e   : > { %v2278_v58 = vpack.c.bf16 %v2272_v63, %v2272_v63  ;;  %v2274_v0 = vpop.f32.mrb[10].mxu1 }
0x1c9f   : > { %3425 = vtanh.bf16 %v2277_v62  ;;  %v2275_v18 = vpop.f32.mrb[11].mxu1 }
0x1ca0   : > { %3427 = vtanh.bf16 %v2278_v58 }
0x1caa   : > { %v3426_v19 = vpop.eup %3425 }
0x1cab   : > { %v3428_v21 = vpop.eup %3427  ;;  %v2281_v57 = vunpack.c.l.bf16 %v3426_v19 }
0x1cac   : > { %v2282_v22 = vunpack.c.l.bf16 %v3428_v21 }
0x1cad   : > { %v2283_v24 = vmul.f32 0.025, %v2281_v57 }
0x1cae   : > { %v2288_v25 = vmul.f32 %v2287_v20, %v2282_v22 }
0x1caf   : > { %v2284_v26 = vadd.f32 %v2283_v24, %v2234_v54 }
0x1cb1   : > { %v2289_v27 = vadd.f32 %v2288_v25, %v2284_v26 }
0x1cb3   : > { %v2290_v56 = vsub.f32 %v2289_v27, %v2234_v54  ;;  %v2295_v28 = vpack.c.bf16 %v2289_v27, %v2289_v27 }
0x1cb5   : > { %v2291_v30 = vmul.f32 0.33333334, %v2290_v56  ;;  %2329 = vmatmul.mubr.bf16.vlgmr.msra.gmra.mrb[12].mxu0 %v2295_v28 }
0x1cb7   : > { %v2292_v31 = vadd.f32 %v2291_v30, %v2234_v54 }
0x1cb9   : > { %2294 = vst [vmem:[#allocation3 + $0x58] sm:$0xff] %v2292_v31 }
0x1d88   : > { %v2330_v32 = vpop.f32.mrb[12].mxu0 }
0x1d89   : > { %v2337_v59 = vpack.c.bf16 %v2330_v32, %v2330_v32  ;;  %v2332_v33 = vpop.f32.mrb[13].mxu0 }
0x1d8a   : > { %v2338_v34 = vpack.c.bf16 %v2332_v33, %v2332_v33  ;;  %v2334_v35 = vpop.f32.mrb[14].mxu0 }
0x1d8b   : > { %3429 = vtanh.bf16 %v2337_v59  ;;  %v2335_v36 = vpop.f32.mrb[15].mxu0 }
0x1d8c   : > { %3431 = vtanh.bf16 %v2338_v34 }
0x1d96   : > { %v3430_v38 = vpop.eup %3429 }
0x1d97   : > { %v3432_v40 = vpop.eup %3431  ;;  %v2341_v41 = vunpack.c.l.bf16 %v3430_v38 }
0x1d98   : > { %v2342_v42 = vunpack.c.l.bf16 %v3432_v40 }
0x1d99   : > { %v2343_v60 = vmul.f32 0.025, %v2341_v41 }
0x1d9a   : > { %v2348_v29 = vmul.f32 %v2347_v39, %v2342_v42 }
0x1d9b   : > { %v2344_v23 = vadd.f32 %v2343_v60, %v2289_v27 }
0x1d9d   : > { %v2349_v17 = vadd.f32 %v2348_v29, %v2344_v23 }
0x1d9f   : > { %v2350_v43 = vpack.c.bf16 %v2349_v17, %v2349_v17 }
0x1da1   : > { %2384 = vmatmul.mubr.bf16.vlgmr.msra.gmra.mrb[12].mxu1 %v2350_v43 }
0x1e74   : > { %v2385_v44 = vpop.f32.mrb[12].mxu1 }
0x1e75   : > { %v2392_v45 = vpack.c.bf16 %v2385_v44, %v2385_v44  ;;  %v2387_v46 = vpop.f32.mrb[13].mxu1 }
0x1e76   : > { %v2393_v47 = vpack.c.bf16 %v2387_v46, %v2387_v46  ;;  %v2389_v48 = vpop.f32.mrb[14].mxu1 }
0x1e77   : > { %3433 = vtanh.bf16 %v2392_v45  ;;  %v2390_v49 = vpop.f32.mrb[15].mxu1 }
0x1e78   : > { %3435 = vtanh.bf16 %v2393_v47 }
0x1e82   : > { %v3434_v50 = vpop.eup %3433 }
0x1e83   : > { %v3436_v52 = vpop.eup %3435  ;;  %v2396_v53 = vunpack.c.l.bf16 %v3434_v50 }
0x1e84   : > { %v2397_v54 = vunpack.c.l.bf16 %v3436_v52 }
0x1e85   : > { %v2398_v55 = vmul.f32 0.025, %v2396_v53 }
0x1e86   : > { %v2403_v61 = vmul.f32 %v2402_v51, %v2397_v54 }
0x1e87   : > { %v2399_v62 = vadd.f32 %v2398_v55, %v2349_v17 }
0x1e89   : > { %v2404_v63 = vadd.f32 %v2403_v61, %v2399_v62 }
0x1e8b   : > { %v2405_v58 = vsub.f32 %v2404_v63, %v2349_v17  ;;  %2409 = vst [vmem:[#allocation2] sm:$0xff] %v2404_v63 }
0x1e8d   : > { %v2406_v0 = vadd.f32 %v2405_v58, %v2349_v17 }
0x1e8f   : > { %2408 = vst [vmem:[#allocation3 + $0x60] sm:$0xff] %v2406_v0 }
0x1e90 PF: > { %p3186_p13 = scmp.ne.s32.totalorder %s3635_s15, 4 }
0x1e91   : > { %v4709_v18 = vcombine.high (!%p3186_p13), %v3853_v1, %v3855_v2  ;;  %v4713_v19 = vcombine.low (!%p3186_p13), %v3853_v1, %v3855_v2  ;;  %v4717_v20 = vcombine.high (!%p3186_p13), %v3857_v3, %v3859_v4  ;;  %v4723_v21 = vcombine.low (!%p3186_p13), %v3857_v3, %v3859_v4  ;;  %v2545_v27 = vld [vmem:[%s3844_s29] sm:$0xff] (!%p3186_p13)   ;;  %v3204_v55 = vld [vmem:[%s3844_s29 + $0x8] sm:$0xff] (!%p3186_p13)  }
0x1e92   : > { %2413 = sbr.rel (%p3186_p13) target bundleno = 9750 (0x2616), region = 68  ;;  %v4728_v57 = vcombine.high (!%p3186_p13), %v3861_v5, %v3863_v6  ;;  %v3656_v1 = vmov (!%p3186_p13), 0   ;;  %v4738_v2 = vcombine.low (!%p3186_p13), %v3861_v5, %v3863_v6  ;;  %v4743_v3 = vcombine.high (!%p3186_p13), %v3865_v7, %v3867_v8  ;;  %v2414_v22 = vld [vmem:[#allocation2] sm:$0xff] (!%p3186_p13) }
0x1e93   : > { %2496 = vmatprep.subr.bf16.mxu0 (!%p3186_p13), %v4709_v18  ;;  %2550 = vmatprep.subr.bf16.mxu1 (!%p3186_p13), %v4709_v18  ;;  %v4750_v4 = vcombine.low (!%p3186_p13), %v3865_v7, %v3867_v8  ;;  %v4755_v5 = vcombine.high (!%p3186_p13), %v3869_v9, %v3871_v10  ;;  %v4762_v6 = vcombine.low (!%p3186_p13), %v3869_v9, %v3871_v10  ;;  %v2546_v28 = vunpack.c.l.bf16 (!%p3186_p13), %v2545_v27 }
0x1e94   : > { %2497 = vmatpush1.bf16.msra.mxu0 (!%p3186_p13), %v4713_v19  ;;  %2528 = vmatprep.mubr.bf16.mxu0 (!%p3186_p13), %v3656_v1  ;;  %v4767_v7 = vcombine.high (!%p3186_p13), %v3873_v11, %v3875_v12  ;;  %v4774_v8 = vcombine.low (!%p3186_p13), %v3873_v11, %v3875_v12  ;;  %v4779_v9 = vcombine.high (!%p3186_p13), %v3877_v13, %v3879_v14  ;;  %v2601_v29 = vunpack.c.h.bf16 (!%p3186_p13), %v2545_v27 }
0x1e95   : > { %2498 = vmatprep.subr.bf16.mxu0 (!%p3186_p13), %v4717_v20  ;;  %2551 = vmatpush1.bf16.msra.mxu1 (!%p3186_p13), %v4713_v19  ;;  %v4786_v10 = vcombine.low (!%p3186_p13), %v3877_v13, %v3879_v14  ;;  %v4791_v11 = vcombine.high (!%p3186_p13), %v3881_v15, %v3883_v16  ;;  %v4798_v12 = vcombine.low (!%p3186_p13), %v3881_v15, %v3883_v16  ;;  %v2656_v62 = vunpack.c.l.bf16 (!%p3186_p13), %v3204_v55 }
0x1e96   : > { %2552 = vmatprep.subr.bf16.mxu1 (!%p3186_p13), %v4717_v20  ;;  %2582 = vmatprep.mubr.bf16.mxu1 (!%p3186_p13), %v3656_v1  ;;  %v2415_v13 = vpack.c.bf16 (!%p3186_p13), %v2414_v22, %v2414_v22 }
0x1e98   : > { %2499 = vmatpush1.bf16.msra.mxu0 (!%p3186_p13), %v4723_v21 }
0x1e99   : > { %2500 = vmatprep.subr.bf16.mxu0 %v4728_v57  ;;  %2553 = vmatpush1.bf16.msra.mxu1 %v4723_v21 }
0x1e9a   : > { %2554 = vmatprep.subr.bf16.mxu1 %v4728_v57 }
0x1e9c   : > { %2501 = vmatpush1.bf16.msra.mxu0 %v4738_v2 }
0x1e9d   : > { %2502 = vmatprep.subr.bf16.mxu0 %v4743_v3  ;;  %2555 = vmatpush1.bf16.msra.mxu1 %v4738_v2 }
0x1e9e   : > { %2556 = vmatprep.subr.bf16.mxu1 %v4743_v3 }
0x1ea0   : > { %2503 = vmatpush1.bf16.msra.mxu0 %v4750_v4 }
0x1ea1   : > { %2504 = vmatprep.subr.bf16.mxu0 %v4755_v5  ;;  %2557 = vmatpush1.bf16.msra.mxu1 %v4750_v4 }
0x1ea2   : > { %2558 = vmatprep.subr.bf16.mxu1 %v4755_v5 }
0x1ea4   : > { %2505 = vmatpush1.bf16.msra.mxu0 %v4762_v6 }
0x1ea5   : > { %2506 = vmatprep.subr.bf16.mxu0 %v4767_v7  ;;  %2559 = vmatpush1.bf16.msra.mxu1 %v4762_v6 }
0x1ea6   : > { %2560 = vmatprep.subr.bf16.mxu1 %v4767_v7 }
0x1ea8   : > { %2507 = vmatpush1.bf16.msra.mxu0 %v4774_v8 }
0x1ea9   : > { %2508 = vmatprep.subr.bf16.mxu0 %v4779_v9  ;;  %2561 = vmatpush1.bf16.msra.mxu1 %v4774_v8 }
0x1eaa   : > { %2562 = vmatprep.subr.bf16.mxu1 %v4779_v9 }
0x1eac   : > { %2509 = vmatpush1.bf16.msra.mxu0 %v4786_v10 }
0x1ead   : > { %2510 = vmatprep.subr.bf16.mxu0 %v4791_v11  ;;  %2563 = vmatpush1.bf16.msra.mxu1 %v4786_v10 }
0x1eae   : > { %2564 = vmatprep.subr.bf16.mxu1 %v4791_v11 }
0x1eb0   : > { %2511 = vmatpush1.bf16.msra.mxu0 %v4798_v12 }
0x1eb1   : > { %2605 = vmatprep.subr.bf16.mxu0 %v4709_v18  ;;  %2565 = vmatpush1.bf16.msra.mxu1 %v4798_v12 }
0x1eb2   : > { %2665 = vmatprep.subr.bf16.mxu1 %v4709_v18 }
0x1eb3   : > { %2529 = vmatmul.mubr.bf16.vlgmr.msra.gmra.mrb[0].mxu0 %v2415_v13 }
0x1eb4   : > { %2606 = vmatpush1.bf16.msra.mxu0 %v4713_v19  ;;  %2637 = vmatprep.mubr.bf16.mxu0 %v3656_v1 }
0x1eb5   : > { %2607 = vmatprep.subr.bf16.mxu0 %v4717_v20 }
0x1eb8   : > { %2608 = vmatpush1.bf16.msra.mxu0 %v4723_v21 }
0x1eb9   : > { %2609 = vmatprep.subr.bf16.mxu0 %v4728_v57 }
0x1ebc   : > { %2610 = vmatpush1.bf16.msra.mxu0 %v4738_v2 }
0x1ebd   : > { %2611 = vmatprep.subr.bf16.mxu0 %v4743_v3 }
0x1ec0   : > { %2612 = vmatpush1.bf16.msra.mxu0 %v4750_v4 }
0x1ec1   : > { %2613 = vmatprep.subr.bf16.mxu0 %v4755_v5 }
0x1ec4   : > { %2614 = vmatpush1.bf16.msra.mxu0 %v4762_v6 }
0x1ec5   : > { %2615 = vmatprep.subr.bf16.mxu0 %v4767_v7 }
0x1ec8   : > { %2616 = vmatpush1.bf16.msra.mxu0 %v4774_v8 }
0x1ec9   : > { %2617 = vmatprep.subr.bf16.mxu0 %v4779_v9 }
0x1ecc   : > { %2618 = vmatpush1.bf16.msra.mxu0 %v4786_v10 }
0x1ecd   : > { %2619 = vmatprep.subr.bf16.mxu0 %v4791_v11 }
0x1ed0   : > { %2620 = vmatpush1.bf16.msra.mxu0 %v4798_v12 }
0x1ed1   : > { %2720 = vmatprep.subr.bf16.mxu0 %v4709_v18 }
0x1f86   : > { %v2530_v14 = vpop.f32.mrb[0].mxu0 }
0x1f87   : > { %v2537_v15 = vpack.c.bf16 %v2530_v14, %v2530_v14  ;;  %v2532_v16 = vpop.f32.mrb[1].mxu0 }
0x1f88   : > { %v2538_v24 = vpack.c.bf16 %v2532_v16, %v2532_v16  ;;  %v2534_v25 = vpop.f32.mrb[2].mxu0 }
0x1f89   : > { %3437 = vtanh.bf16 %v2537_v15  ;;  %v2535_v26 = vpop.f32.mrb[3].mxu0 }
0x1f8a   : > { %3439 = vtanh.bf16 %v2538_v24 }
0x1f94   : > { %v3438_v56 = vpop.eup %3437 }
0x1f95   : > { %v3440_v30 = vpop.eup %3439  ;;  %v2541_v31 = vunpack.c.l.bf16 %v3438_v56 }
0x1f96   : > { %v2542_v32 = vunpack.c.l.bf16 %v3440_v30 }
0x1f97   : > { %v2543_v59 = vmul.f32 0.025, %v2541_v31 }
0x1f98   : > { %v2547_v33 = vmul.f32 %v2546_v28, %v2542_v32 }
0x1f99   : > { %v2544_v34 = vadd.f32 %v2543_v59, %v2414_v22 }
0x1f9b   : > { %v2548_v35 = vadd.f32 %v2547_v33, %v2544_v34  ;;  %v2716_v33 = vunpack.c.h.bf16 %v3204_v55 }
0x1f9d   : > { %v2549_v36 = vpack.c.bf16 %v2548_v35, %v2548_v35 }
0x1f9f   : > { %2583 = vmatmul.mubr.bf16.vlgmr.msra.gmra.mrb[0].mxu1 %v2549_v36 }
0x1fa0   : > { %2666 = vmatpush1.bf16.msra.mxu1 %v4713_v19  ;;  %2697 = vmatprep.mubr.bf16.mxu1 %v3656_v1 }
0x1fa1   : > { %2667 = vmatprep.subr.bf16.mxu1 %v4717_v20 }
0x1fa4   : > { %2668 = vmatpush1.bf16.msra.mxu1 %v4723_v21 }
0x1fa5   : > { %2669 = vmatprep.subr.bf16.mxu1 %v4728_v57 }
0x1fa8   : > { %2670 = vmatpush1.bf16.msra.mxu1 %v4738_v2 }
0x1fa9   : > { %2671 = vmatprep.subr.bf16.mxu1 %v4743_v3 }
0x1fac   : > { %2672 = vmatpush1.bf16.msra.mxu1 %v4750_v4 }
0x1fad   : > { %2673 = vmatprep.subr.bf16.mxu1 %v4755_v5 }
0x1fb0   : > { %2674 = vmatpush1.bf16.msra.mxu1 %v4762_v6 }
0x1fb1   : > { %2675 = vmatprep.subr.bf16.mxu1 %v4767_v7 }
0x1fb4   : > { %2676 = vmatpush1.bf16.msra.mxu1 %v4774_v8 }
0x1fb5   : > { %2677 = vmatprep.subr.bf16.mxu1 %v4779_v9 }
0x1fb8   : > { %2678 = vmatpush1.bf16.msra.mxu1 %v4786_v10 }
0x1fb9   : > { %2679 = vmatprep.subr.bf16.mxu1 %v4791_v11 }
0x1fbc   : > { %2680 = vmatpush1.bf16.msra.mxu1 %v4798_v12 }
0x1fbd   : > { %2775 = vmatprep.subr.bf16.mxu1 %v4709_v18 }
0x2072   : > { %v2584_v37 = vpop.f32.mrb[0].mxu1 }
0x2073   : > { %v2591_v38 = vpack.c.bf16 %v2584_v37, %v2584_v37  ;;  %v2586_v39 = vpop.f32.mrb[1].mxu1 }
0x2074   : > { %v2592_v40 = vpack.c.bf16 %v2586_v39, %v2586_v39  ;;  %v2588_v41 = vpop.f32.mrb[2].mxu1 }
0x2075   : > { %3441 = vtanh.bf16 %v2591_v38  ;;  %v2589_v42 = vpop.f32.mrb[3].mxu1 }
0x2076   : > { %3443 = vtanh.bf16 %v2592_v40 }
0x2080   : > { %v3442_v60 = vpop.eup %3441 }
0x2081   : > { %v3444_v23 = vpop.eup %3443  ;;  %v2595_v17 = vunpack.c.l.bf16 %v3442_v60 }
0x2082   : > { %v2596_v43 = vunpack.c.l.bf16 %v3444_v23 }
0x2083   : > { %v2597_v44 = vmul.f32 0.025, %v2595_v17 }
0x2084   : > { %v2602_v45 = vmul.f32 %v2601_v29, %v2596_v43  ;;  %v3206_v43 = vld [vmem:[%s3844_s29 + $0x10] sm:$0xff]  }
0x2085   : > { %v2598_v46 = vadd.f32 %v2597_v44, %v2548_v35 }
0x2087   : > { %v2603_v47 = vadd.f32 %v2602_v45, %v2598_v46  ;;  %v2771_v45 = vunpack.c.l.bf16 %v3206_v43 }
0x2089   : > { %v2604_v48 = vpack.c.bf16 %v2603_v47, %v2603_v47 }
0x208b   : > { %2638 = vmatmul.mubr.bf16.vlgmr.msra.gmra.mrb[4].mxu0 %v2604_v48 }
0x208c   : > { %2721 = vmatpush1.bf16.msra.mxu0 %v4713_v19  ;;  %2752 = vmatprep.mubr.bf16.mxu0 %v3656_v1 }
0x208d   : > { %2722 = vmatprep.subr.bf16.mxu0 %v4717_v20 }
0x2090   : > { %2723 = vmatpush1.bf16.msra.mxu0 %v4723_v21 }
0x2091   : > { %2724 = vmatprep.subr.bf16.mxu0 %v4728_v57 }
0x2094   : > { %2725 = vmatpush1.bf16.msra.mxu0 %v4738_v2 }
0x2095   : > { %2726 = vmatprep.subr.bf16.mxu0 %v4743_v3 }
0x2098   : > { %2727 = vmatpush1.bf16.msra.mxu0 %v4750_v4 }
0x2099   : > { %2728 = vmatprep.subr.bf16.mxu0 %v4755_v5 }
0x209c   : > { %2729 = vmatpush1.bf16.msra.mxu0 %v4762_v6 }
0x209d   : > { %2730 = vmatprep.subr.bf16.mxu0 %v4767_v7 }
0x20a0   : > { %2731 = vmatpush1.bf16.msra.mxu0 %v4774_v8 }
0x20a1   : > { %2732 = vmatprep.subr.bf16.mxu0 %v4779_v9 }
0x20a4   : > { %2733 = vmatpush1.bf16.msra.mxu0 %v4786_v10 }
0x20a5   : > { %2734 = vmatprep.subr.bf16.mxu0 %v4791_v11 }
0x20a8   : > { %2735 = vmatpush1.bf16.msra.mxu0 %v4798_v12 }
0x20a9   : > { %2835 = vmatprep.subr.bf16.mxu0 %v4709_v18 }
0x215e   : > { %v2639_v49 = vpop.f32.mrb[4].mxu0 }
0x215f   : > { %v2646_v50 = vpack.c.bf16 %v2639_v49, %v2639_v49  ;;  %v2641_v51 = vpop.f32.mrb[5].mxu0 }
0x2160   : > { %v2647_v52 = vpack.c.bf16 %v2641_v51, %v2641_v51  ;;  %v2643_v53 = vpop.f32.mrb[6].mxu0 }
0x2161   : > { %3445 = vtanh.bf16 %v2646_v50  ;;  %v2644_v54 = vpop.f32.mrb[7].mxu0 }
0x2162   : > { %3447 = vtanh.bf16 %v2647_v52 }
0x216c   : > { %v3446_v61 = vpop.eup %3445 }
0x216d   : > { %v3448_v63 = vpop.eup %3447  ;;  %v2650_v58 = vunpack.c.l.bf16 %v3446_v61 }
0x216e   : > { %v2651_v0 = vunpack.c.l.bf16 %v3448_v63 }
0x216f   : > { %v2652_v22 = vmul.f32 0.025, %v2650_v58 }
0x2170   : > { %v2657_v13 = vmul.f32 %v2656_v62, %v2651_v0 }
0x2171   : > { %v2653_v14 = vadd.f32 %v2652_v22, %v2603_v47 }
0x2173   : > { %v2658_v15 = vadd.f32 %v2657_v13, %v2653_v14  ;;  %v3208_v14 = vld [vmem:[%s3844_s29 + $0x18] sm:$0xff]  }
0x2175   : > { %v2659_v16 = vsub.f32 %v2658_v15, %v2603_v47  ;;  %v2664_v24 = vpack.c.bf16 %v2658_v15, %v2658_v15 }
0x2177   : > { %v2660_v25 = vmul.f32 0.6666667, %v2659_v16  ;;  %2698 = vmatmul.mubr.bf16.vlgmr.msra.gmra.mrb[4].mxu1 %v2664_v24  ;;  %v2886_v16 = vunpack.c.l.bf16 %v3208_v14 }
0x2178   : > { %2776 = vmatpush1.bf16.msra.mxu1 %v4713_v19  ;;  %2807 = vmatprep.mubr.bf16.mxu1 %v3656_v1 }
0x2179   : > { %v2661_v26 = vadd.f32 %v2660_v25, %v2603_v47  ;;  %2777 = vmatprep.subr.bf16.mxu1 %v4717_v20 }
0x217b   : > { %2978 = vst [vmem:[#allocation10 + $0x68] sm:$0xff] %v2661_v26 }
0x217c   : > { %2778 = vmatpush1.bf16.msra.mxu1 %v4723_v21 }
0x217d   : > { %2779 = vmatprep.subr.bf16.mxu1 %v4728_v57 }
0x2180   : > { %2780 = vmatpush1.bf16.msra.mxu1 %v4738_v2 }
0x2181   : > { %2781 = vmatprep.subr.bf16.mxu1 %v4743_v3 }
0x2184   : > { %2782 = vmatpush1.bf16.msra.mxu1 %v4750_v4 }
0x2185   : > { %2783 = vmatprep.subr.bf16.mxu1 %v4755_v5 }
0x2188   : > { %2784 = vmatpush1.bf16.msra.mxu1 %v4762_v6 }
0x2189   : > { %2785 = vmatprep.subr.bf16.mxu1 %v4767_v7 }
0x218c   : > { %2786 = vmatpush1.bf16.msra.mxu1 %v4774_v8 }
0x218d   : > { %2787 = vmatprep.subr.bf16.mxu1 %v4779_v9 }
0x2190   : > { %2788 = vmatpush1.bf16.msra.mxu1 %v4786_v10 }
0x2191   : > { %2789 = vmatprep.subr.bf16.mxu1 %v4791_v11 }
0x2194   : > { %2790 = vmatpush1.bf16.msra.mxu1 %v4798_v12 }
0x2195   : > { %2890 = vmatprep.subr.bf16.mxu1 %v4709_v18 }
0x224a   : > { %v2699_v27 = vpop.f32.mrb[4].mxu1 }
0x224b   : > { %v2706_v56 = vpack.c.bf16 %v2699_v27, %v2699_v27  ;;  %v2701_v28 = vpop.f32.mrb[5].mxu1 }
0x224c   : > { %v2707_v30 = vpack.c.bf16 %v2701_v28, %v2701_v28  ;;  %v2703_v31 = vpop.f32.mrb[6].mxu1 }
0x224d   : > { %3449 = vtanh.bf16 %v2706_v56  ;;  %v2704_v32 = vpop.f32.mrb[7].mxu1 }
0x224e   : > { %3451 = vtanh.bf16 %v2707_v30  ;;  %v2949_v32 = vld [vmem:[#allocation3] sm:$0xff] }
0x224f   : > { %2965 = vst [vmem:[#allocation10] sm:$0xff] %v2949_v32 }
0x2258   : > { %v3450_v59 = vpop.eup %3449 }
0x2259   : > { %v3452_v34 = vpop.eup %3451  ;;  %v2710_v35 = vunpack.c.l.bf16 %v3450_v59  ;;  %v2950_v59 = vld [vmem:[#allocation3 + $0x8] sm:$0xff] }
0x225a   : > { %v2711_v36 = vunpack.c.l.bf16 %v3452_v34  ;;  %v2952_v34 = vld [vmem:[#allocation3 + $0x18] sm:$0xff]  ;;  %2966 = vst [vmem:[#allocation10 + $0x8] sm:$0xff] %v2950_v59 }
0x225b   : > { %v2712_v37 = vmul.f32 0.025, %v2710_v35  ;;  %v2953_v35 = vld [vmem:[#allocation3 + $0x20] sm:$0xff]  ;;  %2968 = vst [vmem:[#allocation10 + $0x18] sm:$0xff] %v2952_v34 }
0x225c   : > { %v2717_v38 = vmul.f32 %v2716_v33, %v2711_v36  ;;  %v2951_v33 = vld [vmem:[#allocation3 + $0x10] sm:$0xff]  ;;  %v2954_v36 = vld [vmem:[#allocation3 + $0x28] sm:$0xff]  ;;  %2969 = vst [vmem:[#allocation10 + $0x20] sm:$0xff] %v2953_v35 }
0x225d   : > { %v2713_v39 = vadd.f32 %v2712_v37, %v2658_v15  ;;  %2967 = vst [vmem:[#allocation10 + $0x10] sm:$0xff] %v2951_v33  ;;  %v2955_v37 = vld [vmem:[#allocation3 + $0x30] sm:$0xff]  ;;  %2970 = vst [vmem:[#allocation10 + $0x28] sm:$0xff] %v2954_v36 }
0x225e   : > { %2971 = vst [vmem:[#allocation10 + $0x30] sm:$0xff] %v2955_v37 }
0x225f   : > { %v2718_v40 = vadd.f32 %v2717_v38, %v2713_v39  ;;  %v2956_v38 = vld [vmem:[#allocation3 + $0x38] sm:$0xff]  ;;  %v2957_v39 = vld [vmem:[#allocation3 + $0x40] sm:$0xff] }
0x2260   : > { %2972 = vst [vmem:[#allocation10 + $0x38] sm:$0xff] %v2956_v38  ;;  %2973 = vst [vmem:[#allocation10 + $0x40] sm:$0xff] %v2957_v39 }
0x2261   : > { %v2719_v41 = vpack.c.bf16 %v2718_v40, %v2718_v40 }
0x2263   : > { %2753 = vmatmul.mubr.bf16.vlgmr.msra.gmra.mrb[8].mxu0 %v2719_v41  ;;  %v2959_v41 = vld [vmem:[#allocation3 + $0x50] sm:$0xff] }
0x2264   : > { %2836 = vmatpush1.bf16.msra.mxu0 %v4713_v19  ;;  %2867 = vmatprep.mubr.bf16.mxu0 %v3656_v1  ;;  %2975 = vst [vmem:[#allocation10 + $0x50] sm:$0xff] %v2959_v41 }
0x2265   : > { %2837 = vmatprep.subr.bf16.mxu0 %v4717_v20 }
0x2268   : > { %2838 = vmatpush1.bf16.msra.mxu0 %v4723_v21 }
0x2269   : > { %2839 = vmatprep.subr.bf16.mxu0 %v4728_v57 }
0x226c   : > { %2840 = vmatpush1.bf16.msra.mxu0 %v4738_v2 }
0x226d   : > { %2841 = vmatprep.subr.bf16.mxu0 %v4743_v3 }
0x2270   : > { %2842 = vmatpush1.bf16.msra.mxu0 %v4750_v4 }
0x2271   : > { %2843 = vmatprep.subr.bf16.mxu0 %v4755_v5 }
0x2274   : > { %2844 = vmatpush1.bf16.msra.mxu0 %v4762_v6 }
0x2275   : > { %2845 = vmatprep.subr.bf16.mxu0 %v4767_v7 }
0x2278   : > { %2846 = vmatpush1.bf16.msra.mxu0 %v4774_v8 }
0x2279   : > { %2847 = vmatprep.subr.bf16.mxu0 %v4779_v9 }
0x227c   : > { %2848 = vmatpush1.bf16.msra.mxu0 %v4786_v10 }
0x227d   : > { %2849 = vmatprep.subr.bf16.mxu0 %v4791_v11 }
0x2280   : > { %2850 = vmatpush1.bf16.msra.mxu0 %v4798_v12 }
0x2336   : > { %v2754_v18 = vpop.f32.mrb[8].mxu0 }
0x2337   : > { %v2761_v42 = vpack.c.bf16 %v2754_v18, %v2754_v18  ;;  %v2756_v60 = vpop.f32.mrb[9].mxu0  ;;  %v2960_v18 = vld [vmem:[#allocation3 + $0x58] sm:$0xff] }
0x2338   : > { %v2762_v29 = vpack.c.bf16 %v2756_v60, %v2756_v60  ;;  %v2758_v23 = vpop.f32.mrb[10].mxu0  ;;  %2976 = vst [vmem:[#allocation10 + $0x58] sm:$0xff] %v2960_v18 }
0x2339   : > { %3453 = vtanh.bf16 %v2761_v42  ;;  %v2759_v17 = vpop.f32.mrb[11].mxu0  ;;  %v2961_v42 = vld [vmem:[#allocation3 + $0x60] sm:$0xff] }
0x233a   : > { %3455 = vtanh.bf16 %v2762_v29  ;;  %2977 = vst [vmem:[#allocation10 + $0x60] sm:$0xff] %v2961_v42 }
0x2344   : > { %v3454_v44 = vpop.eup %3453 }
0x2345   : > { %v3456_v46 = vpop.eup %3455  ;;  %v2765_v47 = vunpack.c.l.bf16 %v3454_v44 }
0x2346   : > { %v2766_v48 = vunpack.c.l.bf16 %v3456_v46  ;;  %v2941_v46 = vunpack.c.h.bf16 %v3208_v14 }
0x2347   : > { %v2767_v49 = vmul.f32 0.025, %v2765_v47 }
0x2348   : > { %v2772_v50 = vmul.f32 %v2771_v45, %v2766_v48 }
0x2349   : > { %v2768_v51 = vadd.f32 %v2767_v49, %v2718_v40  ;;  %v2958_v40 = vld [vmem:[#allocation3 + $0x48] sm:$0xff] }
0x234a   : > { %2974 = vst [vmem:[#allocation10 + $0x48] sm:$0xff] %v2958_v40 }
0x234b   : > { %v2773_v52 = vadd.f32 %v2772_v50, %v2768_v51 }
0x234d   : > { %v2774_v53 = vpack.c.bf16 %v2773_v52, %v2773_v52 }
0x234f   : > { %2808 = vmatmul.mubr.bf16.vlgmr.msra.gmra.mrb[8].mxu1 %v2774_v53 }
0x2350   : > { %2891 = vmatpush1.bf16.msra.mxu1 %v4713_v19  ;;  %2922 = vmatprep.mubr.bf16.mxu1 %v3656_v1 }
0x2351   : > { %2892 = vmatprep.subr.bf16.mxu1 %v4717_v20 }
0x2354   : > { %2893 = vmatpush1.bf16.msra.mxu1 %v4723_v21 }
0x2355   : > { %2894 = vmatprep.subr.bf16.mxu1 %v4728_v57 }
0x2358   : > { %2895 = vmatpush1.bf16.msra.mxu1 %v4738_v2 }
0x2359   : > { %2896 = vmatprep.subr.bf16.mxu1 %v4743_v3 }
0x235c   : > { %2897 = vmatpush1.bf16.msra.mxu1 %v4750_v4  ;;  %v2826_v4 = vunpack.c.h.bf16 %v3206_v43 }
0x235d   : > { %2898 = vmatprep.subr.bf16.mxu1 %v4755_v5 }
0x2360   : > { %2899 = vmatpush1.bf16.msra.mxu1 %v4762_v6 }
0x2361   : > { %2900 = vmatprep.subr.bf16.mxu1 %v4767_v7 }
0x2364   : > { %2901 = vmatpush1.bf16.msra.mxu1 %v4774_v8 }
0x2365   : > { %2902 = vmatprep.subr.bf16.mxu1 %v4779_v9 }
0x2368   : > { %2903 = vmatpush1.bf16.msra.mxu1 %v4786_v10 }
0x2369   : > { %2904 = vmatprep.subr.bf16.mxu1 %v4791_v11 }
0x236c   : > { %2905 = vmatpush1.bf16.msra.mxu1 %v4798_v12 }
0x2422   : > { %v2809_v19 = vpop.f32.mrb[8].mxu1 }
0x2423   : > { %v2816_v20 = vpack.c.bf16 %v2809_v19, %v2809_v19  ;;  %v2811_v21 = vpop.f32.mrb[9].mxu1 }
0x2424   : > { %v2817_v57 = vpack.c.bf16 %v2811_v21, %v2811_v21  ;;  %v2813_v1 = vpop.f32.mrb[10].mxu1 }
0x2425   : > { %3457 = vtanh.bf16 %v2816_v20  ;;  %v2814_v2 = vpop.f32.mrb[11].mxu1 }
0x2426   : > { %3459 = vtanh.bf16 %v2817_v57 }
0x2430   : > { %v3458_v3 = vpop.eup %3457 }
0x2431   : > { %v3460_v5 = vpop.eup %3459  ;;  %v2820_v6 = vunpack.c.l.bf16 %v3458_v3 }
0x2432   : > { %v2821_v7 = vunpack.c.l.bf16 %v3460_v5 }
0x2433   : > { %v2822_v8 = vmul.f32 0.025, %v2820_v6 }
0x2434   : > { %v2827_v9 = vmul.f32 %v2826_v4, %v2821_v7 }
0x2435   : > { %v2823_v10 = vadd.f32 %v2822_v8, %v2773_v52 }
0x2437   : > { %v2828_v11 = vadd.f32 %v2827_v9, %v2823_v10 }
0x2439   : > { %v2829_v54 = vsub.f32 %v2828_v11, %v2773_v52  ;;  %v2834_v12 = vpack.c.bf16 %v2828_v11, %v2828_v11 }
0x243b   : > { %v2830_v55 = vmul.f32 0.33333334, %v2829_v54  ;;  %2868 = vmatmul.mubr.bf16.vlgmr.msra.gmra.mrb[12].mxu0 %v2834_v12 }
0x243d   : > { %v2831_v61 = vadd.f32 %v2830_v55, %v2773_v52 }
0x243f   : > { %2979 = vst [vmem:[#allocation10 + $0x70] sm:$0xff] %v2831_v61 }
0x250e   : > { %v2869_v62 = vpop.f32.mrb[12].mxu0 }
0x250f   : > { %v2876_v63 = vpack.c.bf16 %v2869_v62, %v2869_v62  ;;  %v2871_v58 = vpop.f32.mrb[13].mxu0 }
0x2510   : > { %v2877_v0 = vpack.c.bf16 %v2871_v58, %v2871_v58  ;;  %v2873_v22 = vpop.f32.mrb[14].mxu0 }
0x2511   : > { %3461 = vtanh.bf16 %v2876_v63  ;;  %v2874_v13 = vpop.f32.mrb[15].mxu0 }
0x2512   : > { %3463 = vtanh.bf16 %v2877_v0 }
0x251c   : > { %v3462_v15 = vpop.eup %3461 }
0x251d   : > { %v3464_v24 = vpop.eup %3463  ;;  %v2880_v25 = vunpack.c.l.bf16 %v3462_v15 }
0x251e   : > { %v2881_v26 = vunpack.c.l.bf16 %v3464_v24 }
0x251f   : > { %v2882_v27 = vmul.f32 0.025, %v2880_v25 }
0x2520   : > { %v2887_v56 = vmul.f32 %v2886_v16, %v2881_v26 }
0x2521   : > { %v2883_v28 = vadd.f32 %v2882_v27, %v2828_v11 }
0x2523   : > { %v2888_v30 = vadd.f32 %v2887_v56, %v2883_v28 }
0x2525   : > { %v2889_v31 = vpack.c.bf16 %v2888_v30, %v2888_v30 }
0x2527   : > { %2923 = vmatmul.mubr.bf16.vlgmr.msra.gmra.mrb[12].mxu1 %v2889_v31 }
0x25fa   : > { %v2924_v60 = vpop.f32.mrb[12].mxu1 }
0x25fb   : > { %v2931_v29 = vpack.c.bf16 %v2924_v60, %v2924_v60  ;;  %v2926_v23 = vpop.f32.mrb[13].mxu1 }
0x25fc   : > { %v2932_v17 = vpack.c.bf16 %v2926_v23, %v2926_v23  ;;  %v2928_v43 = vpop.f32.mrb[14].mxu1 }
0x25fd   : > { %3465 = vtanh.bf16 %v2931_v29  ;;  %v2929_v44 = vpop.f32.mrb[15].mxu1 }
0x25fe   : > { %3467 = vtanh.bf16 %v2932_v17 }
0x2608   : > { %v3466_v45 = vpop.eup %3465 }
0x2609   : > { %v3468_v47 = vpop.eup %3467  ;;  %v2935_v48 = vunpack.c.l.bf16 %v3466_v45 }
0x260a   : > { %v2936_v49 = vunpack.c.l.bf16 %v3468_v47 }
0x260b   : > { %v2937_v50 = vmul.f32 0.025, %v2935_v48 }
0x260c   : > { %v2942_v51 = vmul.f32 %v2941_v46, %v2936_v49 }
0x260d   : > { %v2938_v52 = vadd.f32 %v2937_v50, %v2888_v30 }
0x260f   : > { %v2943_v53 = vadd.f32 %v2942_v51, %v2938_v52 }
0x2611   : > { %v2944_v19 = vsub.f32 %v2943_v53, %v2888_v30  ;;  %2948 = vst [vmem:[#allocation2] sm:$0xff] %v2943_v53 }
0x2613   : > { %v2945_v20 = vadd.f32 %v2944_v19, %v2888_v30 }
0x2615   : > { %2980 = vst [vmem:[#allocation10 + $0x78] sm:$0xff] %v2945_v20 }
0x2616 PF: > { %p3245_p8 = scmp.eq.s32.totalorder %s3709_s18, 4  ;;  %s3657_s15 = smov [#allocation10]  }
0x2617   : > { %s2989_s20 = sshll.u32 %s3657_s15, 4  ;;  %s2990_s20 = int_to_ptr.vmem [resolvable:$true] %s2989_s20 }
0x2618   : > { %s3555_s23 = scalar_lea.vmem %s2990_s20, 2048  ;;  %p3562_p12 = scmp.lt.s32.totalorder %s2990_s20, %s2990_s20 }
0x2619   : > { %p3556_p1 = scmp.ne.s32.totalorder %s2990_s20, %s3555_s23  ;;  %p3563_p4 = scmp.lt.s32.totalorder %s3555_s23, %s3555_s23 }
0x261b   : > { %p3557_p2 = pnand %p3556_p1, %p3245_p8  ;;  %p3564_p5 = por %p3563_p4, %p3562_p12 }
0x261d   : > { %p3558_p6 = pneg %p3557_p2 }
0x261f   : > { %p3565_p7 = pnand %p3564_p5, %p3558_p6 }
0x2621   : > { %3568 = shalt.err (!%p3565_p7)
}
0x2622   : > { %s3569_s6 = scalar_lea.hbm %s4955_s3, 2048 }
0x2623   : > { %p3570_p3 = scmp.ne.s32.totalorder %s4955_s3, %s3569_s6  ;;  %p3575_p0 = scmp.lt.u32.totalorder %s3569_s6, %s4955_s3 }
0x2625   : > { %p3571_p9 = pnand %p3570_p3, %p3245_p8 }
0x2627   : > { %p3572_p10 = pneg %p3571_p9 }
0x2629   : > { %p3577_p11 = pnand %p3575_p0, %p3572_p10 }
0x262b   : > { %3580 = shalt.err (!%p3577_p11)
}
0x262c   : > { %s3658_s8 = smov 128   ;;  %s3659_s12 = smov 8  }
0x262d   : > { %3226 = dma.vmem_to_hbm [thread:$0]  (%p3245_p8), %s2990_s20, 2048, %s4955_s3, [#allocation6], %s3658_s8, %s3658_s8, %s3659_s12  }
0x262e   : > { %3618 = dma.done.wait (%p3245_p8), [#allocation6], 2048  }
0x262f   : > { %3620 = vsyncadd (%p3245_p8), [#allocation6], 4294965248 }
0x2630 PF: > { %s16_s17 = sadd.s32 1, %s3643_s17   ;;  %s4971_s12 = smov %s3627_s13 }
0x2631   : > { %p13_p13 = scmp.ge.s32.totalorder %s16_s17, 7   ;;  %s4972_s13 = smov %s3631_s14 }
0x2632   : > { %s4973_s14 = smov %s3802_s30  ;;  %s4974_s15 = smov %s3639_s16 }
0x2633   : > { %s4975_s16 = smov %s4977_s9  ;;  %15 = sbr.rel (!%p13_p13) target bundleno = 5 (0x5), region = 152 }
0x263a   :  { %3005 = vsyncpa [#allocation5], 1 }
0x263b   :  { %3007 = vsyncpa [#allocation5 + $0x1], 1 }
0x263c   :  { %3008 = vsyncpa [#allocation8], 1 }
0x263d   :  { %3009 = vsyncpa [#allocation6], 1 }
0x263e   :  { %3011 = vsyncpa [#allocation6 + $0x1], 1 }

</bundles_post_ra>
